<compile_context>
chip_gen: v7x
topology: tpu7x:2x2x1
jax: 0.10.0
libtpu: 0.0.40
codegen_flags: <defaults>
</compile_context>

<pallas_src>
import math

import jax
import jax.numpy as jnp
from jax.experimental import pallas as pl
from jax.experimental.pallas import tpu as pltpu

LANE = 128          # TPU lane width: keep feature dims lane-dense
MAX_TB = 512        # cap for the batch tile (well under VMEM on all gens)


def _round_up(n, m):
    return ((n + m - 1) // m) * m


def _choose_batch_tile(B, max_tile=MAX_TB):
    """Adaptive batch tile: minimize padded rows, keep tile count even when >1."""
    n_tiles = -(-B // max_tile)
    if n_tiles == 1 and B > 64:
        n_tiles = 2                       # let v7x's two TCs split the batch
    elif n_tiles > 1 and n_tiles % 2 == 1:
        n_tiles += 1                      # even tile count for a clean 2-way split
    tb = _round_up(-(-B // n_tiles), 8)
    return max(tb, 8)


def autoencoder_kernel(
    x_ref,
    w1, b1, w2, b2, w3, b3, w4, b4,      # encoder
    w5, b5, w6, b6, w7, b7, w8, b8,      # decoder
    out_ref,
):
    """One batch tile of the full 8-layer MLP chain (weights resident in VMEM)."""

    def lin(h, w_ref, b_ref):
        # bf16 matmul inputs on the MXU, f32 accumulation, f32 bias add (VPU).
        return (
            jnp.dot(h.astype(jnp.bfloat16), w_ref[...],
                    preferred_element_type=jnp.float32)
            + b_ref[...]
        )

    def act(h):
        # LeakyReLU(0.1) without the compare: max(x, 0.1x).
        return jnp.maximum(h, 0.1 * h)

    h = x_ref[...]                        # bf16 input tile

    # ---- encoder ----
    h = act(lin(h, w1, b1))               # D_pad -> 512
    h = act(lin(h, w2, b2))               # 512   -> 256
    h = act(lin(h, w3, b3))               # 256   -> 128
    h = act(lin(h, w4, b4))               # 128   -> E_pad (E zero-padded to 128)

    # ---- decoder ----
    h = act(lin(h, w5, b5))               # E_pad -> 128 (padded rows of w5 are 0)
    h = act(lin(h, w6, b6))               # 128 -> 256
    h = act(lin(h, w7, b7))               # 256 -> 512
    h = lin(h, w8, b8)                    # 512 -> D_pad  (no activation)

    out_ref[...] = h.astype(out_ref.dtype)


def init_params(key, input_dim, encoding_dim=2,
                w_dtype=jnp.bfloat16, b_dtype=jnp.float32):
    """Deterministic parameter init (uniform fan-in, like torch's default).

    Weights stored in bf16 (halved HBM traffic + bf16 MXU path); biases in f32.
    """
    dims = [
        (input_dim, 512), (512, 256), (256, 128), (128, encoding_dim),   # encoder
        (encoding_dim, 128), (128, 256), (256, 512), (512, input_dim),   # decoder
    ]
    params = []
    for fan_in, fan_out in dims:
        key, kw, kb = jax.random.split(key, 3)
        bound = 1.0 / math.sqrt(fan_in)
        w = jax.random.uniform(kw, (fan_in, fan_out), jnp.float32,
                               -bound, bound).astype(w_dtype)
        b = jax.random.uniform(kb, (1, fan_out), jnp.float32,
                               -bound, bound).astype(b_dtype)
        params.append((w, b))
    return params


def prepare_params(params, input_dim, lane=LANE):
    """One-time layout prep (hoisted out of the per-call hot path).

    Zero-pads: w1 rows / w8 cols / b8 to D_pad, w4 cols / b4 to E_pad,
    w5 rows to E_pad.  All padding is numerically inert.
    Returns (prepped_params, D_pad).
    """
    D = input_dim
    D_pad = _round_up(max(D, lane), lane)
    E = params[3][0].shape[1]
    E_pad = _round_up(max(E, lane), lane)

    prepped = []
    for i, (w, b) in enumerate(params):
        fi, fo = w.shape
        fi_p, fo_p = fi, fo
        if i == 0:
            fi_p = D_pad
        if i == 3:
            fo_p = E_pad
        if i == 4:
            fi_p = E_pad
        if i == 7:
            fo_p = D_pad
        wp = jnp.zeros((fi_p, fo_p), jnp.bfloat16).at[:fi, :fo].set(
            w.astype(jnp.bfloat16))
        bp = jnp.zeros((1, fo_p), jnp.float32).at[:, :fo].set(
            b.astype(jnp.float32).reshape(1, -1))
        prepped.append((jax.device_put(wp), jax.device_put(bp)))
    return prepped, D_pad


def autoencoder_forward(x, prepped_params, d_pad, *, batch_tile=None):
    """Pallas autoencoder forward: batch-tiled parallel grid, resident bf16 weights."""
    B, D = x.shape
    out_dtype = x.dtype

    TB = batch_tile if batch_tile is not None else _choose_batch_tile(B)
    B_pad = _round_up(B, TB)

    # x handed to the kernel in bf16 (layer 1 consumes bf16 anyway); zero
    # padding is inert through the network.
    xp = jnp.zeros((B_pad, d_pad), jnp.bfloat16).at[:B, :D].set(
        x.astype(jnp.bfloat16))

    flat_args = [xp]
    in_specs = [pl.BlockSpec((TB, d_pad), lambda i: (i, 0))]
    for (w, b) in prepped_params:
        flat_args += [w, b]
        # Full-array blocks + constant index_map: parameters stay resident in
        # VMEM across all batch tiles (no per-tile re-DMA).
        in_specs += [
            pl.BlockSpec(w.shape, lambda i: (0, 0)),
            pl.BlockSpec(b.shape, lambda i: (0, 0)),
        ]

    out = pl.pallas_call(
        autoencoder_kernel,
        out_shape=jax.ShapeDtypeStruct((B_pad, d_pad), jnp.float32),
        grid=(B_pad // TB,),
        in_specs=in_specs,
        out_specs=pl.BlockSpec((TB, d_pad), lambda i: (i, 0)),
        compiler_params=pltpu.CompilerParams(
            dimension_semantics=("parallel",),   # shard batch tiles across TCs (v7x)
            vmem_limit_bytes=32 * 1024 * 1024,   # safe on v5e/v6e/v7x, ample headroom
        ),
    )(*flat_args)

    return out[:B, :D].astype(out_dtype)


def autoencoder_forward_ref(x, params):
    """Pure-JAX reference mimicking the kernel numerics:
    bf16 matmul inputs (all layers) with f32 accumulation, f32 bias/LeakyReLU."""
    h = x.astype(jnp.float32)
    n = len(params)
    for i, (w, b) in enumerate(params):
        wf = w.astype(jnp.float32)          # weights stored in bf16
        bf = b.astype(jnp.float32).reshape(1, -1)
        h = jnp.dot(h.astype(jnp.bfloat16).astype(jnp.float32), wf,
                    precision=jax.lax.Precision.HIGHEST) + bf
        if i != n - 1:
            h = jnp.maximum(h, 0.1 * h)
    return h.astype(x.dtype)


if __name__ == "__main__":
    key = jax.random.PRNGKey(0)
    # B not a multiple of the batch tile, D not a multiple of 128: exercises the
    # adaptive batch tiling (2x152 for B=300) and the lane-dense feature padding.
    B, D, E = 300, 64, 2

    kx, kp = jax.random.split(key)
    x = jax.random.normal(kx, (B, D), dtype=jnp.float32)
    params = init_params(kp, input_dim=D, encoding_dim=E)
    prepped, d_pad = prepare_params(params, input_dim=D)

    out = jax.block_until_ready(autoencoder_forward(x, prepped, d_pad))
    ref = autoencoder_forward_ref(x, params)

    assert out.shape == (B, D)
    max_err = float(jnp.max(jnp.abs(out - ref)))
    assert jnp.allclose(out, ref, atol=2e-3, rtol=2e-3), (
        f"mismatch vs JAX reference (max abs err {max_err:.3e})")

    print("KERNEL_OK")
</pallas_src>

<mosaic_0001>
module attributes {stable_mosaic.version = 11 : i64} {
  func.func @autoencoder_kernel(%arg0: i32, %arg1: memref<152x128xbf16, #tpu.memory_space<vmem>>, %arg2: memref<128x512xbf16, #tpu.memory_space<vmem>>, %arg3: memref<1x512xf32, #tpu.memory_space<vmem>>, %arg4: memref<512x256xbf16, #tpu.memory_space<vmem>>, %arg5: memref<1x256xf32, #tpu.memory_space<vmem>>, %arg6: memref<256x128xbf16, #tpu.memory_space<vmem>>, %arg7: memref<1x128xf32, #tpu.memory_space<vmem>>, %arg8: memref<128x128xbf16, #tpu.memory_space<vmem>>, %arg9: memref<1x128xf32, #tpu.memory_space<vmem>>, %arg10: memref<128x128xbf16, #tpu.memory_space<vmem>>, %arg11: memref<1x128xf32, #tpu.memory_space<vmem>>, %arg12: memref<128x256xbf16, #tpu.memory_space<vmem>>, %arg13: memref<1x256xf32, #tpu.memory_space<vmem>>, %arg14: memref<256x512xbf16, #tpu.memory_space<vmem>>, %arg15: memref<1x512xf32, #tpu.memory_space<vmem>>, %arg16: memref<512x128xbf16, #tpu.memory_space<vmem>>, %arg17: memref<1x128xf32, #tpu.memory_space<vmem>>, %arg18: memref<152x128xf32, #tpu.memory_space<vmem>>) attributes {dimension_semantics = [#tpu.dimension_semantics<parallel>], iteration_bounds = array<i64: 2>, scalar_prefetch = 0 : i64, scratch_operands = 0 : i64, tpu.core_type = #tpu.core_type<tc>, window_params = [{transform_indices = @transform_0, window_bounds = array<i64: 152, 128>}, {pipeline_mode = #tpu.pipeline_mode<synchronous>, transform_indices = @transform_1, window_bounds = array<i64: 128, 512>}, {pipeline_mode = #tpu.pipeline_mode<synchronous>, transform_indices = @transform_2, window_bounds = array<i64: 1, 512>}, {pipeline_mode = #tpu.pipeline_mode<synchronous>, transform_indices = @transform_3, window_bounds = array<i64: 512, 256>}, {pipeline_mode = #tpu.pipeline_mode<synchronous>, transform_indices = @transform_4, window_bounds = array<i64: 1, 256>}, {pipeline_mode = #tpu.pipeline_mode<synchronous>, transform_indices = @transform_5, window_bounds = array<i64: 256, 128>}, {pipeline_mode = #tpu.pipeline_mode<synchronous>, transform_indices = @transform_6, window_bounds = array<i64: 1, 128>}, {pipeline_mode = #tpu.pipeline_mode<synchronous>, transform_indices = @transform_7, window_bounds = array<i64: 128, 128>}, {pipeline_mode = #tpu.pipeline_mode<synchronous>, transform_indices = @transform_8, window_bounds = array<i64: 1, 128>}, {pipeline_mode = #tpu.pipeline_mode<synchronous>, transform_indices = @transform_9, window_bounds = array<i64: 128, 128>}, {pipeline_mode = #tpu.pipeline_mode<synchronous>, transform_indices = @transform_10, window_bounds = array<i64: 1, 128>}, {pipeline_mode = #tpu.pipeline_mode<synchronous>, transform_indices = @transform_11, window_bounds = array<i64: 128, 256>}, {pipeline_mode = #tpu.pipeline_mode<synchronous>, transform_indices = @transform_12, window_bounds = array<i64: 1, 256>}, {pipeline_mode = #tpu.pipeline_mode<synchronous>, transform_indices = @transform_13, window_bounds = array<i64: 256, 512>}, {pipeline_mode = #tpu.pipeline_mode<synchronous>, transform_indices = @transform_14, window_bounds = array<i64: 1, 512>}, {pipeline_mode = #tpu.pipeline_mode<synchronous>, transform_indices = @transform_15, window_bounds = array<i64: 512, 128>}, {pipeline_mode = #tpu.pipeline_mode<synchronous>, transform_indices = @transform_16, window_bounds = array<i64: 1, 128>}, {transform_indices = @transform_17, window_bounds = array<i64: 152, 128>}]} {
    %c0 = arith.constant 0 : index
    %c0_0 = arith.constant 0 : index
    %0 = vector.load %arg1[%c0, %c0_0] : memref<152x128xbf16, #tpu.memory_space<vmem>>, vector<152x128xbf16>
    %c0_1 = arith.constant 0 : index
    %c0_2 = arith.constant 0 : index
    %1 = vector.load %arg2[%c0_1, %c0_2] : memref<128x512xbf16, #tpu.memory_space<vmem>>, vector<128x512xbf16>
    %cst = arith.constant dense<0.000000e+00> : vector<152x512xf32>
    %2 = tpu.matmul %0, %1, %cst {dimension_numbers = #tpu.dot_dimension_numbers<[1], [0], [0], [1], [0, 0, 1, 1], [], []>} : vector<152x128xbf16>, vector<128x512xbf16>, vector<152x512xf32> -> vector<152x512xf32>
    %c0_3 = arith.constant 0 : index
    %c0_4 = arith.constant 0 : index
    %3 = vector.load %arg3[%c0_3, %c0_4] : memref<1x512xf32, #tpu.memory_space<vmem>>, vector<1x512xf32>
    %4 = vector.broadcast %3 : vector<1x512xf32> to vector<152x512xf32>
    %5 = arith.addf %2, %4 : vector<152x512xf32>
    %cst_5 = arith.constant 1.000000e-01 : f32
    %6 = vector.broadcast %cst_5 : f32 to vector<152x512xf32>
    %7 = arith.mulf %6, %5 : vector<152x512xf32>
    %8 = arith.maximumf %5, %7 : vector<152x512xf32>
    %9 = arith.truncf %8 : vector<152x512xf32> to vector<152x512xbf16>
    %c0_6 = arith.constant 0 : index
    %c0_7 = arith.constant 0 : index
    %10 = vector.load %arg4[%c0_6, %c0_7] : memref<512x256xbf16, #tpu.memory_space<vmem>>, vector<512x256xbf16>
    %cst_8 = arith.constant dense<0.000000e+00> : vector<152x256xf32>
    %11 = tpu.matmul %9, %10, %cst_8 {dimension_numbers = #tpu.dot_dimension_numbers<[1], [0], [0], [1], [0, 0, 1, 1], [], []>} : vector<152x512xbf16>, vector<512x256xbf16>, vector<152x256xf32> -> vector<152x256xf32>
    %c0_9 = arith.constant 0 : index
    %c0_10 = arith.constant 0 : index
    %12 = vector.load %arg5[%c0_9, %c0_10] : memref<1x256xf32, #tpu.memory_space<vmem>>, vector<1x256xf32>
    %13 = vector.broadcast %12 : vector<1x256xf32> to vector<152x256xf32>
    %14 = arith.addf %11, %13 : vector<152x256xf32>
    %cst_11 = arith.constant 1.000000e-01 : f32
    %15 = vector.broadcast %cst_11 : f32 to vector<152x256xf32>
    %16 = arith.mulf %15, %14 : vector<152x256xf32>
    %17 = arith.maximumf %14, %16 : vector<152x256xf32>
    %18 = arith.truncf %17 : vector<152x256xf32> to vector<152x256xbf16>
    %c0_12 = arith.constant 0 : index
    %c0_13 = arith.constant 0 : index
    %19 = vector.load %arg6[%c0_12, %c0_13] : memref<256x128xbf16, #tpu.memory_space<vmem>>, vector<256x128xbf16>
    %cst_14 = arith.constant dense<0.000000e+00> : vector<152x128xf32>
    %20 = tpu.matmul %18, %19, %cst_14 {dimension_numbers = #tpu.dot_dimension_numbers<[1], [0], [0], [1], [0, 0, 1, 1], [], []>} : vector<152x256xbf16>, vector<256x128xbf16>, vector<152x128xf32> -> vector<152x128xf32>
    %c0_15 = arith.constant 0 : index
    %c0_16 = arith.constant 0 : index
    %21 = vector.load %arg7[%c0_15, %c0_16] : memref<1x128xf32, #tpu.memory_space<vmem>>, vector<1x128xf32>
    %22 = vector.broadcast %21 : vector<1x128xf32> to vector<152x128xf32>
    %23 = arith.addf %20, %22 : vector<152x128xf32>
    %cst_17 = arith.constant 1.000000e-01 : f32
    %24 = vector.broadcast %cst_17 : f32 to vector<152x128xf32>
    %25 = arith.mulf %24, %23 : vector<152x128xf32>
    %26 = arith.maximumf %23, %25 : vector<152x128xf32>
    %27 = arith.truncf %26 : vector<152x128xf32> to vector<152x128xbf16>
    %c0_18 = arith.constant 0 : index
    %c0_19 = arith.constant 0 : index
    %28 = vector.load %arg8[%c0_18, %c0_19] : memref<128x128xbf16, #tpu.memory_space<vmem>>, vector<128x128xbf16>
    %cst_20 = arith.constant dense<0.000000e+00> : vector<152x128xf32>
    %29 = tpu.matmul %27, %28, %cst_20 {dimension_numbers = #tpu.dot_dimension_numbers<[1], [0], [0], [1], [0, 0, 1, 1], [], []>} : vector<152x128xbf16>, vector<128x128xbf16>, vector<152x128xf32> -> vector<152x128xf32>
    %c0_21 = arith.constant 0 : index
    %c0_22 = arith.constant 0 : index
    %30 = vector.load %arg9[%c0_21, %c0_22] : memref<1x128xf32, #tpu.memory_space<vmem>>, vector<1x128xf32>
    %31 = vector.broadcast %30 : vector<1x128xf32> to vector<152x128xf32>
    %32 = arith.addf %29, %31 : vector<152x128xf32>
    %cst_23 = arith.constant 1.000000e-01 : f32
    %33 = vector.broadcast %cst_23 : f32 to vector<152x128xf32>
    %34 = arith.mulf %33, %32 : vector<152x128xf32>
    %35 = arith.maximumf %32, %34 : vector<152x128xf32>
    %36 = arith.truncf %35 : vector<152x128xf32> to vector<152x128xbf16>
    %c0_24 = arith.constant 0 : index
    %c0_25 = arith.constant 0 : index
    %37 = vector.load %arg10[%c0_24, %c0_25] : memref<128x128xbf16, #tpu.memory_space<vmem>>, vector<128x128xbf16>
    %cst_26 = arith.constant dense<0.000000e+00> : vector<152x128xf32>
    %38 = tpu.matmul %36, %37, %cst_26 {dimension_numbers = #tpu.dot_dimension_numbers<[1], [0], [0], [1], [0, 0, 1, 1], [], []>} : vector<152x128xbf16>, vector<128x128xbf16>, vector<152x128xf32> -> vector<152x128xf32>
    %c0_27 = arith.constant 0 : index
    %c0_28 = arith.constant 0 : index
    %39 = vector.load %arg11[%c0_27, %c0_28] : memref<1x128xf32, #tpu.memory_space<vmem>>, vector<1x128xf32>
    %40 = vector.broadcast %39 : vector<1x128xf32> to vector<152x128xf32>
    %41 = arith.addf %38, %40 : vector<152x128xf32>
    %cst_29 = arith.constant 1.000000e-01 : f32
    %42 = vector.broadcast %cst_29 : f32 to vector<152x128xf32>
    %43 = arith.mulf %42, %41 : vector<152x128xf32>
    %44 = arith.maximumf %41, %43 : vector<152x128xf32>
    %45 = arith.truncf %44 : vector<152x128xf32> to vector<152x128xbf16>
    %c0_30 = arith.constant 0 : index
    %c0_31 = arith.constant 0 : index
    %46 = vector.load %arg12[%c0_30, %c0_31] : memref<128x256xbf16, #tpu.memory_space<vmem>>, vector<128x256xbf16>
    %cst_32 = arith.constant dense<0.000000e+00> : vector<152x256xf32>
    %47 = tpu.matmul %45, %46, %cst_32 {dimension_numbers = #tpu.dot_dimension_numbers<[1], [0], [0], [1], [0, 0, 1, 1], [], []>} : vector<152x128xbf16>, vector<128x256xbf16>, vector<152x256xf32> -> vector<152x256xf32>
    %c0_33 = arith.constant 0 : index
    %c0_34 = arith.constant 0 : index
    %48 = vector.load %arg13[%c0_33, %c0_34] : memref<1x256xf32, #tpu.memory_space<vmem>>, vector<1x256xf32>
    %49 = vector.broadcast %48 : vector<1x256xf32> to vector<152x256xf32>
    %50 = arith.addf %47, %49 : vector<152x256xf32>
    %cst_35 = arith.constant 1.000000e-01 : f32
    %51 = vector.broadcast %cst_35 : f32 to vector<152x256xf32>
    %52 = arith.mulf %51, %50 : vector<152x256xf32>
    %53 = arith.maximumf %50, %52 : vector<152x256xf32>
    %54 = arith.truncf %53 : vector<152x256xf32> to vector<152x256xbf16>
    %c0_36 = arith.constant 0 : index
    %c0_37 = arith.constant 0 : index
    %55 = vector.load %arg14[%c0_36, %c0_37] : memref<256x512xbf16, #tpu.memory_space<vmem>>, vector<256x512xbf16>
    %cst_38 = arith.constant dense<0.000000e+00> : vector<152x512xf32>
    %56 = tpu.matmul %54, %55, %cst_38 {dimension_numbers = #tpu.dot_dimension_numbers<[1], [0], [0], [1], [0, 0, 1, 1], [], []>} : vector<152x256xbf16>, vector<256x512xbf16>, vector<152x512xf32> -> vector<152x512xf32>
    %c0_39 = arith.constant 0 : index
    %c0_40 = arith.constant 0 : index
    %57 = vector.load %arg15[%c0_39, %c0_40] : memref<1x512xf32, #tpu.memory_space<vmem>>, vector<1x512xf32>
    %58 = vector.broadcast %57 : vector<1x512xf32> to vector<152x512xf32>
    %59 = arith.addf %56, %58 : vector<152x512xf32>
    %cst_41 = arith.constant 1.000000e-01 : f32
    %60 = vector.broadcast %cst_41 : f32 to vector<152x512xf32>
    %61 = arith.mulf %60, %59 : vector<152x512xf32>
    %62 = arith.maximumf %59, %61 : vector<152x512xf32>
    %63 = arith.truncf %62 : vector<152x512xf32> to vector<152x512xbf16>
    %c0_42 = arith.constant 0 : index
    %c0_43 = arith.constant 0 : index
    %64 = vector.load %arg16[%c0_42, %c0_43] : memref<512x128xbf16, #tpu.memory_space<vmem>>, vector<512x128xbf16>
    %cst_44 = arith.constant dense<0.000000e+00> : vector<152x128xf32>
    %65 = tpu.matmul %63, %64, %cst_44 {dimension_numbers = #tpu.dot_dimension_numbers<[1], [0], [0], [1], [0, 0, 1, 1], [], []>} : vector<152x512xbf16>, vector<512x128xbf16>, vector<152x128xf32> -> vector<152x128xf32>
    %c0_45 = arith.constant 0 : index
    %c0_46 = arith.constant 0 : index
    %66 = vector.load %arg17[%c0_45, %c0_46] : memref<1x128xf32, #tpu.memory_space<vmem>>, vector<1x128xf32>
    %67 = vector.broadcast %66 : vector<1x128xf32> to vector<152x128xf32>
    %68 = arith.addf %65, %67 : vector<152x128xf32>
    %c0_47 = arith.constant 0 : index
    %c0_48 = arith.constant 0 : index
    %69 = vector.load %arg18[%c0_47, %c0_48] : memref<152x128xf32, #tpu.memory_space<vmem>>, vector<152x128xf32>
    tpu.vector_store %arg18[%c0_47, %c0_48], %68 {strides = array<i32>} : memref<152x128xf32, #tpu.memory_space<vmem>>, vector<152x128xf32>,
    return
  }
  func.func @transform_0(%arg0: i32) -> (i32, i32) {
    %c0_i32 = arith.constant 0 : i32
    %c0_i32_0 = arith.constant 0 : i32
    return %arg0, %c0_i32 : i32, i32
  }
  func.func @transform_1(%arg0: i32) -> (i32, i32) {
    %c0_i32 = arith.constant 0 : i32
    %c0_i32_0 = arith.constant 0 : i32
    %c0_i32_1 = arith.constant 0 : i32
    return %c0_i32, %c0_i32_0 : i32, i32
  }
  func.func @transform_2(%arg0: i32) -> (i32, i32) {
    %c0_i32 = arith.constant 0 : i32
    %c0_i32_0 = arith.constant 0 : i32
    %c0_i32_1 = arith.constant 0 : i32
    return %c0_i32, %c0_i32_0 : i32, i32
  }
  func.func @transform_3(%arg0: i32) -> (i32, i32) {
    %c0_i32 = arith.constant 0 : i32
    %c0_i32_0 = arith.constant 0 : i32
    %c0_i32_1 = arith.constant 0 : i32
    return %c0_i32, %c0_i32_0 : i32, i32
  }
  func.func @transform_4(%arg0: i32) -> (i32, i32) {
    %c0_i32 = arith.constant 0 : i32
    %c0_i32_0 = arith.constant 0 : i32
    %c0_i32_1 = arith.constant 0 : i32
    return %c0_i32, %c0_i32_0 : i32, i32
  }
  func.func @transform_5(%arg0: i32) -> (i32, i32) {
    %c0_i32 = arith.constant 0 : i32
    %c0_i32_0 = arith.constant 0 : i32
    %c0_i32_1 = arith.constant 0 : i32
    return %c0_i32, %c0_i32_0 : i32, i32
  }
  func.func @transform_6(%arg0: i32) -> (i32, i32) {
    %c0_i32 = arith.constant 0 : i32
    %c0_i32_0 = arith.constant 0 : i32
    %c0_i32_1 = arith.constant 0 : i32
    return %c0_i32, %c0_i32_0 : i32, i32
  }
  func.func @transform_7(%arg0: i32) -> (i32, i32) {
    %c0_i32 = arith.constant 0 : i32
    %c0_i32_0 = arith.constant 0 : i32
    %c0_i32_1 = arith.constant 0 : i32
    return %c0_i32, %c0_i32_0 : i32, i32
  }
  func.func @transform_8(%arg0: i32) -> (i32, i32) {
    %c0_i32 = arith.constant 0 : i32
    %c0_i32_0 = arith.constant 0 : i32
    %c0_i32_1 = arith.constant 0 : i32
    return %c0_i32, %c0_i32_0 : i32, i32
  }
  func.func @transform_9(%arg0: i32) -> (i32, i32) {
    %c0_i32 = arith.constant 0 : i32
    %c0_i32_0 = arith.constant 0 : i32
    %c0_i32_1 = arith.constant 0 : i32
    return %c0_i32, %c0_i32_0 : i32, i32
  }
  func.func @transform_10(%arg0: i32) -> (i32, i32) {
    %c0_i32 = arith.constant 0 : i32
    %c0_i32_0 = arith.constant 0 : i32
    %c0_i32_1 = arith.constant 0 : i32
    return %c0_i32, %c0_i32_0 : i32, i32
  }
  func.func @transform_11(%arg0: i32) -> (i32, i32) {
    %c0_i32 = arith.constant 0 : i32
    %c0_i32_0 = arith.constant 0 : i32
    %c0_i32_1 = arith.constant 0 : i32
    return %c0_i32, %c0_i32_0 : i32, i32
  }
  func.func @transform_12(%arg0: i32) -> (i32, i32) {
    %c0_i32 = arith.constant 0 : i32
    %c0_i32_0 = arith.constant 0 : i32
    %c0_i32_1 = arith.constant 0 : i32
    return %c0_i32, %c0_i32_0 : i32, i32
  }
  func.func @transform_13(%arg0: i32) -> (i32, i32) {
    %c0_i32 = arith.constant 0 : i32
    %c0_i32_0 = arith.constant 0 : i32
    %c0_i32_1 = arith.constant 0 : i32
    return %c0_i32, %c0_i32_0 : i32, i32
  }
  func.func @transform_14(%arg0: i32) -> (i32, i32) {
    %c0_i32 = arith.constant 0 : i32
    %c0_i32_0 = arith.constant 0 : i32
    %c0_i32_1 = arith.constant 0 : i32
    return %c0_i32, %c0_i32_0 : i32, i32
  }
  func.func @transform_15(%arg0: i32) -> (i32, i32) {
    %c0_i32 = arith.constant 0 : i32
    %c0_i32_0 = arith.constant 0 : i32
    %c0_i32_1 = arith.constant 0 : i32
    return %c0_i32, %c0_i32_0 : i32, i32
  }
  func.func @transform_16(%arg0: i32) -> (i32, i32) {
    %c0_i32 = arith.constant 0 : i32
    %c0_i32_0 = arith.constant 0 : i32
    %c0_i32_1 = arith.constant 0 : i32
    return %c0_i32, %c0_i32_0 : i32, i32
  }
  func.func @transform_17(%arg0: i32) -> (i32, i32) {
    %c0_i32 = arith.constant 0 : i32
    %c0_i32_0 = arith.constant 0 : i32
    return %arg0, %c0_i32 : i32, i32
  }
}

</mosaic_0001>

<bundles_post_ra>
// kernel: tpu_custom_call.1
= control target key start
LH: loop header
LB: loop body
LE: loop exit
PB: predicated region body
PF: predicated region fallthrough
CT: control target
= control target key end

     0   :  { %s7373_s0 = inlined_call_operand.hbm [shape: bf16[304,128], index: 0, kind: input, shape index: {}]   ;;  %s7374_s1 = inlined_call_operand.hbm [shape: bf16[128,512], index: 1, kind: input, shape index: {}]   ;;  %s7375_s2 = inlined_call_operand.vmem [shape: f32[1,512], index: 2, kind: input, shape index: {}]   ;;  %s7376_s3 = inlined_call_operand.hbm [shape: bf16[512,256], index: 3, kind: input, shape index: {}]   ;;  %s7377_s4 = inlined_call_operand.vmem [shape: f32[1,256], index: 4, kind: input, shape index: {}]   ;;  %s7378_s5 = inlined_call_operand.hbm [shape: bf16[256,128], index: 5, kind: input, shape index: {}]   ;;  %s7379_s6 = inlined_call_operand.vmem [shape: f32[1,128], index: 6, kind: input, shape index: {}]   ;;  %s7380_s7 = inlined_call_operand.hbm [shape: bf16[128,128], index: 7, kind: input, shape index: {}]   ;;  %s7381_s8 = inlined_call_operand.vmem [shape: f32[1,128], index: 8, kind: input, shape index: {}]   ;;  %s7382_s9 = inlined_call_operand.hbm [shape: bf16[128,128], index: 9, kind: input, shape index: {}]   ;;  %s7383_s10 = inlined_call_operand.vmem [shape: f32[1,128], index: 10, kind: input, shape index: {}]   ;;  %s7384_s11 = inlined_call_operand.hbm [shape: bf16[128,256], index: 11, kind: input, shape index: {}]   ;;  %s7385_s12 = inlined_call_operand.vmem [shape: f32[1,256], index: 12, kind: input, shape index: {}]   ;;  %s7386_s13 = inlined_call_operand.hbm [shape: bf16[256,512], index: 13, kind: input, shape index: {}]   ;;  %s7387_s14 = inlined_call_operand.vmem [shape: f32[1,512], index: 14, kind: input, shape index: {}]   ;;  %s7388_s15 = inlined_call_operand.hbm [shape: bf16[512,128], index: 15, kind: input, shape index: {}]   ;;  %s7389_s16 = inlined_call_operand.vmem [shape: f32[1,128], index: 16, kind: input, shape index: {}]   ;;  %s7390_s17 = inlined_call_operand.hbm [shape: f32[304,128], index: 17, kind: output, shape index: {}]  }
   0x1   :  { %7403 = sst [smem:[#allocation24_spill]] %s7373_s0 }
   0x2   :  { %7404 = sst [smem:[#allocation25_spill]] %s7374_s1 }
   0x3   :  { %7405 = sst [smem:[#allocation26_spill]] %s7376_s3 }
   0x4   :  { %7406 = sst [smem:[#allocation27_spill]] %s7377_s4 }
   0x5   :  { %7407 = sst [smem:[#allocation28_spill]] %s7378_s5 }
   0x6   :  { %7408 = sst [smem:[#allocation29_spill]] %s7379_s6 }
   0x7   :  { %7409 = sst [smem:[#allocation30_spill]] %s7380_s7 }
   0x8   :  { %7410 = sst [smem:[#allocation31_spill]] %s7381_s8 }
   0x9   :  { %7411 = sst [smem:[#allocation32_spill]] %s7382_s9 }
   0xa   :  { %7412 = sst [smem:[#allocation33_spill]] %s7383_s10 }
   0xb   :  { %7413 = sst [smem:[#allocation34_spill]] %s7384_s11 }
   0xc   :  { %7414 = sst [smem:[#allocation35_spill]] %s7385_s12 }
   0xd   :  { %7415 = sst [smem:[#allocation36_spill]] %s7387_s14 }
   0xe   :  { %7416 = sst [smem:[#allocation37_spill]] %s7389_s16 }
   0xf   :  { %7417 = sst [smem:[#allocation38_spill]] %s7390_s17 }
  0x10   :  { %22 = vsyncpa [#allocation3], 0 }
  0x11   :  { %24 = vsyncpa [#allocation3 + $0x1], 0 }
  0x12   :  { %25 = vsyncpa [#allocation6], 0 }
  0x13   :  { %26 = vsyncpa [#allocation9], 0 }
  0x14   :  { %27 = vsyncpa [#allocation12], 0 }
  0x15   :  { %28 = vsyncpa [#allocation15], 0 }
  0x16   :  { %29 = vsyncpa [#allocation4], 0 }
  0x17   :  { %31 = vsyncpa [#allocation4 + $0x1], 0  ;;  %s6440_s24 = smov 0   ;;  %s6442_s25 = smov 0  }
  0x18   :  { %s6444_s26 = smov 0   ;;  %s6446_s27 = smov 0  }
  0x19 LB: > { %s6331_s28 = smov [#allocation5]   ;;  %s6461_s0 = sadd.s32 4294967295, %s6329_s27   ;;  %s6329_s27 = sphi %s6446_s27, %s7460_s27   ;;  %s6325_s26 = sphi %s6444_s26, %s7459_s26   ;;  %s6321_s25 = sphi %s6442_s25, %s7458_s25   ;;  %s6317_s24 = sphi %s6440_s24, %s7457_s24  }
  0x1a   : > { %s442_s29 = sshll.u32 %s6331_s28, 4  ;;  %p4807_p0 = scmp.ge.s32.totalorder %s6329_s27, 1  ;;  %s6466_s29 = int_to_ptr.vmem [resolvable:$true] %s442_s29 }
  0x1b   : > { %p7395_p1 = scmp.eq.s32.totalorder %s6461_s0, 0  ;;  %p430_p2 = scmp.lt.s32.totalorder %s6329_s27, 3 }
  0x1c   : > { %s6332_s18 = smov [#allocation8]   ;;  %s6333_s20 = smov [#allocation11]  }
  0x1d   : > { %p6468_p3 = pnand %p4807_p0, %p430_p2  ;;  %s474_s19 = sshll.u32 %s6332_s18, 4  ;;  %s6481_s19 = int_to_ptr.vmem [resolvable:$true] %s474_s19 }
  0x1e   : > { %s6483_s21 = sshll.u32 %s6333_s20, 4  ;;  %s7420_s28 = sld [smem:[#allocation25_spill]]  ;;  %s507_s21 = int_to_ptr.vmem [resolvable:$true] %s6483_s21 }
  0x1f   : > { %s7418_s30 = scalar_select %p6468_p3, 1, 0 }
  0x20   : > { %p5555_p5 = pneg %p6468_p3 }
  0x22   : > { %p6477_p6 = pnand %p5555_p5, %p7395_p1 }
  0x24   : > { %s5993_s17 = scalar_lea.hbm %s7420_s28, 4096  ;;  %p6493_p8 = pneg %p6477_p6 }
  0x25   : > { %p5994_p7 = scmp.ne.s32.totalorder %s7420_s28, %s5993_s17  ;;  %p6000_p11 = scmp.lt.u32.totalorder %s5993_s17, %s7420_s28 }
  0x27   : > { %p5996_p9 = pnand %p6493_p8, %p5994_p7 }
  0x29   : > { %p5997_p10 = pneg %p5996_p9 }
  0x2b   : > { %p6002_p12 = pnand %p6000_p11, %p5997_p10 }
  0x2d   : > { %6005 = shalt.err (!%p6002_p12)
}
  0x2e   : > { %s6006_s14 = scalar_lea.vmem %s6466_s29, 4096  ;;  %p6014_p5 = scmp.lt.s32.totalorder %s6466_s29, %s6466_s29 }
  0x2f   : > { %p6007_p13 = scmp.ne.s32.totalorder %s6466_s29, %s6006_s14  ;;  %p6015_p4 = scmp.lt.s32.totalorder %s6006_s14, %s6006_s14 }
  0x31   : > { %p6009_p0 = pnand %p6007_p13, %p6493_p8  ;;  %p6016_p7 = por %p6015_p4, %p6014_p5 }
  0x33   : > { %p6010_p2 = pneg %p6009_p0 }
  0x35   : > { %p6017_p9 = pnand %p6016_p7, %p6010_p2 }
  0x37   : > { %6020 = shalt.err (!%p6017_p9)
}
  0x38   : > { %s7394_s16 = smov 256   ;;  %s7397_s12 = smov 16  }
  0x39   : > { %5558 = dma.hbm_to_vmem [thread:$0]  (!%p6477_p6), %s7420_s28, 4096, %s6466_s29, [#allocation6], %s7394_s16, %s7394_s16, %s7397_s12  }
  0x3a   : > { %s7422_s5 = sld [smem:[#allocation28_spill]] }
  0x40   : > { %s6021_s14 = scalar_lea.hbm %s7422_s5, 2048 }
  0x41   : > { %p6022_p4 = scmp.ne.s32.totalorder %s7422_s5, %s6021_s14  ;;  %p6028_p12 = scmp.lt.u32.totalorder %s6021_s14, %s7422_s5 }
  0x43   : > { %p6024_p10 = pnand %p6022_p4, %p6493_p8 }
  0x45   : > { %p6025_p11 = pneg %p6024_p10 }
  0x47   : > { %p6030_p13 = pnand %p6028_p12, %p6025_p11 }
  0x49   : > { %6033 = shalt.err (!%p6030_p13)
}
  0x4a   : > { %s6034_s29 = scalar_lea.vmem %s6481_s19, 2048  ;;  %p6042_p7 = scmp.lt.s32.totalorder %s6481_s19, %s6481_s19 }
  0x4b   : > { %p6035_p0 = scmp.ne.s32.totalorder %s6481_s19, %s6034_s29  ;;  %p6043_p9 = scmp.lt.s32.totalorder %s6034_s29, %s6034_s29 }
  0x4d   : > { %p6037_p2 = pnand %p6035_p0, %p6493_p8  ;;  %p6044_p4 = por %p6043_p9, %p6042_p7 }
  0x4f   : > { %p6038_p5 = pneg %p6037_p2 }
  0x51   : > { %p6045_p10 = pnand %p6044_p4, %p6038_p5 }
  0x53   : > { %6048 = shalt.err (!%p6045_p10)
}
  0x54   : > { %s7398_s8 = smov 64   ;;  %s7400_s4 = smov 4  }
  0x55   : > { %5564 = dma.hbm_to_vmem [thread:$0]  (!%p6477_p6), %s7422_s5, 2048, %s6481_s19, [#allocation9], %s7398_s8, %s7398_s8, %s7400_s4  }
  0x56   : > { %s7423_s9 = sld [smem:[#allocation32_spill]] }
  0x5c   : > { %s6049_s23 = scalar_lea.hbm %s7423_s9, 1024 }
  0x5d   : > { %p6050_p11 = scmp.ne.s32.totalorder %s7423_s9, %s6049_s23  ;;  %p6056_p0 = scmp.lt.u32.totalorder %s6049_s23, %s7423_s9 }
  0x5f   : > { %p6052_p12 = pnand %p6050_p11, %p6493_p8 }
  0x61   : > { %p6053_p13 = pneg %p6052_p12 }
  0x63   : > { %p6058_p2 = pnand %p6056_p0, %p6053_p13 }
  0x65   : > { %6061 = shalt.err (!%p6058_p2)
}
  0x66   : > { %s6062_s6 = scalar_lea.vmem %s507_s21, 1024  ;;  %p6070_p4 = scmp.lt.s32.totalorder %s507_s21, %s507_s21 }
  0x67   : > { %p6063_p5 = scmp.ne.s32.totalorder %s507_s21, %s6062_s6  ;;  %p6071_p10 = scmp.lt.s32.totalorder %s6062_s6, %s6062_s6 }
  0x69   : > { %p6065_p7 = pnand %p6063_p5, %p6493_p8  ;;  %p6072_p1 = por %p6071_p10, %p6070_p4 }
  0x6b   : > { %p6066_p9 = pneg %p6065_p7 }
  0x6d   : > { %p6073_p3 = pnand %p6072_p1, %p6066_p9 }
  0x6f   : > { %6076 = shalt.err (!%p6073_p3)
}
  0x70   : > { %5570 = dma.hbm_to_vmem [thread:$0]  (!%p6477_p6), %s7423_s9, 1024, %s507_s21, [#allocation12], %s7398_s8, %s7398_s8, %s7400_s4  }
  0x71   : > { %s6338_s10 = smov [#allocation14]   ;;  %s6339_s22 = smov [#allocation7]  }
  0x72   : > { %s538_s17 = sshll.u32 %s6338_s10, 4  ;;  %s458_s23 = sshll.u32 %s6339_s22, 4  ;;  %s539_s17 = int_to_ptr.vmem [resolvable:$true] %s538_s17  ;;  %s459_s23 = int_to_ptr.vmem [resolvable:$true] %s458_s23 }
  0x73   : > { %s6077_s29 = scalar_lea.hbm %s7386_s13, 8192 }
  0x74   : > { %p6078_p1 = scmp.ne.s32.totalorder %s7386_s13, %s6077_s29  ;;  %p6084_p12 = scmp.lt.u32.totalorder %s6077_s29, %s7386_s13 }
  0x76   : > { %p6080_p3 = pnand %p6078_p1, %p6493_p8 }
  0x78   : > { %p6081_p11 = pneg %p6080_p3 }
  0x7a   : > { %p6086_p13 = pnand %p6084_p12, %p6081_p11 }
  0x7c   : > { %6089 = shalt.err (!%p6086_p13)
}
  0x7d   : > { %s6090_s21 = scalar_lea.vmem %s539_s17, 8192  ;;  %p6098_p7 = scmp.lt.s32.totalorder %s539_s17, %s539_s17 }
  0x7e   : > { %p6091_p0 = scmp.ne.s32.totalorder %s539_s17, %s6090_s21  ;;  %p6099_p9 = scmp.lt.s32.totalorder %s6090_s21, %s6090_s21 }
  0x80   : > { %p6093_p2 = pnand %p6091_p0, %p6493_p8  ;;  %p6100_p4 = por %p6099_p9, %p6098_p7 }
  0x82   : > { %p6094_p5 = pneg %p6093_p2 }
  0x84   : > { %p6101_p10 = pnand %p6100_p4, %p6094_p5 }
  0x86   : > { %6104 = shalt.err (!%p6101_p10)
}
  0x87   : > { %s7424_s12 = smov 16   ;;  %s7425_s16 = smov 256  }
  0x88   : > { %5576 = dma.hbm_to_vmem [thread:$0]  (!%p6477_p6), %s7386_s13, 8192, %s539_s17, [#allocation15], %s7425_s16, %s7425_s16, %s7424_s12  }
  0x89   : > { %s7426_s3 = sld [smem:[#allocation26_spill]] }
  0x8f   : > { %s6105_s14 = scalar_lea.hbm %s7426_s3, 8192 }
  0x90   : > { %p6106_p1 = scmp.ne.s32.totalorder %s7426_s3, %s6105_s14  ;;  %p6112_p12 = scmp.lt.u32.totalorder %s6105_s14, %s7426_s3 }
  0x92   : > { %p6108_p3 = pnand %p6106_p1, %p6493_p8 }
  0x94   : > { %p6109_p11 = pneg %p6108_p3 }
  0x96   : > { %p6114_p13 = pnand %p6112_p12, %p6109_p11 }
  0x98   : > { %6117 = shalt.err (!%p6114_p13)
}
  0x99   : > { %s6118_s5 = scalar_lea.vmem %s459_s23, 8192  ;;  %p6126_p7 = scmp.lt.s32.totalorder %s459_s23, %s459_s23 }
  0x9a   : > { %p6119_p0 = scmp.ne.s32.totalorder %s459_s23, %s6118_s5  ;;  %p6127_p9 = scmp.lt.s32.totalorder %s6118_s5, %s6118_s5 }
  0x9c   : > { %p6121_p2 = pnand %p6119_p0, %p6493_p8  ;;  %p6128_p4 = por %p6127_p9, %p6126_p7 }
  0x9e   : > { %p6122_p5 = pneg %p6121_p2 }
  0xa0   : > { %p6129_p10 = pnand %p6128_p4, %p6122_p5 }
  0xa2   : > { %6132 = shalt.err (!%p6129_p10)
}
  0xa3   : > { %s6340_s17 = smov 128   ;;  %s6341_s12 = smov 8  }
  0xa4   : > { %5561 = dma.hbm_to_vmem [thread:$0]  (!%p6477_p6), %s7426_s3, 8192, %s459_s23, [#allocation6], %s6340_s17, %s6340_s17, %s6341_s12  }
  0xa5   : > { %s6342_s22 = smov [#allocation10]   ;;  %s6343_s14 = smov [#allocation13]  }
  0xa6   : > { %s490_s20 = sshll.u32 %s6342_s22, 4  ;;  %s522_s29 = sshll.u32 %s6343_s14, 4  ;;  %s491_s20 = int_to_ptr.vmem [resolvable:$true] %s490_s20  ;;  %s523_s29 = int_to_ptr.vmem [resolvable:$true] %s522_s29 }
  0xa7   : > { %s7427_s7 = sld [smem:[#allocation30_spill]] }
  0xad   : > { %s6133_s21 = scalar_lea.hbm %s7427_s7, 1024 }
  0xae   : > { %p6134_p1 = scmp.ne.s32.totalorder %s7427_s7, %s6133_s21  ;;  %p6140_p12 = scmp.lt.u32.totalorder %s6133_s21, %s7427_s7 }
  0xb0   : > { %p6136_p3 = pnand %p6134_p1, %p6493_p8 }
  0xb2   : > { %p6137_p11 = pneg %p6136_p3 }
  0xb4   : > { %p6142_p13 = pnand %p6140_p12, %p6137_p11 }
  0xb6   : > { %6145 = shalt.err (!%p6142_p13)
}
  0xb7   : > { %s6146_s23 = scalar_lea.vmem %s491_s20, 1024  ;;  %p6154_p7 = scmp.lt.s32.totalorder %s491_s20, %s491_s20 }
  0xb8   : > { %p6147_p0 = scmp.ne.s32.totalorder %s491_s20, %s6146_s23  ;;  %p6155_p9 = scmp.lt.s32.totalorder %s6146_s23, %s6146_s23 }
  0xba   : > { %p6149_p2 = pnand %p6147_p0, %p6493_p8  ;;  %p6156_p4 = por %p6155_p9, %p6154_p7 }
  0xbc   : > { %p6150_p5 = pneg %p6149_p2 }
  0xbe   : > { %p6157_p10 = pnand %p6156_p4, %p6150_p5 }
  0xc0   : > { %6160 = shalt.err (!%p6157_p10)
}
  0xc1   : > { %s7428_s8 = smov 4   ;;  %s7429_s16 = smov 64  }
  0xc2   : > { %5567 = dma.hbm_to_vmem [thread:$0]  (!%p6477_p6), %s7427_s7, 1024, %s491_s20, [#allocation9], %s7429_s16, %s7429_s16, %s7428_s8  }
  0xc3   : > { %s7430_s11 = sld [smem:[#allocation34_spill]] }
  0xc9   : > { %s6161_s14 = scalar_lea.hbm %s7430_s11, 2048 }
  0xca   : > { %p6162_p1 = scmp.ne.s32.totalorder %s7430_s11, %s6161_s14  ;;  %p6168_p12 = scmp.lt.u32.totalorder %s6161_s14, %s7430_s11 }
  0xcc   : > { %p6164_p3 = pnand %p6162_p1, %p6493_p8 }
  0xce   : > { %p6165_p11 = pneg %p6164_p3 }
  0xd0   : > { %p6170_p13 = pnand %p6168_p12, %p6165_p11 }
  0xd2   : > { %6173 = shalt.err (!%p6170_p13)
}
  0xd3   : > { %s6174_s23 = scalar_lea.vmem %s523_s29, 2048  ;;  %p6182_p7 = scmp.lt.s32.totalorder %s523_s29, %s523_s29 }
  0xd4   : > { %p6175_p0 = scmp.ne.s32.totalorder %s523_s29, %s6174_s23  ;;  %p6183_p9 = scmp.lt.s32.totalorder %s6174_s23, %s6174_s23 }
  0xd6   : > { %p6177_p2 = pnand %p6175_p0, %p6493_p8  ;;  %p6184_p4 = por %p6183_p9, %p6182_p7 }
  0xd8   : > { %p6178_p5 = pneg %p6177_p2 }
  0xda   : > { %p6185_p10 = pnand %p6184_p4, %p6178_p5 }
  0xdc   : > { %6188 = shalt.err (!%p6185_p10)
}
  0xdd   : > { %5573 = dma.hbm_to_vmem [thread:$0]  (!%p6477_p6), %s7430_s11, 2048, %s523_s29, [#allocation12], %s6340_s17, %s6340_s17, %s6341_s12  }
  0xde   : > { %s6344_s4 = smov [#allocation16]   ;;  %s6189_s6 = scalar_lea.hbm %s7388_s15, 4096 }
  0xdf   : > { %s554_s10 = sshll.u32 %s6344_s4, 4  ;;  %p6190_p1 = scmp.ne.s32.totalorder %s7388_s15, %s6189_s6  ;;  %s555_s10 = int_to_ptr.vmem [resolvable:$true] %s554_s10 }
  0xe0   : > { %p6196_p12 = scmp.lt.u32.totalorder %s6189_s6, %s7388_s15 }
  0xe1   : > { %p6192_p3 = pnand %p6190_p1, %p6493_p8 }
  0xe3   : > { %p6193_p11 = pneg %p6192_p3 }
  0xe5   : > { %p6198_p13 = pnand %p6196_p12, %p6193_p11 }
  0xe7   : > { %6201 = shalt.err (!%p6198_p13)
}
  0xe8   : > { %s6202_s17 = scalar_lea.vmem %s555_s10, 4096  ;;  %p6210_p7 = scmp.lt.s32.totalorder %s555_s10, %s555_s10 }
  0xe9   : > { %p6203_p0 = scmp.ne.s32.totalorder %s555_s10, %s6202_s17  ;;  %p6211_p9 = scmp.lt.s32.totalorder %s6202_s17, %s6202_s17 }
  0xeb   : > { %p6205_p2 = pnand %p6203_p0, %p6493_p8  ;;  %p6212_p4 = por %p6211_p9, %p6210_p7 }
  0xed   : > { %p6206_p5 = pneg %p6205_p2 }
  0xef   : > { %p6213_p10 = pnand %p6212_p4, %p6206_p5 }
  0xf1   : > { %6216 = shalt.err (!%p6213_p10)
}
  0xf2   : > { %5579 = dma.hbm_to_vmem [thread:$0]  (!%p6477_p6), %s7388_s15, 4096, %s555_s10, [#allocation15], %s7429_s16, %s7429_s16, %s7428_s8  }
  0xf3   : > { %s4806_s1 = sadd.s32 4294967294, %s6329_s27   ;;  %s6672_s18 = sadd.s32 1, %s6329_s27  }
  0xf4   : > { %s41_s20 = ssub.s32 %s6329_s27, %s6672_s18  ;;  %s44_s9 = sadd.s32 1, %s6325_s26 }
  0xf5   : > { %p42_p8 = scmp.eq.s32.totalorder %s41_s20, 0  ;;  %p51_p1 = scmp.ne.s32.totalorder %s6325_s26, %s6321_s25 }
  0xf6   : > { %p52_p3 = scmp.eq.s32.totalorder %s6329_s27, 0  ;;  %p57_p11 = scmp.ne.s32.totalorder %s6321_s25, %s6317_s24 }
  0xf7   : > { %s6683_s4 = scalar_select %p42_p8, %s6325_s26, %s44_s9  }
  0xf8   : > { %p53_p12 = por %p52_p3, %p51_p1  ;;  %p7431_p13 = scmp.eq.s32.totalorder %s6461_s0, 0 }
  0xf9   : > { %p417_p6 = scmp.eq.s32.totalorder %s6461_s0, 1  ;;  %p423_p2 = scmp.eq.s32.totalorder %s4806_s1, 1 }
  0xfa   : > { %p6687_p0 = por %p7431_p13, %p57_p11  ;;  %p5596_p5 = scmp.lt.s32.totalorder %s6329_s27, 2 }
  0xfb   : > { %s571_s10 = sand.u32 1, %s6325_s26   ;;  %p6694_p7 = por %p417_p6, %p51_p1 }
  0xfc   : > { %p6698_p9 = por %p423_p2, %p57_p11  ;;  %s5516_s19 = smul.u32 76, %s571_s10 }
  0xfd   : > { %s7433_s14 = scalar_select %p6694_p7, 1, 0 }
  0xfe   : > { %s7434_s6 = scalar_select %p6698_p9, 1, 0 }
  0xff   : > { %s5084_s21 = smul.u32 1216, %s6329_s27  ;;  %p6703_p4 = pnand %p5596_p5, %p53_p12 }
 0x100   : > { %s7436_s12 = sld [smem:[#allocation24_spill]]  ;;  %s575_s1 = scalar_lea.vmem [#allocation2], %s5516_s19 }
 0x101   : > { %s582_s20 = sshll.u32 %s575_s1, 4  ;;  %s6714_s9 = scalar_lea.sflag [#allocation3], %s571_s10  ;;  %s6712_s20 = int_to_ptr.vmem [resolvable:$true] %s582_s20 }
 0x102   : > { %p6219_p8 = pneg %p6703_p4 }
 0x106   : > { %s6710_s29 = scalar_lea.hbm %s7436_s12, %s5084_s21  ;;  %s6222_s17 = scalar_lea.hbm %s7436_s12, 2432 }
 0x107   : > { %s6217_s3 = scalar_lea.hbm %s6710_s29, 1216  ;;  %p6223_p11 = scmp.lt.u32.totalorder %s6710_s29, %s7436_s12 }
 0x108   : > { %p6218_p10 = scmp.ne.s32.totalorder %s6710_s29, %s6217_s3  ;;  %p6224_p12 = scmp.lt.u32.totalorder %s6222_s17, %s6217_s3 }
 0x109   : > { %p6226_p6 = scmp.lt.u32.totalorder %s6217_s3, %s6710_s29 }
 0x10a   : > { %p6220_p1 = pnand %p6219_p8, %p6218_p10  ;;  %p6225_p13 = por %p6224_p12, %p6223_p11 }
 0x10c   : > { %p6221_p3 = pneg %p6220_p1  ;;  %p6227_p2 = por %p6226_p6, %p6225_p13 }
 0x10e   : > { %p6228_p5 = pnand %p6227_p2, %p6221_p3 }
 0x110   : > { %6231 = shalt.err (!%p6228_p5)
}
 0x111   : > { %s6232_s10 = scalar_lea.vmem %s6712_s20, 1216  ;;  %s6345_s19 = smov [#allocation2]  }
 0x112   : > { %p6233_p10 = scmp.ne.s32.totalorder %s6712_s20, %s6232_s10  ;;  %s6237_s1 = sshll.u32 %s6345_s19, 4  ;;  %s6238_s1 = int_to_ptr.vmem [resolvable:$false] %s6237_s1 }
 0x113   : > { %s6239_s7 = scalar_lea.vmem %s6238_s1, 2432  ;;  %p6240_p7 = scmp.lt.s32.totalorder %s6712_s20, %s6238_s1 }
 0x114   : > { %p6235_p1 = pnand %p6233_p10, %p6219_p8  ;;  %p6241_p11 = scmp.lt.s32.totalorder %s6239_s7, %s6232_s10 }
 0x116   : > { %p6236_p9 = pneg %p6235_p1  ;;  %p6242_p12 = por %p6241_p11, %p6240_p7 }
 0x118   : > { %p6243_p13 = pnand %p6242_p12, %p6236_p9 }
 0x11a   : > { %6246 = shalt.err (!%p6243_p13)
}
 0x11b   : > { %5583 = dma.hbm_to_vmem [thread:$0]  (!%p6703_p4), %s6710_s29, 1216, %s6712_s20, %s6714_s9, %s7429_s16, %s7429_s16, %s7428_s8  }
 0x11c   : > { %p7437_p8 = scmp.ne.s32.totalorder %s7418_s30, 0 }
 0x11d   : > { %s6748_s3 = sand.u32 (!%p7437_p8), 1, %s6321_s25  }
 0x11e   : > { %594 = sbr.rel (%p7437_p8) target bundleno = 2325 (0x915), region = 88  ;;  %s597_s21 = scalar_lea.sflag (!%p7437_p8), [#allocation3], %s6748_s3 }
 0x11f   : > { %s5517_s11 = smul.u32 (!%p7437_p8), 76, %s6748_s3 }
 0x121   : > { %s6752_s23 = scalar_lea.vmem (!%p7437_p8), [#allocation2], %s5517_s11 }
 0x125   : > { %6292 = dma.done.wait (%p6687_p0), %s597_s21, 1216  }
 0x126   : > { %6294 = vsyncadd (%p6687_p0), %s597_s21, 4294966080  ;;  %p7438_p7 = scmp.eq.s32.totalorder %s6461_s0, 0 }
 0x128   : > { %6296 = dma.done.wait (%p7438_p7), [#allocation6], 12288   ;;  %p7439_p9 = pmov %p7438_p7 }
 0x129   : > { %p7440_p4 = pmov %p7438_p7 }
 0x12a   : > { %6298 = vsyncadd (%p7439_p9), [#allocation6], 4294955008 }
 0x12b   : > { %6300 = dma.done.wait (%p7440_p4), [#allocation9], 3072   ;;  %p7441_p3 = pmov %p7440_p4 }
 0x12d   : > { %6302 = vsyncadd (%p7441_p3), [#allocation9], 4294964224  ;;  %p7442_p6 = pmov %p7441_p3 }
 0x12e   : > { %p7443_p2 = pmov %p7441_p3 }
 0x12f   : > { %6304 = dma.done.wait (%p7442_p6), [#allocation12], 3072  }
 0x130   : > { %6306 = vsyncadd (%p7443_p2), [#allocation12], 4294964224  ;;  %p7444_p0 = pmov %p7443_p2 }
 0x132   : > { %6308 = dma.done.wait (%p7444_p0), [#allocation15], 12288   ;;  %p7445_p5 = pmov %p7444_p0 }
 0x133   : > { %v6346_v0 = vmov 0   ;;  %v5655_v1 = vld [vmem:[#allocation5 + $0x4] ss:$16 sps:$4 sm:$0xff]   ;;  %v5657_v2 = vld [vmem:[#allocation5] ss:$16 sps:$4 sm:$0xff]   ;;  %s7446_s5 = sld [smem:[#allocation27_spill]] }
 0x134   : > { %6310 = vsyncadd (%p7445_p5), [#allocation15], 4294955008  ;;  %1009 = vmatprep.mubr.bf16.mxu0 %v6346_v0  ;;  %1140 = vmatprep.mubr.bf16.mxu1 %v6346_v0  ;;  %v5658_v3 = vld [vmem:[#allocation5 + $0x24] ss:$16 sps:$4 sm:$0xff]   ;;  %v5660_v4 = vld [vmem:[#allocation5 + $0x20] ss:$16 sps:$4 sm:$0xff]  }
 0x135   : > { %977 = vmatprep.subr.bf16.mxu0 %v5655_v1  ;;  %v5661_v5 = vld [vmem:[#allocation5 + $0x44] ss:$16 sps:$4 sm:$0xff]   ;;  %v5663_v6 = vld [vmem:[#allocation5 + $0x40] ss:$16 sps:$4 sm:$0xff]   ;;  %v5685_v13 = vld [vmem:[#allocation5 + $0xc] ss:$16 sps:$4 sm:$0xff]  }
 0x136   : > { %978 = vmatpush1.bf16.msra.mxu0 %v5657_v2  ;;  %v5664_v7 = vld [vmem:[#allocation5 + $0x64] ss:$16 sps:$4 sm:$0xff]   ;;  %v5666_v8 = vld [vmem:[#allocation5 + $0x60] ss:$16 sps:$4 sm:$0xff]   ;;  %v5687_v14 = vld [vmem:[#allocation5 + $0x8] ss:$16 sps:$4 sm:$0xff]   ;;  %1108 = vmatprep.subr.bf16.mxu1 %v5685_v13  ;;  %v739_v13 = vlaneseq }
 0x137   : > { %979 = vmatprep.subr.bf16.mxu0 %v5658_v3  ;;  %v5667_v9 = vld [vmem:[#allocation5 + $0x84] ss:$16 sps:$4 sm:$0xff]   ;;  %v5669_v10 = vld [vmem:[#allocation5 + $0x80] ss:$16 sps:$4 sm:$0xff]   ;;  %v5688_v15 = vld [vmem:[#allocation5 + $0x2c] ss:$16 sps:$4 sm:$0xff]   ;;  %1109 = vmatpush1.bf16.msra.mxu1 %v5687_v14 }
 0x138   : > { %v5670_v11 = vld [vmem:[#allocation5 + $0xa4] ss:$16 sps:$4 sm:$0xff]   ;;  %v5672_v12 = vld [vmem:[#allocation5 + $0xa0] ss:$16 sps:$4 sm:$0xff]   ;;  %v5691_v17 = vld [vmem:[#allocation5 + $0x28] ss:$16 sps:$4 sm:$0xff]   ;;  %1110 = vmatprep.subr.bf16.mxu1 %v5688_v15 }
 0x139   : > { %v5673_v16 = vld [vmem:[#allocation5 + $0xc4] ss:$16 sps:$4 sm:$0xff]   ;;  %v5692_v18 = vld [vmem:[#allocation5 + $0x4c] ss:$16 sps:$4 sm:$0xff]   ;;  %v5675_v19 = vld [vmem:[#allocation5 + $0xc0] ss:$16 sps:$4 sm:$0xff]  }
 0x13a   : > { %980 = vmatpush1.bf16.msra.mxu0 %v5660_v4  ;;  %v5676_v20 = vld [vmem:[#allocation5 + $0xe4] ss:$16 sps:$4 sm:$0xff]   ;;  %v5694_v21 = vld [vmem:[#allocation5 + $0x48] ss:$16 sps:$4 sm:$0xff]   ;;  %v5695_v22 = vld [vmem:[#allocation5 + $0x6c] ss:$16 sps:$4 sm:$0xff]  }
 0x13b   : > { %981 = vmatprep.subr.bf16.mxu0 %v5661_v5  ;;  %1111 = vmatpush1.bf16.msra.mxu1 %v5691_v17  ;;  %v5678_v23 = vld [vmem:[#allocation5 + $0xe0] ss:$16 sps:$4 sm:$0xff]   ;;  %v5698_v24 = vld [vmem:[#allocation5 + $0x68] ss:$16 sps:$4 sm:$0xff]   ;;  %v5699_v25 = vld [vmem:[#allocation5 + $0x8c] ss:$16 sps:$4 sm:$0xff]  }
 0x13c   : > { %1112 = vmatprep.subr.bf16.mxu1 %v5692_v18  ;;  %v5679_v26 = vld [vmem:[%s6752_s23] sm:$0xff]   ;;  %v5680_v36 = vld [vmem:[%s6752_s23 + $0x8] sm:$0xff]   ;;  %v5681_v44 = vld [vmem:[%s6752_s23 + $0x10] sm:$0xff]   ;;  %v6804_v14 = vshrl.u32 %v739_v13, 7  ;;  %s7447_s9 = sld [smem:[#allocation29_spill]]  ;;  %s7448_s19 = sld [smem:[#allocation31_spill]] }
 0x13d   : > { %v5701_v27 = vld [vmem:[#allocation5 + $0x88] ss:$16 sps:$4 sm:$0xff]   ;;  %v5715_v29 = vld [vmem:[#allocation7 + $0x4] ss:$8 sps:$4 sm:$0xff]   ;;  %v5718_v31 = vld [vmem:[#allocation7 + $0x14] ss:$8 sps:$4 sm:$0xff]  }
 0x13e   : > { %982 = vmatpush1.bf16.msra.mxu0 %v5663_v6  ;;  %v5713_v28 = vld [vmem:[#allocation7] ss:$8 sps:$4 sm:$0xff]   ;;  %v5702_v30 = vld [vmem:[#allocation5 + $0xac] ss:$16 sps:$4 sm:$0xff]   ;;  %v5716_v33 = vld [vmem:[#allocation7 + $0x10] ss:$8 sps:$4 sm:$0xff]  }
 0x13f   : > { %983 = vmatprep.subr.bf16.mxu0 %v5664_v7  ;;  %1113 = vmatpush1.bf16.msra.mxu1 %v5694_v21  ;;  %v5705_v32 = vld [vmem:[#allocation5 + $0xa8] ss:$16 sps:$4 sm:$0xff]   ;;  %v5721_v34 = vld [vmem:[#allocation7 + $0x24] ss:$8 sps:$4 sm:$0xff]   ;;  %v5724_v39 = vld [vmem:[#allocation7 + $0x34] ss:$8 sps:$4 sm:$0xff]  }
 0x140   : > { %1114 = vmatprep.subr.bf16.mxu1 %v5695_v22  ;;  %v5706_v35 = vld [vmem:[#allocation5 + $0xcc] ss:$16 sps:$4 sm:$0xff]   ;;  %v5708_v37 = vld [vmem:[#allocation5 + $0xc8] ss:$16 sps:$4 sm:$0xff]   ;;  %v6807_v15 = vsub.s32 0, %v6804_v14  ;;  %v6813_v17 = vsub.s32 1, %v6804_v14 }
 0x141   : > { %v5719_v38 = vld [vmem:[#allocation7 + $0x20] ss:$8 sps:$4 sm:$0xff]   ;;  %v5709_v40 = vld [vmem:[#allocation5 + $0xec] ss:$16 sps:$4 sm:$0xff]   ;;  %v5722_v42 = vld [vmem:[#allocation7 + $0x30] ss:$8 sps:$4 sm:$0xff]  }
 0x142   : > { %984 = vmatpush1.bf16.msra.mxu0 %v5666_v8  ;;  %v5712_v41 = vld [vmem:[#allocation5 + $0xe8] ss:$16 sps:$4 sm:$0xff]   ;;  %v5727_v43 = vld [vmem:[#allocation7 + $0x44] ss:$8 sps:$4 sm:$0xff]   ;;  %v5730_v46 = vld [vmem:[#allocation7 + $0x54] ss:$8 sps:$4 sm:$0xff]  }
 0x143   : > { %985 = vmatprep.subr.bf16.mxu0 %v5667_v9  ;;  %1115 = vmatpush1.bf16.msra.mxu1 %v5698_v24  ;;  %v5725_v45 = vld [vmem:[#allocation7 + $0x40] ss:$8 sps:$4 sm:$0xff]   ;;  %v5728_v47 = vld [vmem:[#allocation7 + $0x50] ss:$8 sps:$4 sm:$0xff]   ;;  %v5733_v48 = vld [vmem:[#allocation7 + $0x64] ss:$8 sps:$4 sm:$0xff]  }
 0x144   : > { %1116 = vmatprep.subr.bf16.mxu1 %v5699_v25  ;;  %v5682_v49 = vld [vmem:[%s6752_s23 + $0x18] sm:$0xff]   ;;  %v5736_v51 = vld [vmem:[#allocation7 + $0x74] ss:$8 sps:$4 sm:$0xff]   ;;  %s7449_s11 = sld [smem:[#allocation33_spill]]  ;;  %s7450_s30 = sld [smem:[#allocation35_spill]] }
 0x145   : > { %v5731_v50 = vld [vmem:[#allocation7 + $0x60] ss:$8 sps:$4 sm:$0xff]   ;;  %v5734_v52 = vld [vmem:[#allocation7 + $0x70] ss:$8 sps:$4 sm:$0xff]   ;;  %v5739_v53 = vld [vmem:[#allocation7 + $0x84] ss:$8 sps:$4 sm:$0xff]  }
 0x146   : > { %986 = vmatpush1.bf16.msra.mxu0 %v5669_v10  ;;  %v5683_v54 = vld [vmem:[%s6752_s23 + $0x20] sm:$0xff]   ;;  %v5684_v59 = vld [vmem:[%s6752_s23 + $0x28] sm:$0xff]   ;;  %v5690_v1 = vld [vmem:[%s6752_s23 + $0x30] sm:$0xff]   ;;  %s7451_s22 = sld [smem:[#allocation36_spill]]  ;;  %s7452_s20 = sld [smem:[#allocation37_spill]] }
 0x147   : > { %987 = vmatprep.subr.bf16.mxu0 %v5670_v11  ;;  %1117 = vmatpush1.bf16.msra.mxu1 %v5701_v27  ;;  %v5737_v55 = vld [vmem:[#allocation7 + $0x80] ss:$8 sps:$4 sm:$0xff]   ;;  %v5742_v56 = vld [vmem:[#allocation7 + $0x94] ss:$8 sps:$4 sm:$0xff]   ;;  %v5740_v57 = vld [vmem:[#allocation7 + $0x90] ss:$8 sps:$4 sm:$0xff]  }
 0x148   : > { %1118 = vmatprep.subr.bf16.mxu1 %v5702_v30  ;;  %v5745_v58 = vld [vmem:[#allocation7 + $0xa4] ss:$8 sps:$4 sm:$0xff]   ;;  %v5743_v60 = vld [vmem:[#allocation7 + $0xa0] ss:$8 sps:$4 sm:$0xff]   ;;  %v5748_v61 = vld [vmem:[#allocation7 + $0xb4] ss:$8 sps:$4 sm:$0xff]  }
 0x149   : > { %v5746_v62 = vld [vmem:[#allocation7 + $0xb0] ss:$8 sps:$4 sm:$0xff]   ;;  %v5751_v63 = vld [vmem:[#allocation7 + $0xc4] ss:$8 sps:$4 sm:$0xff]   ;;  %v5749_v2 = vld [vmem:[#allocation7 + $0xc0] ss:$8 sps:$4 sm:$0xff]  }
 0x14a   : > { %988 = vmatpush1.bf16.msra.mxu0 %v5672_v12  ;;  %v5754_v3 = vld [vmem:[#allocation7 + $0xd4] ss:$8 sps:$4 sm:$0xff]   ;;  %v5752_v4 = vld [vmem:[#allocation7 + $0xd0] ss:$8 sps:$4 sm:$0xff]   ;;  %v5757_v8 = vld [vmem:[#allocation7 + $0xe4] ss:$8 sps:$4 sm:$0xff]  }
 0x14b   : > { %989 = vmatprep.subr.bf16.mxu0 %v5673_v16  ;;  %1119 = vmatpush1.bf16.msra.mxu1 %v5705_v32  ;;  %v5697_v5 = vld [vmem:[%s6752_s23 + $0x38] sm:$0xff]   ;;  %v5704_v6 = vld [vmem:[%s6752_s23 + $0x40] sm:$0xff]   ;;  %v5711_v7 = vld [vmem:[%s6752_s23 + $0x48] ss:$0 sps:$4 sm:$0xff]   ;;  %s5085_s10 = smul.u32 2432, %s6461_s0  ;;  %s4644_s0 = scalar_lea.sflag [#allocation4], %s6748_s3 }
 0x14c   : > { %1120 = vmatprep.subr.bf16.mxu1 %v5706_v35  ;;  %v5755_v9 = vld [vmem:[#allocation7 + $0xe0] ss:$8 sps:$4 sm:$0xff]   ;;  %v5760_v10 = vld [vmem:[#allocation7 + $0xf4] ss:$8 sps:$4 sm:$0xff]   ;;  %v5758_v11 = vld [vmem:[#allocation7 + $0xf0] ss:$8 sps:$4 sm:$0xff]  }
 0x14d   : > { %v5763_v12 = vld [vmem:[#allocation7 + $0x104] ss:$8 sps:$4 sm:$0xff]   ;;  %v737_v16 = vld [vmem:[%s7375_s2] sm:$0xf]  ;;  %v5772_v13 = vld [vmem:[#allocation7 + $0x134] ss:$8 sps:$4 sm:$0xff]  }
 0x14e   : > { %990 = vmatpush1.bf16.msra.mxu0 %v5675_v19  ;;  %v6816_v18 = vrot.slane %v737_v16, %v6807_v15  ;;  %v6819_v19 = vrot.slane %v737_v16, %v6813_v17  ;;  %p7454_p1 = scmp.ne.s32.totalorder %s7433_s14, 0 }
 0x14f   : > { %991 = vmatprep.subr.bf16.mxu0 %v5676_v20  ;;  %1121 = vmatpush1.bf16.msra.mxu1 %v5708_v37 }
 0x150   : > { %1122 = vmatprep.subr.bf16.mxu1 %v5709_v40 }
 0x152   : > { %992 = vmatpush1.bf16.msra.mxu0 %v5678_v23 }
 0x153   : > { %1827 = vmatprep.subr.bf16.mxu0 %v5715_v29  ;;  %1123 = vmatpush1.bf16.msra.mxu1 %v5712_v41 }
 0x155   : > { %1010 = vmatmul.mubr.bf16.vlgmr.msra.gmra.mrb[0].mxu0 %v5679_v26 }
 0x156   : > { %1019 = vmatprep.mubr.bf16.mxu0 %v6346_v0  ;;  %1828 = vmatpush1.bf16.msra.mxu0 %v5713_v28 }
 0x157   : > { %1829 = vmatprep.subr.bf16.mxu0 %v5718_v31  ;;  %1141 = vmatmul.mubr.bf16.vlgmr.msra.gmra.mrb[0].mxu1 %v5679_v26 }
 0x158   : > { %1150 = vmatprep.mubr.bf16.mxu1 %v6346_v0 }
 0x15a   : > { %1830 = vmatpush1.bf16.msra.mxu0 %v5716_v33 }
 0x15b   : > { %1831 = vmatprep.subr.bf16.mxu0 %v5721_v34 }
 0x15d   : > { %1020 = vmatmul.mubr.bf16.gmra.mrb[4].mxu0 %v5680_v36 }
 0x15e   : > { %1029 = vmatprep.mubr.bf16.mxu0 %v6346_v0  ;;  %1832 = vmatpush1.bf16.msra.mxu0 %v5719_v38 }
 0x15f   : > { %1833 = vmatprep.subr.bf16.mxu0 %v5724_v39  ;;  %1151 = vmatmul.mubr.bf16.gmra.mrb[4].mxu1 %v5680_v36 }
 0x160   : > { %1160 = vmatprep.mubr.bf16.mxu1 %v6346_v0 }
 0x162   : > { %1834 = vmatpush1.bf16.msra.mxu0 %v5722_v42 }
 0x163   : > { %1835 = vmatprep.subr.bf16.mxu0 %v5727_v43  ;;  %v5761_v43 = vld [vmem:[#allocation7 + $0x100] ss:$8 sps:$4 sm:$0xff]  }
 0x165   : > { %1030 = vmatmul.mubr.bf16.gmra.mrb[8].mxu0 %v5681_v44 }
 0x166   : > { %1039 = vmatprep.mubr.bf16.mxu0 %v6346_v0  ;;  %1836 = vmatpush1.bf16.msra.mxu0 %v5725_v45 }
 0x167   : > { %1837 = vmatprep.subr.bf16.mxu0 %v5730_v46  ;;  %1161 = vmatmul.mubr.bf16.gmra.mrb[8].mxu1 %v5681_v44  ;;  %v749_v44 = vsub.s32 2, %v6804_v14 }
 0x168   : > { %1170 = vmatprep.mubr.bf16.mxu1 %v6346_v0 }
 0x16a   : > { %1838 = vmatpush1.bf16.msra.mxu0 %v5728_v47 }
 0x16b   : > { %1839 = vmatprep.subr.bf16.mxu0 %v5733_v48  ;;  %v5766_v48 = vld [vmem:[#allocation7 + $0x114] ss:$8 sps:$4 sm:$0xff]  }
 0x16d   : > { %1040 = vmatmul.mubr.bf16.gmra.mrb[12].mxu0 %v5682_v49 }
 0x16e   : > { %1049 = vmatprep.mubr.bf16.mxu0 %v6346_v0  ;;  %1840 = vmatpush1.bf16.msra.mxu0 %v5731_v50 }
 0x16f   : > { %1841 = vmatprep.subr.bf16.mxu0 %v5736_v51  ;;  %1171 = vmatmul.mubr.bf16.gmra.mrb[12].mxu1 %v5682_v49  ;;  %v753_v49 = vsub.s32 3, %v6804_v14 }
 0x170   : > { %1180 = vmatprep.mubr.bf16.mxu1 %v6346_v0 }
 0x172   : > { %1842 = vmatpush1.bf16.msra.mxu0 %v5734_v52 }
 0x173   : > { %1843 = vmatprep.subr.bf16.mxu0 %v5739_v53 }
 0x175   : > { %1050 = vmatmul.mubr.bf16.gmra.mrb[16].mxu0 %v5683_v54 }
 0x176   : > { %1059 = vmatprep.mubr.bf16.mxu0 %v6346_v0  ;;  %1844 = vmatpush1.bf16.msra.mxu0 %v5737_v55  ;;  %v6833_v55 = vrot.slane %v737_v16, %v749_v44 }
 0x177   : > { %1845 = vmatprep.subr.bf16.mxu0 %v5742_v56  ;;  %1181 = vmatmul.mubr.bf16.gmra.mrb[16].mxu1 %v5683_v54  ;;  %v5764_v54 = vld [vmem:[#allocation7 + $0x110] ss:$8 sps:$4 sm:$0xff]  }
 0x178   : > { %1190 = vmatprep.mubr.bf16.mxu1 %v6346_v0 }
 0x17a   : > { %1846 = vmatpush1.bf16.msra.mxu0 %v5740_v57 }
 0x17b   : > { %1847 = vmatprep.subr.bf16.mxu0 %v5745_v58  ;;  %v5769_v58 = vld [vmem:[#allocation7 + $0x124] ss:$8 sps:$4 sm:$0xff]  }
 0x17d   : > { %1060 = vmatmul.mubr.bf16.gmra.mrb[20].mxu0 %v5684_v59 }
 0x17e   : > { %1069 = vmatprep.mubr.bf16.mxu0 %v6346_v0  ;;  %1848 = vmatpush1.bf16.msra.mxu0 %v5743_v60 }
 0x17f   : > { %1849 = vmatprep.subr.bf16.mxu0 %v5748_v61  ;;  %1191 = vmatmul.mubr.bf16.gmra.mrb[20].mxu1 %v5684_v59  ;;  %v6837_v59 = vrot.slane %v737_v16, %v753_v49 }
 0x180   : > { %1200 = vmatprep.mubr.bf16.mxu1 %v6346_v0 }
 0x182   : > { %1850 = vmatpush1.bf16.msra.mxu0 %v5746_v62 }
 0x183   : > { %1851 = vmatprep.subr.bf16.mxu0 %v5751_v63 }
 0x185   : > { %1070 = vmatmul.mubr.bf16.gmra.mrb[24].mxu0 %v5690_v1 }
 0x186   : > { %1079 = vmatprep.mubr.bf16.mxu0 %v6346_v0  ;;  %1852 = vmatpush1.bf16.msra.mxu0 %v5749_v2 }
 0x187   : > { %1853 = vmatprep.subr.bf16.mxu0 %v5754_v3  ;;  %1201 = vmatmul.mubr.bf16.gmra.mrb[24].mxu1 %v5690_v1 }
 0x188   : > { %1210 = vmatprep.mubr.bf16.mxu1 %v6346_v0 }
 0x18a   : > { %1854 = vmatpush1.bf16.msra.mxu0 %v5752_v4 }
 0x18b   : > { %1855 = vmatprep.subr.bf16.mxu0 %v5757_v8 }
 0x18d   : > { %1080 = vmatmul.mubr.bf16.gmra.mrb[28].mxu0 %v5697_v5 }
 0x18e   : > { %1089 = vmatprep.mubr.bf16.mxu0 %v6346_v0  ;;  %1856 = vmatpush1.bf16.msra.mxu0 %v5755_v9 }
 0x18f   : > { %1211 = vmatmul.mubr.bf16.gmra.mrb[28].mxu1 %v5697_v5  ;;  %1857 = vmatprep.subr.bf16.mxu0 %v5760_v10 }
 0x190   : > { %1220 = vmatprep.mubr.bf16.mxu1 %v6346_v0 }
 0x192   : > { %1858 = vmatpush1.bf16.msra.mxu0 %v5758_v11 }
 0x193   : > { %1958 = vmatprep.subr.bf16.mxu0 %v5763_v12 }
 0x195   : > { %1090 = vmatmul.mubr.bf16.gmra.mrb[32].mxu0 %v5704_v6 }
 0x196   : > { %1099 = vmatprep.mubr.bf16.mxu0 %v6346_v0 }
 0x197   : > { %1221 = vmatmul.mubr.bf16.gmra.mrb[32].mxu1 %v5704_v6 }
 0x198   : > { %1230 = vmatprep.mubr.bf16.mxu1 %v6346_v0 }
 0x19d   : > { %1100 = vmatmul.mubr.bf16.gmra.mrb[36].mxu0 %v5711_v7 }
 0x19f   : > { %1231 = vmatmul.mubr.bf16.gmra.mrb[36].mxu1 %v5711_v7  ;;  %v5767_v7 = vld [vmem:[#allocation7 + $0x120] ss:$8 sps:$4 sm:$0xff]  }
 0x228   : > { %v1011_v20 = vpop.f32.mrb[0].mxu0 }
 0x229   : > { %v1012_v21 = vadd.f32 %v1011_v20, %v6816_v18  ;;  %v1013_v22 = vpop.f32.mrb[1].mxu0 }
 0x22a   : > { %v1014_v23 = vadd.f32 %v1013_v22, %v6819_v19  ;;  %v1015_v24 = vpop.f32.mrb[2].mxu0  ;;  %v1142_v3 = vpop.f32.mrb[0].mxu1 }
 0x22b   : > { %v1239_v25 = vmul.f32 0.1, %v1012_v21  ;;  %v1016_v26 = vadd.f32 %v1015_v24, %v6816_v18  ;;  %v1017_v27 = vpop.f32.mrb[3].mxu0  ;;  %v1143_v8 = vadd.f32 %v1142_v3, %v6833_v55  ;;  %v1144_v9 = vpop.f32.mrb[1].mxu1 }
 0x22c   : > { %v1240_v28 = vmul.f32 0.1, %v1014_v23  ;;  %v1018_v29 = vadd.f32 %v1017_v27, %v6819_v19  ;;  %v1145_v16 = vadd.f32 %v1144_v9, %v6837_v59  ;;  %v1146_v20 = vpop.f32.mrb[2].mxu1 }
 0x22d   : > { %v1243_v30 = vmul.f32 0.1, %v1016_v26  ;;  %v1315_v32 = vmax.f32 %v1012_v21, %v1239_v25  ;;  %v1147_v24 = vadd.f32 %v1146_v20, %v6833_v55  ;;  %v1148_v25 = vpop.f32.mrb[3].mxu1 }
 0x22e   : > { %v1244_v31 = vmul.f32 0.1, %v1018_v29  ;;  %v1316_v34 = vmax.f32 %v1014_v23, %v1240_v28  ;;  %v1241_v23 = vmul.f32 0.1, %v1143_v8  ;;  %v1242_v27 = vmul.f32 0.1, %v1145_v16 }
 0x22f   : > { %v1319_v33 = vmax.f32 %v1016_v26, %v1243_v30  ;;  %v1149_v28 = vadd.f32 %v1148_v25, %v6837_v59  ;;  %v5770_v30 = vld [vmem:[#allocation7 + $0x130] ss:$8 sps:$4 sm:$0xff]  }
 0x230   : > { %v1320_v35 = vmax.f32 %v1018_v29, %v1244_v31  ;;  %v1021_v36 = vpop.f32.mrb[4].mxu0  ;;  %v1317_v31 = vmax.f32 %v1143_v8, %v1241_v23 }
 0x231   : > { %v1391_v37 = vpack.c.bf16 %v1319_v33, %v1315_v32  ;;  %v1022_v38 = vadd.f32 %v1021_v36, %v6816_v18  ;;  %v1023_v39 = vpop.f32.mrb[5].mxu0  ;;  %v1245_v32 = vmul.f32 0.1, %v1147_v24  ;;  %v1318_v36 = vmax.f32 %v1145_v16, %v1242_v27 }
 0x232   : > { %v1024_v40 = vadd.f32 %v1023_v39, %v6819_v19  ;;  %v1025_v41 = vpop.f32.mrb[6].mxu0  ;;  %v1392_v42 = vpack.c.bf16 %v1320_v35, %v1316_v34  ;;  %v5775_v35 = vld [vmem:[#allocation7 + $0x144] ss:$8 sps:$4 sm:$0xff]  }
 0x233   : > { %v1247_v45 = vmul.f32 0.1, %v1022_v38  ;;  %v1026_v46 = vadd.f32 %v1025_v41, %v6816_v18  ;;  %v1027_v47 = vpop.f32.mrb[7].mxu0  ;;  %v1321_v41 = vmax.f32 %v1147_v24, %v1245_v32 }
 0x234   : > { %v1248_v50 = vmul.f32 0.1, %v1024_v40  ;;  %v1028_v51 = vadd.f32 %v1027_v47, %v6819_v19  ;;  %1859 = vmatprep.mubr.bf16.mxu0 %v1392_v42  ;;  %v1152_v47 = vpop.f32.mrb[4].mxu1 }
 0x235   : > { %v1251_v52 = vmul.f32 0.1, %v1026_v46  ;;  %1860 = vmatmul.mubr.bf16.vlgmr.msra.gmra.mrb[40].mxu0 %v1391_v37  ;;  %v1323_v56 = vmax.f32 %v1022_v38, %v1247_v45  ;;  %v1246_v37 = vmul.f32 0.1, %v1149_v28 }
 0x236   : > { %v1252_v53 = vmul.f32 0.1, %v1028_v51  ;;  %1959 = vmatpush1.bf16.msra.mxu0 %v5761_v43  ;;  %v1324_v60 = vmax.f32 %v1024_v40, %v1248_v50 }
 0x237   : > { %v1327_v57 = vmax.f32 %v1026_v46, %v1251_v52  ;;  %1960 = vmatprep.subr.bf16.mxu0 %v5766_v48  ;;  %v1322_v46 = vmax.f32 %v1149_v28, %v1246_v37  ;;  %v5773_v52 = vld [vmem:[#allocation7 + $0x140] ss:$8 sps:$4 sm:$0xff]  }
 0x238   : > { %v1328_v61 = vmax.f32 %v1028_v51, %v1252_v53  ;;  %v1031_v62 = vpop.f32.mrb[8].mxu0  ;;  %v6849_v53 = vpack.c.bf16 %v1321_v41, %v1317_v31 }
 0x239   : > { %v1032_v63 = vadd.f32 %v1031_v62, %v6816_v18  ;;  %v1033_v1 = vpop.f32.mrb[9].mxu0  ;;  %v1395_v2 = vpack.c.bf16 %v1327_v57, %v1323_v56  ;;  %v1154_v56 = vpop.f32.mrb[5].mxu1 }
 0x23a   : > { %v1034_v4 = vadd.f32 %v1033_v1, %v6819_v19  ;;  %v1035_v5 = vpop.f32.mrb[10].mxu0  ;;  %1961 = vmatpush1.bf16.msra.mxu0 %v5764_v54  ;;  %v1396_v6 = vpack.c.bf16 %v1328_v61, %v1324_v60  ;;  %v1153_v54 = vadd.f32 %v1152_v47, %v6833_v55  ;;  %v5778_v61 = vld [vmem:[#allocation7 + $0x154] ss:$8 sps:$4 sm:$0xff]   ;;  %v1155_v62 = vadd.f32 %v1154_v56, %v6837_v59 }
 0x23b   : > { %v1255_v10 = vmul.f32 0.1, %v1032_v63  ;;  %v1036_v11 = vadd.f32 %v1035_v5, %v6816_v18  ;;  %v1037_v12 = vpop.f32.mrb[11].mxu0  ;;  %1962 = vmatprep.subr.bf16.mxu0 %v5769_v58  ;;  %v6854_v1 = vpack.c.bf16 %v1322_v46, %v1318_v36  ;;  %v5779_v36 = vld [vmem:[#allocation7 + $0x160] ss:$8 sps:$4 sm:$0xff]  }
 0x23c   : > { %v1256_v21 = vmul.f32 0.1, %v1034_v4  ;;  %v1038_v22 = vadd.f32 %v1037_v12, %v6819_v19  ;;  %1869 = vmatprep.mubr.bf16.mxu0 %v1396_v6  ;;  %v1250_v8 = vmul.f32 0.1, %v1155_v62 }
 0x23d   : > { %v1259_v26 = vmul.f32 0.1, %v1036_v11  ;;  %1870 = vmatmul.mubr.bf16.gmra.mrb[44].mxu0 %v1395_v2  ;;  %v1331_v33 = vmax.f32 %v1032_v63, %v1255_v10  ;;  %v1156_v63 = vpop.f32.mrb[6].mxu1 }
 0x23e   : > { %v1260_v29 = vmul.f32 0.1, %v1038_v22  ;;  %1963 = vmatpush1.bf16.msra.mxu0 %v5767_v7  ;;  %v1332_v38 = vmax.f32 %v1034_v4, %v1256_v21  ;;  %v1249_v4 = vmul.f32 0.1, %v1153_v54  ;;  %v1157_v5 = vadd.f32 %v1156_v63, %v6833_v55  ;;  %v1158_v6 = vpop.f32.mrb[7].mxu1 }
 0x23f   : > { %v1335_v34 = vmax.f32 %v1036_v11, %v1259_v26  ;;  %1964 = vmatprep.subr.bf16.mxu0 %v5772_v13  ;;  %v1159_v9 = vadd.f32 %v1158_v6, %v6837_v59  ;;  %v5776_v11 = vld [vmem:[#allocation7 + $0x150] ss:$8 sps:$4 sm:$0xff]   ;;  %v5781_v21 = vld [vmem:[#allocation7 + $0x164] ss:$8 sps:$4 sm:$0xff]   ;;  %v1162_v32 = vpop.f32.mrb[8].mxu1 }
 0x240   : > { %v1336_v39 = vmax.f32 %v1038_v22, %v1260_v29  ;;  %v1041_v40 = vpop.f32.mrb[12].mxu0  ;;  %v1325_v12 = vmax.f32 %v1153_v54, %v1249_v4  ;;  %v1253_v13 = vmul.f32 0.1, %v1157_v5  ;;  %v1326_v22 = vmax.f32 %v1155_v62, %v1250_v8  ;;  %v5810_v62 = vld [vmem:[#allocation8] sm:$0xff]   ;;  %v5811_v4 = vld [vmem:[#allocation8 + $0x48] sm:$0xff]  }
 0x241   : > { %v1042_v42 = vadd.f32 %v1041_v40, %v6816_v18  ;;  %v1043_v43 = vpop.f32.mrb[13].mxu0  ;;  %v1399_v45 = vpack.c.bf16 %v1335_v34, %v1331_v33  ;;  %v1254_v23 = vmul.f32 0.1, %v1159_v9  ;;  %v1163_v37 = vadd.f32 %v1162_v32, %v6833_v55 }
 0x242   : > { %v1044_v48 = vadd.f32 %v1043_v43, %v6819_v19  ;;  %v1045_v50 = vpop.f32.mrb[14].mxu0  ;;  %v1400_v51 = vpack.c.bf16 %v1336_v39, %v1332_v38  ;;  %1965 = vmatpush1.bf16.msra.mxu0 %v5770_v30  ;;  %v1329_v27 = vmax.f32 %v1157_v5, %v1253_v13  ;;  %v1164_v38 = vpop.f32.mrb[9].mxu1  ;;  %v5784_v43 = vld [vmem:[#allocation7 + $0x174] ss:$8 sps:$4 sm:$0xff]  }
 0x243   : > { %v1263_v57 = vmul.f32 0.1, %v1042_v42  ;;  %v1046_v58 = vadd.f32 %v1045_v50, %v6816_v18  ;;  %v1047_v60 = vpop.f32.mrb[15].mxu0  ;;  %1966 = vmatprep.subr.bf16.mxu0 %v5775_v35  ;;  %v1330_v31 = vmax.f32 %v1159_v9, %v1254_v23  ;;  %v1166_v46 = vpop.f32.mrb[10].mxu1 }
 0x244   : > { %v1264_v2 = vmul.f32 0.1, %v1044_v48  ;;  %v1048_v3 = vadd.f32 %v1047_v60, %v6819_v19  ;;  %1879 = vmatprep.mubr.bf16.mxu0 %v1400_v51  ;;  %v6862_v39 = vpack.c.bf16 %v1329_v27, %v1325_v12  ;;  %v5782_v51 = vld [vmem:[#allocation7 + $0x170] ss:$8 sps:$4 sm:$0xff]   ;;  %v1167_v54 = vadd.f32 %v1166_v46, %v6833_v55  ;;  %v1168_v56 = vpop.f32.mrb[11].mxu1 }
 0x245   : > { %v1267_v7 = vmul.f32 0.1, %v1046_v58  ;;  %1880 = vmatmul.mubr.bf16.gmra.mrb[48].mxu0 %v1399_v45  ;;  %v1339_v16 = vmax.f32 %v1042_v42, %v1263_v57  ;;  %v1165_v45 = vadd.f32 %v1164_v38, %v6837_v59  ;;  %v6866_v47 = vpack.c.bf16 %v1330_v31, %v1326_v22 }
 0x246   : > { %v1268_v10 = vmul.f32 0.1, %v1048_v3  ;;  %1967 = vmatpush1.bf16.msra.mxu0 %v5773_v52  ;;  %v1340_v24 = vmax.f32 %v1044_v48, %v1264_v2  ;;  %v1257_v52 = vmul.f32 0.1, %v1163_v37  ;;  %v1169_v60 = vadd.f32 %v1168_v56, %v6837_v59 }
 0x247   : > { %v1343_v20 = vmax.f32 %v1046_v58, %v1267_v7  ;;  %1968 = vmatprep.subr.bf16.mxu0 %v5778_v61  ;;  %v1258_v58 = vmul.f32 0.1, %v1165_v45  ;;  %v5809_v61 = vld [vmem:[#allocation8 + $0x40] sm:$0xff]  }
 0x248   : > { %v1344_v25 = vmax.f32 %v1048_v3, %v1268_v10  ;;  %v1051_v26 = vpop.f32.mrb[16].mxu0  ;;  %v1333_v2 = vmax.f32 %v1163_v37, %v1257_v52  ;;  %v1261_v3 = vmul.f32 0.1, %v1167_v54  ;;  %v5787_v7 = vld [vmem:[#allocation7 + $0x184] ss:$8 sps:$4 sm:$0xff]   ;;  %5086 = vmatprep.subr.bf16.mxu1 %v5809_v61 }
 0x249   : > { %v1052_v28 = vadd.f32 %v1051_v26, %v6816_v18  ;;  %v1053_v29 = vpop.f32.mrb[17].mxu0  ;;  %v1403_v30 = vpack.c.bf16 %v1343_v20, %v1339_v16  ;;  %v1334_v8 = vmax.f32 %v1165_v45, %v1258_v58  ;;  %v1262_v9 = vmul.f32 0.1, %v1169_v60  ;;  %5087 = vmatpush3.bf16.msra.mxu1 %v5810_v62  ;;  %v5812_v16 = vld [vmem:[#allocation8 + $0x8] sm:$0xff]  }
 0x24a   : > { %v1054_v33 = vadd.f32 %v1053_v29, %v6819_v19  ;;  %v1055_v34 = vpop.f32.mrb[18].mxu0  ;;  %v1404_v35 = vpack.c.bf16 %v1344_v25, %v1340_v24  ;;  %1969 = vmatpush1.bf16.msra.mxu0 %v5776_v11  ;;  %v1337_v13 = vmax.f32 %v1167_v54, %v1261_v3  ;;  %v1172_v24 = vpop.f32.mrb[12].mxu1  ;;  %5088 = vmatprep.subr.bf16.mxu1 %v5811_v4  ;;  %v5813_v25 = vld [vmem:[#allocation8 + $0x50] sm:$0xff]   ;;  %v5785_v29 = vld [vmem:[#allocation7 + $0x180] ss:$8 sps:$4 sm:$0xff]   ;;  %v5815_v54 = vld [vmem:[#allocation8 + $0x58] sm:$0xff]  }
 0x24b   : > { %v1271_v40 = vmul.f32 0.1, %v1052_v28  ;;  %v1056_v41 = vadd.f32 %v1055_v34, %v6816_v18  ;;  %v1057_v42 = vpop.f32.mrb[19].mxu0  ;;  %1970 = vmatprep.subr.bf16.mxu0 %v5781_v21  ;;  %v1338_v23 = vmax.f32 %v1169_v60, %v1262_v9  ;;  %v1174_v31 = vpop.f32.mrb[13].mxu1 }
 0x24c   : > { %v1272_v48 = vmul.f32 0.1, %v1054_v33  ;;  %v1058_v50 = vadd.f32 %v1057_v42, %v6819_v19  ;;  %1889 = vmatprep.mubr.bf16.mxu0 %v1404_v35  ;;  %v6874_v32 = vpack.c.bf16 %v1337_v13, %v1333_v2  ;;  %v1175_v37 = vadd.f32 %v1174_v31, %v6837_v59  ;;  %v1176_v38 = vpop.f32.mrb[14].mxu1 }
 0x24d   : > { %v1275_v57 = vmul.f32 0.1, %v1056_v41  ;;  %1890 = vmatmul.mubr.bf16.gmra.mrb[52].mxu0 %v1403_v30  ;;  %v1347_v5 = vmax.f32 %v1052_v28, %v1271_v40  ;;  %v1173_v30 = vadd.f32 %v1172_v24, %v6833_v55  ;;  %v6878_v40 = vpack.c.bf16 %v1338_v23, %v1334_v8  ;;  %v1178_v46 = vpop.f32.mrb[15].mxu1  ;;  %5089 = vmatpush3.bf16.msra.mxu1 %v5812_v16  ;;  %v5816_v8 = vld [vmem:[#allocation8 + $0x18] sm:$0xff]   ;;  %v5817_v16 = vld [vmem:[#allocation8 + $0x60] sm:$0xff]  }
 0x24e   : > { %v1276_v63 = vmul.f32 0.1, %v1058_v50  ;;  %1971 = vmatpush1.bf16.msra.mxu0 %v5779_v36  ;;  %v1348_v10 = vmax.f32 %v1054_v33, %v1272_v48  ;;  %v5790_v36 = vld [vmem:[#allocation7 + $0x194] ss:$8 sps:$4 sm:$0xff]   ;;  %v1177_v45 = vadd.f32 %v1176_v38, %v6833_v55  ;;  %v1179_v52 = vadd.f32 %v1178_v46, %v6837_v59  ;;  %5090 = vmatprep.subr.bf16.mxu1 %v5813_v25  ;;  %v1182_v13 = vpop.f32.mrb[16].mxu1 }
 0x24f   : > { %v1351_v6 = vmax.f32 %v1056_v41, %v1275_v57  ;;  %1972 = vmatprep.subr.bf16.mxu0 %v5784_v43  ;;  %v1265_v43 = vmul.f32 0.1, %v1173_v30  ;;  %v5814_v48 = vld [vmem:[#allocation8 + $0x10] sm:$0xff]   ;;  %v5791_v23 = vld [vmem:[#allocation7 + $0x1a0] ss:$8 sps:$4 sm:$0xff]   ;;  %v1183_v24 = vadd.f32 %v1182_v13, %v6833_v55  ;;  %v1184_v25 = vpop.f32.mrb[17].mxu1 }
 0x250   : > { %v1352_v11 = vmax.f32 %v1058_v50, %v1276_v63  ;;  %v1061_v12 = vpop.f32.mrb[20].mxu0  ;;  %v5788_v57 = vld [vmem:[#allocation7 + $0x190] ss:$8 sps:$4 sm:$0xff]   ;;  %v1269_v60 = vmul.f32 0.1, %v1177_v45  ;;  %v1185_v31 = vadd.f32 %v1184_v25, %v6837_v59 }
 0x251   : > { %v1062_v20 = vadd.f32 %v1061_v12, %v6816_v18  ;;  %v1063_v21 = vpop.f32.mrb[21].mxu0  ;;  %v1407_v22 = vpack.c.bf16 %v1351_v6, %v1347_v5  ;;  %v1341_v58 = vmax.f32 %v1173_v30, %v1265_v43  ;;  %v5793_v63 = vld [vmem:[#allocation7 + $0x1a4] ss:$8 sps:$4 sm:$0xff]   ;;  %v1270_v3 = vmul.f32 0.1, %v1179_v52  ;;  %5091 = vmatpush3.bf16.msra.mxu1 %v5814_v48 }
 0x252   : > { %v1064_v26 = vadd.f32 %v1063_v21, %v6819_v19  ;;  %v1065_v27 = vpop.f32.mrb[22].mxu0  ;;  %v1408_v28 = vpack.c.bf16 %v1352_v11, %v1348_v10  ;;  %1973 = vmatpush1.bf16.msra.mxu0 %v5782_v51  ;;  %v1266_v51 = vmul.f32 0.1, %v1175_v37  ;;  %5092 = vmatprep.subr.bf16.mxu1 %v5815_v54  ;;  %v5796_v30 = vld [vmem:[#allocation7 + $0x1b4] ss:$8 sps:$4 sm:$0xff]   ;;  %v5819_v48 = vld [vmem:[#allocation8 + $0x68] sm:$0xff]  }
 0x253   : > { %v1279_v33 = vmul.f32 0.1, %v1062_v20  ;;  %v1066_v34 = vadd.f32 %v1065_v27, %v6816_v18  ;;  %v1067_v35 = vpop.f32.mrb[23].mxu0  ;;  %1974 = vmatprep.subr.bf16.mxu0 %v5787_v7  ;;  %v1345_v7 = vmax.f32 %v1177_v45, %v1269_v60  ;;  %v1346_v12 = vmax.f32 %v1179_v52, %v1270_v3 }
 0x254   : > { %v1280_v41 = vmul.f32 0.1, %v1064_v26  ;;  %v1068_v42 = vadd.f32 %v1067_v35, %v6819_v19  ;;  %1899 = vmatprep.mubr.bf16.mxu0 %v1408_v28  ;;  %v1342_v2 = vmax.f32 %v1175_v37, %v1266_v51  ;;  %v1273_v37 = vmul.f32 0.1, %v1183_v24  ;;  %v5794_v51 = vld [vmem:[#allocation7 + $0x1b0] ss:$8 sps:$4 sm:$0xff]  }
 0x255   : > { %v1283_v50 = vmul.f32 0.1, %v1066_v34  ;;  %1900 = vmatmul.mubr.bf16.gmra.mrb[56].mxu0 %v1407_v22  ;;  %v1355_v61 = vmax.f32 %v1062_v20, %v1279_v33  ;;  %v1186_v33 = vpop.f32.mrb[18].mxu1  ;;  %5093 = vmatpush3.bf16.msra.mxu1 %v5816_v8  ;;  %v1274_v45 = vmul.f32 0.1, %v1185_v31 }
 0x256   : > { %v1284_v56 = vmul.f32 0.1, %v1068_v42  ;;  %1975 = vmatpush1.bf16.msra.mxu0 %v5785_v29  ;;  %v1356_v4 = vmax.f32 %v1064_v26, %v1280_v41  ;;  %v6886_v26 = vpack.c.bf16 %v1345_v7, %v1341_v58  ;;  %v1187_v38 = vadd.f32 %v1186_v33, %v6833_v55  ;;  %v1188_v41 = vpop.f32.mrb[19].mxu1  ;;  %5094 = vmatprep.subr.bf16.mxu1 %v5817_v16  ;;  %v5799_v58 = vld [vmem:[#allocation7 + $0x1c4] ss:$8 sps:$4 sm:$0xff]  }
 0x257   : > { %v1359_v62 = vmax.f32 %v1066_v34, %v1283_v50  ;;  %1976 = vmatprep.subr.bf16.mxu0 %v5790_v36  ;;  %v6890_v34 = vpack.c.bf16 %v1346_v12, %v1342_v2  ;;  %v1189_v46 = vadd.f32 %v1188_v41, %v6837_v59  ;;  %v1349_v52 = vmax.f32 %v1183_v24, %v1273_v37  ;;  %v5797_v16 = vld [vmem:[#allocation7 + $0x1c0] ss:$8 sps:$4 sm:$0xff]  }
 0x258   : > { %v1360_v5 = vmax.f32 %v1068_v42, %v1284_v56  ;;  %v1071_v6 = vpop.f32.mrb[24].mxu0  ;;  %v5818_v42 = vld [vmem:[#allocation8 + $0x20] sm:$0xff]   ;;  %v1277_v54 = vmul.f32 0.1, %v1187_v38  ;;  %v1350_v60 = vmax.f32 %v1185_v31, %v1274_v45 }
 0x259   : > { %v1072_v9 = vadd.f32 %v1071_v6, %v6816_v18  ;;  %v1073_v10 = vpop.f32.mrb[25].mxu0  ;;  %v1411_v11 = vpack.c.bf16 %v1359_v62, %v1355_v61  ;;  %v1278_v61 = vmul.f32 0.1, %v1189_v46  ;;  %5095 = vmatpush3.bf16.msra.mxu1 %v5818_v42 }
 0x25a   : > { %v1074_v20 = vadd.f32 %v1073_v10, %v6819_v19  ;;  %v1075_v21 = vpop.f32.mrb[26].mxu0  ;;  %v1412_v22 = vpack.c.bf16 %v1360_v5, %v1356_v4  ;;  %1977 = vmatpush1.bf16.msra.mxu0 %v5788_v57  ;;  %v1353_v3 = vmax.f32 %v1187_v38, %v1277_v54  ;;  %v5820_v4 = vld [vmem:[#allocation8 + $0x28] sm:$0xff]   ;;  %v1192_v10 = vpop.f32.mrb[20].mxu1  ;;  %5096 = vmatprep.subr.bf16.mxu1 %v5819_v48  ;;  %v5822_v38 = vld [vmem:[#allocation8 + $0x30] sm:$0xff]  }
 0x25b   : > { %v1287_v27 = vmul.f32 0.1, %v1072_v9  ;;  %v1076_v28 = vadd.f32 %v1075_v21, %v6816_v18  ;;  %v1077_v29 = vpop.f32.mrb[27].mxu0  ;;  %1978 = vmatprep.subr.bf16.mxu0 %v5793_v63  ;;  %v1354_v8 = vmax.f32 %v1189_v46, %v1278_v61  ;;  %v1194_v21 = vpop.f32.mrb[21].mxu1  ;;  %v5800_v46 = vld [vmem:[#allocation7 + $0x1d0] ss:$8 sps:$4 sm:$0xff]  }
 0x25c   : > { %v1288_v35 = vmul.f32 0.1, %v1074_v20  ;;  %v1078_v36 = vadd.f32 %v1077_v29, %v6819_v19  ;;  %1909 = vmatprep.mubr.bf16.mxu0 %v1412_v22  ;;  %v6898_v22 = vpack.c.bf16 %v1353_v3, %v1349_v52  ;;  %v1196_v29 = vpop.f32.mrb[22].mxu1  ;;  %v5805_v54 = vld [vmem:[#allocation7 + $0x1e4] ss:$8 sps:$4 sm:$0xff]  }
 0x25d   : > { %v1291_v43 = vmul.f32 0.1, %v1076_v28  ;;  %1910 = vmatmul.mubr.bf16.gmra.mrb[60].mxu0 %v1411_v11  ;;  %v1363_v56 = vmax.f32 %v1072_v9, %v1287_v27  ;;  %v5821_v11 = vld [vmem:[#allocation8 + $0x70] sm:$0xff]   ;;  %v1198_v37 = vpop.f32.mrb[23].mxu1  ;;  %5097 = vmatpush3.bf16.msra.mxu1 %v5820_v4 }
 0x25e   : > { %v1292_v50 = vmul.f32 0.1, %v1078_v36  ;;  %1979 = vmatpush1.bf16.msra.mxu0 %v5791_v23  ;;  %v1364_v62 = vmax.f32 %v1074_v20, %v1288_v35  ;;  %v1193_v20 = vadd.f32 %v1192_v10, %v6833_v55  ;;  %v5802_v27 = vld [vmem:[#allocation7 + $0x1d4] ss:$8 sps:$4 sm:$0xff]   ;;  %5098 = vmatprep.subr.bf16.mxu1 %v5821_v11  ;;  %v5803_v10 = vld [vmem:[#allocation7 + $0x1e0] ss:$8 sps:$4 sm:$0xff]  }
 0x25f   : > { %v1367_v57 = vmax.f32 %v1076_v28, %v1291_v43  ;;  %1980 = vmatprep.subr.bf16.mxu0 %v5796_v30  ;;  %v1195_v28 = vadd.f32 %v1194_v21, %v6837_v59  ;;  %v6902_v30 = vpack.c.bf16 %v1354_v8, %v1350_v60  ;;  %v1199_v43 = vadd.f32 %v1198_v37, %v6837_v59  ;;  %v5808_v21 = vld [vmem:[#allocation7 + $0x1f4] ss:$8 sps:$4 sm:$0xff]  }
 0x260   : > { %v1368_v63 = vmax.f32 %v1078_v36, %v1292_v50  ;;  %v1081_v2 = vpop.f32.mrb[28].mxu0  ;;  %v1281_v35 = vmul.f32 0.1, %v1193_v20  ;;  %v1197_v36 = vadd.f32 %v1196_v29, %v6833_v55 }
 0x261   : > { %v1082_v5 = vadd.f32 %v1081_v2, %v6816_v18  ;;  %v1083_v6 = vpop.f32.mrb[29].mxu0  ;;  %v1415_v7 = vpack.c.bf16 %v1367_v57, %v1363_v56  ;;  %v1282_v42 = vmul.f32 0.1, %v1195_v28  ;;  %v1286_v57 = vmul.f32 0.1, %v1199_v43  ;;  %5099 = vmatpush3.bf16.msra.mxu1 %v5822_v38 }
 0x262   : > { %v1084_v9 = vadd.f32 %v1083_v6, %v6819_v19  ;;  %v1085_v12 = vpop.f32.mrb[30].mxu0  ;;  %v1416_v13 = vpack.c.bf16 %v1368_v63, %v1364_v62  ;;  %1981 = vmatpush1.bf16.msra.mxu0 %v5794_v51  ;;  %v1357_v48 = vmax.f32 %v1193_v20, %v1281_v35  ;;  %v1285_v50 = vmul.f32 0.1, %v1197_v36  ;;  %v1202_v6 = vpop.f32.mrb[24].mxu1 }
 0x263   : > { %v1295_v23 = vmul.f32 0.1, %v1082_v5  ;;  %v1086_v24 = vadd.f32 %v1085_v12, %v6816_v18  ;;  %v1087_v25 = vpop.f32.mrb[31].mxu0  ;;  %1982 = vmatprep.subr.bf16.mxu0 %v5799_v58  ;;  %v1358_v56 = vmax.f32 %v1195_v28, %v1282_v42  ;;  %v1362_v4 = vmax.f32 %v1199_v43, %v1286_v57  ;;  %v1204_v12 = vpop.f32.mrb[25].mxu1 }
 0x264   : > { %v1296_v31 = vmul.f32 0.1, %v1084_v9  ;;  %v1088_v33 = vadd.f32 %v1087_v25, %v6819_v19  ;;  %1919 = vmatprep.mubr.bf16.mxu0 %v1416_v13  ;;  %v1361_v62 = vmax.f32 %v1197_v36, %v1285_v50  ;;  %v1203_v11 = vadd.f32 %v1202_v6, %v6833_v55 }
 0x265   : > { %v1299_v41 = vmul.f32 0.1, %v1086_v24  ;;  %1920 = vmatmul.mubr.bf16.gmra.mrb[64].mxu0 %v1415_v7  ;;  %v1371_v51 = vmax.f32 %v1082_v5, %v1295_v23  ;;  %v1205_v23 = vadd.f32 %v1204_v12, %v6837_v59  ;;  %v6914_v25 = vpack.c.bf16 %v1362_v4, %v1358_v56 }
 0x266   : > { %v1300_v45 = vmul.f32 0.1, %v1088_v33  ;;  %1983 = vmatpush1.bf16.msra.mxu0 %v5797_v16  ;;  %v1372_v58 = vmax.f32 %v1084_v9, %v1296_v31  ;;  %v6910_v9 = vpack.c.bf16 %v1361_v62, %v1357_v48  ;;  %v1289_v29 = vmul.f32 0.1, %v1203_v11 }
 0x267   : > { %v1375_v52 = vmax.f32 %v1086_v24, %v1299_v41  ;;  %1984 = vmatprep.subr.bf16.mxu0 %v5802_v27  ;;  %v1206_v24 = vpop.f32.mrb[26].mxu1  ;;  %v1290_v36 = vmul.f32 0.1, %v1205_v23  ;;  %v5806_v41 = vld [vmem:[#allocation7 + $0x1f0] ss:$8 sps:$4 sm:$0xff]  }
 0x268   : > { %v1376_v60 = vmax.f32 %v1088_v33, %v1300_v45  ;;  %v1091_v61 = vpop.f32.mrb[32].mxu0  ;;  %v1207_v31 = vadd.f32 %v1206_v24, %v6833_v55  ;;  %v1208_v33 = vpop.f32.mrb[27].mxu1  ;;  %v1365_v42 = vmax.f32 %v1203_v11, %v1289_v29 }
 0x269   : > { %v1092_v63 = vadd.f32 %v1091_v61, %v6816_v18  ;;  %v1093_v2 = vpop.f32.mrb[33].mxu0  ;;  %v1419_v3 = vpack.c.bf16 %v1375_v52, %v1371_v51  ;;  %v1209_v37 = vadd.f32 %v1208_v33, %v6837_v59  ;;  %v1366_v48 = vmax.f32 %v1205_v23, %v1290_v36  ;;  %v1212_v62 = vpop.f32.mrb[28].mxu1 }
 0x26a   : > { %v1094_v7 = vadd.f32 %v1093_v2, %v6819_v19  ;;  %v1095_v8 = vpop.f32.mrb[34].mxu0  ;;  %v1420_v5 = vpack.c.bf16 %v1376_v60, %v1372_v58  ;;  %1985 = vmatpush1.bf16.msra.mxu0 %v5800_v46  ;;  %v1293_v43 = vmul.f32 0.1, %v1207_v31  ;;  %v1214_v6 = vpop.f32.mrb[29].mxu1 }
 0x26b   : > { %v1303_v13 = vmul.f32 0.1, %v1092_v63  ;;  %v1096_v16 = vadd.f32 %v1095_v8, %v6816_v18  ;;  %v1097_v20 = vpop.f32.mrb[35].mxu0  ;;  %1986 = vmatprep.subr.bf16.mxu0 %v5805_v54  ;;  %v1294_v50 = vmul.f32 0.1, %v1209_v37  ;;  %v1216_v11 = vpop.f32.mrb[30].mxu1 }
 0x26c   : > { %v1304_v27 = vmul.f32 0.1, %v1094_v7  ;;  %v1098_v28 = vadd.f32 %v1097_v20, %v6819_v19  ;;  %1929 = vmatprep.mubr.bf16.mxu0 %v1420_v5  ;;  %v1369_v56 = vmax.f32 %v1207_v31, %v1293_v43  ;;  %v1218_v20 = vpop.f32.mrb[31].mxu1 }
 0x26d   : > { %v1307_v35 = vmul.f32 0.1, %v1096_v16  ;;  %1930 = vmatmul.mubr.bf16.gmra.mrb[68].mxu0 %v1419_v3  ;;  %v1379_v45 = vmax.f32 %v1092_v63, %v1303_v13  ;;  %v1370_v61 = vmax.f32 %v1209_v37, %v1294_v50  ;;  %v1213_v63 = vadd.f32 %v1212_v62, %v6833_v55  ;;  %v1222_v37 = vpop.f32.mrb[32].mxu1 }
 0x26e   : > { %v1308_v38 = vmul.f32 0.1, %v1098_v28  ;;  %1987 = vmatpush1.bf16.msra.mxu0 %v5803_v10  ;;  %v1380_v51 = vmax.f32 %v1094_v7, %v1304_v27  ;;  %v1417_v8 = vpack.c.bf16 %v1369_v56, %v1365_v42  ;;  %v1215_v10 = vadd.f32 %v1214_v6, %v6837_v59 }
 0x26f   : > { %v1383_v46 = vmax.f32 %v1096_v16, %v1307_v35  ;;  %1988 = vmatprep.subr.bf16.mxu0 %v5808_v21  ;;  %v1418_v12 = vpack.c.bf16 %v1370_v61, %v1366_v48  ;;  %v1297_v13 = vmul.f32 0.1, %v1213_v63  ;;  %v1217_v16 = vadd.f32 %v1216_v11, %v6833_v55 }
 0x270   : > { %v1384_v52 = vmax.f32 %v1098_v28, %v1308_v38  ;;  %v1101_v54 = vpop.f32.mrb[36].mxu0  ;;  %v1219_v21 = vadd.f32 %v1218_v20, %v6837_v59  ;;  %v1223_v38 = vadd.f32 %v1222_v37, %v6833_v55 }
 0x271   : > { %v1102_v57 = vadd.f32 %v1101_v54, %v6816_v18  ;;  %v1103_v58 = vpop.f32.mrb[37].mxu0  ;;  %v1423_v60 = vpack.c.bf16 %v1383_v46, %v1379_v45  ;;  %v1373_v24 = vmax.f32 %v1213_v63, %v1297_v13  ;;  %v1301_v27 = vmul.f32 0.1, %v1217_v16 }
 0x272   : > { %v1104_v2 = vadd.f32 %v1103_v58, %v6819_v19  ;;  %v1105_v3 = vpop.f32.mrb[38].mxu0  ;;  %v1424_v4 = vpack.c.bf16 %v1384_v52, %v1380_v51  ;;  %1989 = vmatpush1.bf16.msra.mxu0 %v5806_v41  ;;  %v1298_v19 = vmul.f32 0.1, %v1215_v10  ;;  %v1302_v31 = vmul.f32 0.1, %v1219_v21  ;;  %v1224_v41 = vpop.f32.mrb[33].mxu1 }
 0x273   : > { %v1311_v5 = vmul.f32 0.1, %v1102_v57  ;;  %v1106_v7 = vpop.f32.mrb[39].mxu0  ;;  %v1377_v35 = vmax.f32 %v1217_v16, %v1301_v27  ;;  %v1225_v45 = vadd.f32 %v1224_v41, %v6837_v59  ;;  %v1226_v46 = vpop.f32.mrb[34].mxu1  ;;  %v1305_v50 = vmul.f32 0.1, %v1223_v38 }
 0x274   : > { %v1312_v18 = vmul.f32 0.1, %v1104_v2  ;;  %1939 = vmatprep.mubr.bf16.mxu0 %v1424_v4  ;;  %v1374_v29 = vmax.f32 %v1215_v10, %v1298_v19  ;;  %v1378_v36 = vmax.f32 %v1219_v21, %v1302_v31  ;;  %v1227_v51 = vadd.f32 %v1226_v46, %v6833_v55  ;;  %v1228_v52 = vpop.f32.mrb[35].mxu1 }
 0x275   : > { %1940 = vmatmul.mubr.bf16.gmra.mrb[72].mxu0 %v1423_v60  ;;  %v1387_v28 = vmax.f32 %v1102_v57, %v1311_v5  ;;  %v1421_v42 = vpack.c.bf16 %v1377_v35, %v1373_v24  ;;  %v1306_v54 = vmul.f32 0.1, %v1225_v45  ;;  %v1229_v56 = vadd.f32 %v1228_v52, %v6837_v59  ;;  %v1232_v3 = vpop.f32.mrb[36].mxu1 }
 0x276   : > { %v1388_v23 = vmax.f32 %v1104_v2, %v1312_v18  ;;  %v1422_v48 = vpack.c.bf16 %v1378_v36, %v1374_v29  ;;  %v1381_v57 = vmax.f32 %v1223_v38, %v1305_v50  ;;  %v1309_v58 = vmul.f32 0.1, %v1227_v51  ;;  %v1234_v4 = vpop.f32.mrb[37].mxu1 }
 0x277   : > { %v1427_v43 = vpack.c.bf16 %v1387_v28, %v1387_v28  ;;  %v1382_v60 = vmax.f32 %v1225_v45, %v1306_v54  ;;  %v1310_v61 = vmul.f32 0.1, %v1229_v56  ;;  %v1236_v5 = vpop.f32.mrb[38].mxu1 }
 0x278   : > { %v1428_v33 = vpack.c.bf16 %v1388_v23, %v1388_v23  ;;  %v1385_v62 = vmax.f32 %v1227_v51, %v1309_v58  ;;  %v1237_v7 = vpop.f32.mrb[39].mxu1  ;;  %v5827_v58 = vld [vmem:[#allocation10 + $0x10] sm:$0xff]  }
 0x279   : > { %v1386_v2 = vmax.f32 %v1229_v56, %v1310_v61 }
 0x27a   : > { %1949 = vmatprep.mubr.bf16.mxu0 %v1428_v33  ;;  %v1425_v63 = vpack.c.bf16 %v1385_v62, %v1381_v57 }
 0x27b   : > { %v1426_v6 = vpack.c.bf16 %v1386_v2, %v1382_v60 }
 0x27d   : > { %1950 = vmatmul.mubr.bf16.gmra.mrb[76].mxu0 %v1427_v43 }
 0x27e   : > { %1990 = vmatprep.mubr.bf16.mxu0 %v6854_v1 }
 0x285   : > { %1991 = vmatmul.mubr.bf16.vlgmr.msra.gmra.mrb[40].mxu0 %v6849_v53  ;;  %v1235_v53 = vadd.f32 %v1234_v4, %v6837_v59  ;;  %v5825_v59 = vld [vmem:[#allocation10] sm:$0xff]  }
 0x286   : > { %2000 = vmatprep.mubr.bf16.mxu0 %v6866_v47 }
 0x287   : > { %v1314_v1 = vmul.f32 0.1, %v1235_v53 }
 0x289   : > { %v1390_v47 = vmax.f32 %v1235_v53, %v1314_v1 }
 0x28d   : > { %2001 = vmatmul.mubr.bf16.gmra.mrb[44].mxu0 %v6862_v39  ;;  %v1233_v39 = vadd.f32 %v1232_v3, %v6833_v55  ;;  %v1495_v55 = vld [vmem:[%s7446_s5] sm:$0x3] }
 0x28e   : > { %2010 = vmatprep.mubr.bf16.mxu0 %v6878_v40  ;;  %v1430_v40 = vpack.c.bf16 %v1390_v47, %v1390_v47 }
 0x295   : > { %2011 = vmatmul.mubr.bf16.gmra.mrb[48].mxu0 %v6874_v32  ;;  %v1313_v32 = vmul.f32 0.1, %v1233_v39 }
 0x296   : > { %2020 = vmatprep.mubr.bf16.mxu0 %v6890_v34 }
 0x29d   : > { %2021 = vmatmul.mubr.bf16.gmra.mrb[52].mxu0 %v6886_v26  ;;  %v1389_v26 = vmax.f32 %v1233_v39, %v1313_v32  ;;  %v5828_v39 = vld [vmem:[#allocation10 + $0x18] sm:$0xff]  }
 0x29e   : > { %2030 = vmatprep.mubr.bf16.mxu0 %v6902_v30  ;;  %v5824_v30 = vld [vmem:[#allocation8 + $0x38] sm:$0xff]  }
 0x29f   : > { %v1429_v34 = vpack.c.bf16 %v1389_v26, %v1389_v26 }
 0x2a5   : > { %2031 = vmatmul.mubr.bf16.gmra.mrb[56].mxu0 %v6898_v22  ;;  %v5823_v22 = vld [vmem:[#allocation8 + $0x78] sm:$0xff]  }
 0x2a6   : > { %2040 = vmatprep.mubr.bf16.mxu0 %v6914_v25  ;;  %5100 = vmatprep.subr.bf16.mxu1 %v5823_v22  ;;  %v6951_v25 = vrot.slane %v1495_v55, %v6813_v17 }
 0x2a7   : > { %5101 = vmatpush3.bf16.msra.mxu1 %v5824_v30  ;;  %v5829_v30 = vld [vmem:[#allocation10 + $0x20] sm:$0xff]  }
 0x2a8   : > { %5350 = vmatprep.subr.bf16.mxu1 %v5825_v59 }
 0x2ad   : > { %2041 = vmatmul.mubr.bf16.gmra.mrb[60].mxu0 %v6910_v9  ;;  %v6948_v9 = vrot.slane %v1495_v55, %v6807_v15 }
 0x2ae   : > { %2050 = vmatprep.mubr.bf16.mxu0 %v1418_v12 }
 0x2b5   : > { %2051 = vmatmul.mubr.bf16.gmra.mrb[64].mxu0 %v1417_v8 }
 0x2b6   : > { %2060 = vmatprep.mubr.bf16.mxu0 %v1422_v48  ;;  %v5826_v48 = vld [vmem:[#allocation10 + $0x8] sm:$0xff]  }
 0x2bd   : > { %2061 = vmatmul.mubr.bf16.gmra.mrb[68].mxu0 %v1421_v42 }
 0x2be   : > { %2070 = vmatprep.mubr.bf16.mxu0 %v1426_v6 }
 0x2c5   : > { %2071 = vmatmul.mubr.bf16.gmra.mrb[72].mxu0 %v1425_v63 }
 0x2c6   : > { %2080 = vmatprep.mubr.bf16.mxu0 %v1430_v40 }
 0x2cd   : > { %2081 = vmatmul.mubr.bf16.gmra.mrb[76].mxu0 %v1429_v34 }
 0x2ce   : > { %3082 = vmatprep.mubr.bf16.mxu0 %v6346_v0 }
 0x358   : > { %v1992_v8 = vpop.f32.mrb[40].mxu0 }
 0x359   : > { %v5438_v10 = vadd.f32 %v1992_v8, %v6948_v9  ;;  %v1994_v11 = vpop.f32.mrb[41].mxu0 }
 0x35a   : > { %v5439_v12 = vadd.f32 %v1994_v11, %v6951_v25  ;;  %v1996_v18 = vpop.f32.mrb[42].mxu0 }
 0x35b   : > { %v2089_v13 = vmul.f32 0.1, %v5438_v10  ;;  %v5440_v16 = vadd.f32 %v1996_v18, %v6948_v9  ;;  %v1998_v20 = vpop.f32.mrb[43].mxu0 }
 0x35c   : > { %v2090_v19 = vmul.f32 0.1, %v5439_v12  ;;  %v5441_v21 = vadd.f32 %v1998_v20, %v6951_v25 }
 0x35d   : > { %v2091_v23 = vmul.f32 0.1, %v5440_v16  ;;  %v2127_v27 = vmax.f32 %v5438_v10, %v2089_v13 }
 0x35e   : > { %v2092_v24 = vmul.f32 0.1, %v5441_v21  ;;  %v2128_v29 = vmax.f32 %v5439_v12, %v2090_v19 }
 0x35f   : > { %v2129_v28 = vmax.f32 %v5440_v16, %v2091_v23  ;;  %v5830_v23 = vld [vmem:[#allocation10 + $0x28] sm:$0xff]  }
 0x360   : > { %v2130_v31 = vmax.f32 %v5441_v21, %v2092_v24  ;;  %v2002_v33 = vpop.f32.mrb[44].mxu0 }
 0x361   : > { %v2165_v35 = vpack.c.bf16 %v2129_v28, %v2127_v27  ;;  %v5442_v36 = vadd.f32 %v2002_v33, %v6948_v9  ;;  %v2004_v37 = vpop.f32.mrb[45].mxu0 }
 0x362   : > { %v5443_v38 = vadd.f32 %v2004_v37, %v6951_v25  ;;  %v2006_v41 = vpop.f32.mrb[46].mxu0  ;;  %v2166_v42 = vpack.c.bf16 %v2130_v31, %v2128_v29 }
 0x363   : > { %v2093_v43 = vmul.f32 0.1, %v5442_v36  ;;  %v5444_v45 = vadd.f32 %v2006_v41, %v6948_v9  ;;  %v2008_v46 = vpop.f32.mrb[47].mxu0 }
 0x364   : > { %v2094_v50 = vmul.f32 0.1, %v5443_v38  ;;  %v5445_v51 = vadd.f32 %v2008_v46, %v6951_v25  ;;  %2352 = vmatprep.mubr.bf16.mxu1 %v2166_v42 }
 0x365   : > { %v2095_v52 = vmul.f32 0.1, %v5444_v45  ;;  %2353 = vmatmul.mubr.bf16.vlgmr.msra.gmra.mrb[40].mxu1 %v2165_v35  ;;  %v2131_v56 = vmax.f32 %v5442_v36, %v2093_v43 }
 0x366   : > { %v2096_v54 = vmul.f32 0.1, %v5445_v51  ;;  %5351 = vmatpush3.bf16.msra.mxu1 %v5825_v59  ;;  %v2132_v60 = vmax.f32 %v5443_v38, %v2094_v50 }
 0x367   : > { %v2133_v57 = vmax.f32 %v5444_v45, %v2095_v52  ;;  %5352 = vmatprep.subr.bf16.mxu1 %v5826_v48 }
 0x368   : > { %v2134_v61 = vmax.f32 %v5445_v51, %v2096_v54  ;;  %v2012_v62 = vpop.f32.mrb[48].mxu0 }
 0x369   : > { %v5446_v2 = vadd.f32 %v2012_v62, %v6948_v9  ;;  %v2014_v3 = vpop.f32.mrb[49].mxu0  ;;  %v2167_v4 = vpack.c.bf16 %v2133_v57, %v2131_v56 }
 0x36a   : > { %v5447_v63 = vadd.f32 %v2014_v3, %v6951_v25  ;;  %v2016_v6 = vpop.f32.mrb[50].mxu0  ;;  %v2168_v5 = vpack.c.bf16 %v2134_v61, %v2132_v60  ;;  %5353 = vmatpush3.bf16.msra.mxu1 %v5826_v48 }
 0x36b   : > { %v2097_v7 = vmul.f32 0.1, %v5446_v2  ;;  %v5448_v53 = vadd.f32 %v2016_v6, %v6948_v9  ;;  %v2018_v1 = vpop.f32.mrb[51].mxu0  ;;  %5354 = vmatprep.subr.bf16.mxu1 %v5827_v58 }
 0x36c   : > { %v2098_v47 = vmul.f32 0.1, %v5447_v63  ;;  %v5449_v32 = vadd.f32 %v2018_v1, %v6951_v25  ;;  %2360 = vmatprep.mubr.bf16.mxu1 %v2168_v5 }
 0x36d   : > { %v2099_v40 = vmul.f32 0.1, %v5448_v53  ;;  %2361 = vmatmul.mubr.bf16.gmra.mrb[44].mxu1 %v2167_v4  ;;  %v2135_v34 = vmax.f32 %v5446_v2, %v2097_v7 }
 0x36e   : > { %v2100_v26 = vmul.f32 0.1, %v5449_v32  ;;  %5355 = vmatpush3.bf16.msra.mxu1 %v5827_v58  ;;  %v2136_v59 = vmax.f32 %v5447_v63, %v2098_v47 }
 0x36f   : > { %v2137_v22 = vmax.f32 %v5448_v53, %v2099_v40  ;;  %5356 = vmatprep.subr.bf16.mxu1 %v5828_v39 }
 0x370   : > { %v2138_v55 = vmax.f32 %v5449_v32, %v2100_v26  ;;  %v2022_v8 = vpop.f32.mrb[52].mxu0 }
 0x371   : > { %v5450_v10 = vadd.f32 %v2022_v8, %v6948_v9  ;;  %v2024_v11 = vpop.f32.mrb[53].mxu0  ;;  %v2169_v12 = vpack.c.bf16 %v2137_v22, %v2135_v34 }
 0x372   : > { %v5451_v18 = vadd.f32 %v2024_v11, %v6951_v25  ;;  %v2026_v13 = vpop.f32.mrb[54].mxu0  ;;  %v2170_v16 = vpack.c.bf16 %v2138_v55, %v2136_v59  ;;  %5357 = vmatpush3.bf16.msra.mxu1 %v5828_v39 }
 0x373   : > { %v2101_v20 = vmul.f32 0.1, %v5450_v10  ;;  %v5452_v19 = vadd.f32 %v2026_v13, %v6948_v9  ;;  %v2028_v21 = vpop.f32.mrb[55].mxu0  ;;  %5358 = vmatprep.subr.bf16.mxu1 %v5829_v30 }
 0x374   : > { %v2102_v24 = vmul.f32 0.1, %v5451_v18  ;;  %v5453_v27 = vadd.f32 %v2028_v21, %v6951_v25  ;;  %2368 = vmatprep.mubr.bf16.mxu1 %v2170_v16 }
 0x375   : > { %v2103_v28 = vmul.f32 0.1, %v5452_v19  ;;  %2369 = vmatmul.mubr.bf16.gmra.mrb[48].mxu1 %v2169_v12  ;;  %v2139_v31 = vmax.f32 %v5450_v10, %v2101_v20 }
 0x376   : > { %v2104_v29 = vmul.f32 0.1, %v5453_v27  ;;  %5359 = vmatpush3.bf16.msra.mxu1 %v5829_v30  ;;  %v2140_v35 = vmax.f32 %v5451_v18, %v2102_v24 }
 0x377   : > { %v2141_v33 = vmax.f32 %v5452_v19, %v2103_v28  ;;  %5360 = vmatprep.subr.bf16.mxu1 %v5830_v23 }
 0x378   : > { %v2142_v36 = vmax.f32 %v5453_v27, %v2104_v29  ;;  %v2032_v37 = vpop.f32.mrb[56].mxu0 }
 0x379   : > { %v5454_v38 = vadd.f32 %v2032_v37, %v6948_v9  ;;  %v2034_v41 = vpop.f32.mrb[57].mxu0  ;;  %v2171_v42 = vpack.c.bf16 %v2141_v33, %v2139_v31 }
 0x37a   : > { %v5455_v43 = vadd.f32 %v2034_v41, %v6951_v25  ;;  %v2036_v45 = vpop.f32.mrb[58].mxu0  ;;  %v2172_v46 = vpack.c.bf16 %v2142_v36, %v2140_v35  ;;  %5361 = vmatpush3.bf16.msra.mxu1 %v5830_v23 }
 0x37b   : > { %v2105_v48 = vmul.f32 0.1, %v5454_v38  ;;  %v5456_v50 = vadd.f32 %v2036_v45, %v6948_v9  ;;  %v2038_v51 = vpop.f32.mrb[59].mxu0 }
 0x37c   : > { %v2106_v52 = vmul.f32 0.1, %v5455_v43  ;;  %v5457_v54 = vadd.f32 %v2038_v51, %v6951_v25  ;;  %2376 = vmatprep.mubr.bf16.mxu1 %v2172_v46 }
 0x37d   : > { %v2107_v56 = vmul.f32 0.1, %v5456_v50  ;;  %2377 = vmatmul.mubr.bf16.gmra.mrb[52].mxu1 %v2171_v42  ;;  %v2143_v58 = vmax.f32 %v5454_v38, %v2105_v48 }
 0x37e   : > { %v2108_v57 = vmul.f32 0.1, %v5457_v54  ;;  %v2144_v61 = vmax.f32 %v5455_v43, %v2106_v52 }
 0x37f   : > { %v2145_v60 = vmax.f32 %v5456_v50, %v2107_v56 }
 0x380   : > { %v2146_v62 = vmax.f32 %v5457_v54, %v2108_v57  ;;  %v2042_v2 = vpop.f32.mrb[60].mxu0 }
 0x381   : > { %v5458_v3 = vadd.f32 %v2042_v2, %v6948_v9  ;;  %v2044_v4 = vpop.f32.mrb[61].mxu0  ;;  %v2173_v63 = vpack.c.bf16 %v2145_v60, %v2143_v58 }
 0x382   : > { %v5459_v6 = vadd.f32 %v2044_v4, %v6951_v25  ;;  %v2046_v5 = vpop.f32.mrb[62].mxu0  ;;  %v2174_v7 = vpack.c.bf16 %v2146_v62, %v2144_v61 }
 0x383   : > { %v2109_v53 = vmul.f32 0.1, %v5458_v3  ;;  %v5460_v1 = vadd.f32 %v2046_v5, %v6948_v9  ;;  %v2048_v39 = vpop.f32.mrb[63].mxu0 }
 0x384   : > { %v2110_v47 = vmul.f32 0.1, %v5459_v6  ;;  %v5461_v32 = vadd.f32 %v2048_v39, %v6951_v25  ;;  %2384 = vmatprep.mubr.bf16.mxu1 %v2174_v7 }
 0x385   : > { %v2111_v40 = vmul.f32 0.1, %v5460_v1  ;;  %2385 = vmatmul.mubr.bf16.gmra.mrb[56].mxu1 %v2173_v63  ;;  %v2147_v34 = vmax.f32 %v5458_v3, %v2109_v53 }
 0x386   : > { %v2112_v26 = vmul.f32 0.1, %v5461_v32  ;;  %v2148_v30 = vmax.f32 %v5459_v6, %v2110_v47 }
 0x387   : > { %v2149_v22 = vmax.f32 %v5460_v1, %v2111_v40 }
 0x388   : > { %v2150_v59 = vmax.f32 %v5461_v32, %v2112_v26  ;;  %v2052_v55 = vpop.f32.mrb[64].mxu0 }
 0x389   : > { %v5462_v8 = vadd.f32 %v2052_v55, %v6948_v9  ;;  %v2054_v10 = vpop.f32.mrb[65].mxu0  ;;  %v2175_v11 = vpack.c.bf16 %v2149_v22, %v2147_v34 }
 0x38a   : > { %v5463_v12 = vadd.f32 %v2054_v10, %v6951_v25  ;;  %v2056_v18 = vpop.f32.mrb[66].mxu0  ;;  %v2176_v13 = vpack.c.bf16 %v2150_v59, %v2148_v30 }
 0x38b   : > { %v2113_v16 = vmul.f32 0.1, %v5462_v8  ;;  %v5464_v20 = vadd.f32 %v2056_v18, %v6948_v9  ;;  %v2058_v19 = vpop.f32.mrb[67].mxu0 }
 0x38c   : > { %v2114_v21 = vmul.f32 0.1, %v5463_v12  ;;  %v5465_v23 = vadd.f32 %v2058_v19, %v6951_v25  ;;  %2392 = vmatprep.mubr.bf16.mxu1 %v2176_v13 }
 0x38d   : > { %v2115_v24 = vmul.f32 0.1, %v5464_v20  ;;  %2393 = vmatmul.mubr.bf16.gmra.mrb[60].mxu1 %v2175_v11  ;;  %v2151_v28 = vmax.f32 %v5462_v8, %v2113_v16 }
 0x38e   : > { %v2116_v27 = vmul.f32 0.1, %v5465_v23  ;;  %v2152_v31 = vmax.f32 %v5463_v12, %v2114_v21 }
 0x38f   : > { %v2153_v29 = vmax.f32 %v5464_v20, %v2115_v24  ;;  %v5831_v24 = vld [vmem:[#allocation10 + $0x30] sm:$0xff]  }
 0x390   : > { %v2154_v33 = vmax.f32 %v5465_v23, %v2116_v27  ;;  %v2062_v35 = vpop.f32.mrb[68].mxu0  ;;  %5362 = vmatprep.subr.bf16.mxu1 %v5831_v24 }
 0x391   : > { %v5466_v36 = vadd.f32 %v2062_v35, %v6948_v9  ;;  %v2064_v37 = vpop.f32.mrb[69].mxu0  ;;  %v2177_v38 = vpack.c.bf16 %v2153_v29, %v2151_v28  ;;  %5363 = vmatpush3.bf16.msra.mxu1 %v5831_v24  ;;  %v6994_v28 = vld [vmem:[%s7447_s9] ss:$0 sm:$0xff]  ;;  %s5518_s9 = smul.u32 152, %s6748_s3 }
 0x392   : > { %v5467_v41 = vadd.f32 %v2064_v37, %v6951_v25  ;;  %v2066_v42 = vpop.f32.mrb[70].mxu0  ;;  %v2178_v43 = vpack.c.bf16 %v2154_v33, %v2152_v31 }
 0x393   : > { %v2117_v45 = vmul.f32 0.1, %v5466_v36  ;;  %v5468_v46 = vadd.f32 %v2066_v42, %v6948_v9  ;;  %v2068_v48 = vpop.f32.mrb[71].mxu0  ;;  %s7284_s17 = scalar_lea.vmem [#allocation17], %s5518_s9 }
 0x394   : > { %v2118_v50 = vmul.f32 0.1, %v5467_v41  ;;  %v5469_v51 = vadd.f32 %v2068_v48, %v6951_v25  ;;  %2400 = vmatprep.mubr.bf16.mxu1 %v2178_v43 }
 0x395   : > { %v2119_v52 = vmul.f32 0.1, %v5468_v46  ;;  %2401 = vmatmul.mubr.bf16.gmra.mrb[64].mxu1 %v2177_v38  ;;  %v2155_v56 = vmax.f32 %v5466_v36, %v2117_v45 }
 0x396   : > { %v2120_v54 = vmul.f32 0.1, %v5469_v51  ;;  %v2156_v58 = vmax.f32 %v5467_v41, %v2118_v50 }
 0x397   : > { %v2157_v57 = vmax.f32 %v5468_v46, %v2119_v52 }
 0x398   : > { %v2158_v60 = vmax.f32 %v5469_v51, %v2120_v54  ;;  %v2072_v61 = vpop.f32.mrb[72].mxu0 }
 0x399   : > { %v5470_v62 = vadd.f32 %v2072_v61, %v6948_v9  ;;  %v2074_v2 = vpop.f32.mrb[73].mxu0  ;;  %v2179_v3 = vpack.c.bf16 %v2157_v57, %v2155_v56 }
 0x39a   : > { %v5471_v4 = vadd.f32 %v2074_v2, %v6951_v25  ;;  %v2076_v63 = vpop.f32.mrb[74].mxu0  ;;  %v2180_v6 = vpack.c.bf16 %v2158_v60, %v2156_v58 }
 0x39b   : > { %v2121_v5 = vmul.f32 0.1, %v5470_v62  ;;  %v5472_v7 = vadd.f32 %v2076_v63, %v6948_v9  ;;  %v2078_v53 = vpop.f32.mrb[75].mxu0 }
 0x39c   : > { %v2122_v1 = vmul.f32 0.1, %v5471_v4  ;;  %v5473_v39 = vadd.f32 %v2078_v53, %v6951_v25  ;;  %2408 = vmatprep.mubr.bf16.mxu1 %v2180_v6 }
 0x39d   : > { %v2123_v47 = vmul.f32 0.1, %v5472_v7  ;;  %2409 = vmatmul.mubr.bf16.gmra.mrb[68].mxu1 %v2179_v3  ;;  %v2159_v40 = vmax.f32 %v5470_v62, %v2121_v5 }
 0x39e   : > { %v2124_v32 = vmul.f32 0.1, %v5473_v39  ;;  %v2160_v34 = vmax.f32 %v5471_v4, %v2122_v1 }
 0x39f   : > { %v2161_v26 = vmax.f32 %v5472_v7, %v2123_v47 }
 0x3a0   : > { %v2162_v22 = vmax.f32 %v5473_v39, %v2124_v32  ;;  %v2082_v30 = vpop.f32.mrb[76].mxu0  ;;  %v5834_v39 = vld [vmem:[#allocation11 + $0x8] sm:$0xff]  }
 0x3a1   : > { %v5474_v59 = vadd.f32 %v2082_v30, %v6948_v9  ;;  %v2084_v55 = vpop.f32.mrb[77].mxu0  ;;  %v2181_v8 = vpack.c.bf16 %v2161_v26, %v2159_v40  ;;  %v5832_v9 = vld [vmem:[#allocation10 + $0x38] sm:$0xff]  }
 0x3a2   : > { %v5475_v10 = vadd.f32 %v2084_v55, %v6951_v25  ;;  %v2086_v11 = vpop.f32.mrb[78].mxu0  ;;  %v2182_v12 = vpack.c.bf16 %v2162_v22, %v2160_v34  ;;  %5364 = vmatprep.subr.bf16.mxu1 %v5832_v9  ;;  %v5833_v25 = vld [vmem:[#allocation11] sm:$0xff]   ;;  %v5835_v34 = vld [vmem:[#allocation11 + $0x10] sm:$0xff]  }
 0x3a3   : > { %v2125_v18 = vmul.f32 0.1, %v5474_v59  ;;  %v2087_v13 = vpop.f32.mrb[79].mxu0  ;;  %5365 = vmatpush3.bf16.msra.mxu1 %v5832_v9 }
 0x3a4   : > { %v2126_v16 = vmul.f32 0.1, %v5475_v10  ;;  %2416 = vmatprep.mubr.bf16.mxu1 %v2182_v12  ;;  %5386 = vmatprep.subr.bf16.mxu1 %v5833_v25  ;;  %v5836_v13 = vld [vmem:[#allocation11 + $0x18] sm:$0xff]  }
 0x3a5   : > { %2417 = vmatmul.mubr.bf16.gmra.mrb[72].mxu1 %v2181_v8  ;;  %v2163_v19 = vmax.f32 %v5474_v59, %v2125_v18 }
 0x3a6   : > { %v2164_v20 = vmax.f32 %v5475_v10, %v2126_v16 }
 0x3a7   : > { %v2183_v23 = vpack.c.bf16 %v2163_v19, %v2163_v19 }
 0x3a8   : > { %v2184_v21 = vpack.c.bf16 %v2164_v20, %v2164_v20 }
 0x3aa   : > { %2424 = vmatprep.mubr.bf16.mxu1 %v2184_v21 }
 0x3ad   : > { %2425 = vmatmul.mubr.bf16.gmra.mrb[76].mxu1 %v2183_v23  ;;  %v5837_v23 = vld [vmem:[#allocation11 + $0x20] sm:$0xff]  }
 0x438   : > { %v5102_v27 = vpop.f32.mrb[40].mxu1 }
 0x439   : > { %v5103_v29 = vpop.f32.mrb[41].mxu1 }
 0x43a   : > { %v5104_v31 = vadd.f32 %v5103_v29, %v5102_v27  ;;  %v5105_v33 = vpop.f32.mrb[42].mxu1 }
 0x43b   : > { %v5106_v35 = vpop.f32.mrb[43].mxu1 }
 0x43c   : > { %v2355_v36 = vadd.f32 %v5104_v31, %v6994_v28  ;;  %v5107_v37 = vadd.f32 %v5106_v35, %v5105_v33 }
 0x43e   : > { %v2432_v38 = vmul.f32 0.1, %v2355_v36  ;;  %v2358_v41 = vadd.f32 %v5107_v37, %v6994_v28  ;;  %v5838_v37 = vld [vmem:[#allocation11 + $0x28] sm:$0xff]  }
 0x440   : > { %v2433_v42 = vmul.f32 0.1, %v2358_v41  ;;  %v5108_v43 = vpop.f32.mrb[44].mxu1  ;;  %v2451_v46 = vmax.f32 %v2355_v36, %v2432_v38 }
 0x441   : > { %v5109_v45 = vpop.f32.mrb[45].mxu1 }
 0x442   : > { %v2452_v48 = vmax.f32 %v2358_v41, %v2433_v42  ;;  %v5110_v50 = vadd.f32 %v5109_v45, %v5108_v43  ;;  %v5111_v51 = vpop.f32.mrb[46].mxu1 }
 0x443   : > { %v5112_v52 = vpop.f32.mrb[47].mxu1 }
 0x444   : > { %v2363_v54 = vadd.f32 %v5110_v50, %v6994_v28  ;;  %v5113_v56 = vadd.f32 %v5112_v52, %v5111_v51  ;;  %v2470_v57 = vpack.c.bf16 %v2452_v48, %v2451_v46 }
 0x446   : > { %v2434_v58 = vmul.f32 0.1, %v2363_v54  ;;  %v2366_v60 = vadd.f32 %v5113_v56, %v6994_v28  ;;  %5366 = vmatprep.mubr.bf16.mxu1 %v2470_v57 }
 0x448   : > { %v2435_v61 = vmul.f32 0.1, %v2366_v60  ;;  %v5114_v62 = vpop.f32.mrb[48].mxu1  ;;  %v2453_v3 = vmax.f32 %v2363_v54, %v2434_v58 }
 0x449   : > { %v5115_v2 = vpop.f32.mrb[49].mxu1 }
 0x44a   : > { %v2454_v4 = vmax.f32 %v2366_v60, %v2435_v61  ;;  %v5116_v63 = vadd.f32 %v5115_v2, %v5114_v62  ;;  %v5117_v6 = vpop.f32.mrb[50].mxu1 }
 0x44b   : > { %v5118_v5 = vpop.f32.mrb[51].mxu1 }
 0x44c   : > { %v2471_v7 = vpack.c.bf16 %v2454_v4, %v2453_v3  ;;  %v2371_v53 = vadd.f32 %v5116_v63, %v6994_v28  ;;  %v5119_v1 = vadd.f32 %v5118_v5, %v5117_v6 }
 0x44e   : > { %v2436_v47 = vmul.f32 0.1, %v2371_v53  ;;  %v2374_v32 = vadd.f32 %v5119_v1, %v6994_v28  ;;  %5367 = vmatmul.mubr.bf16.vlgmr.msra.gmra.mrb[80].mxu1 %v2471_v7 }
 0x44f   : > { %5387 = vmatpush3.bf16.msra.mxu1 %v5833_v25 }
 0x450   : > { %v2437_v40 = vmul.f32 0.1, %v2374_v32  ;;  %v5120_v26 = vpop.f32.mrb[52].mxu1  ;;  %5388 = vmatprep.subr.bf16.mxu1 %v5834_v39  ;;  %v2455_v30 = vmax.f32 %v2371_v53, %v2436_v47 }
 0x451   : > { %v5121_v22 = vpop.f32.mrb[53].mxu1 }
 0x452   : > { %v2456_v59 = vmax.f32 %v2374_v32, %v2437_v40  ;;  %v5122_v55 = vadd.f32 %v5121_v22, %v5120_v26  ;;  %v5123_v8 = vpop.f32.mrb[54].mxu1 }
 0x453   : > { %v5124_v10 = vpop.f32.mrb[55].mxu1  ;;  %5389 = vmatpush3.bf16.msra.mxu1 %v5834_v39 }
 0x454   : > { %v2379_v11 = vadd.f32 %v5122_v55, %v6994_v28  ;;  %v5125_v12 = vadd.f32 %v5124_v10, %v5123_v8  ;;  %v2472_v18 = vpack.c.bf16 %v2456_v59, %v2455_v30  ;;  %5390 = vmatprep.subr.bf16.mxu1 %v5835_v34 }
 0x456   : > { %v2438_v16 = vmul.f32 0.1, %v2379_v11  ;;  %v2382_v20 = vadd.f32 %v5125_v12, %v6994_v28  ;;  %5370 = vmatprep.mubr.bf16.mxu1 %v2472_v18 }
 0x457   : > { %5391 = vmatpush3.bf16.msra.mxu1 %v5835_v34 }
 0x458   : > { %v2439_v19 = vmul.f32 0.1, %v2382_v20  ;;  %v5126_v21 = vpop.f32.mrb[56].mxu1  ;;  %5392 = vmatprep.subr.bf16.mxu1 %v5836_v13  ;;  %v2457_v9 = vmax.f32 %v2379_v11, %v2438_v16 }
 0x459   : > { %v5127_v24 = vpop.f32.mrb[57].mxu1 }
 0x45a   : > { %v2458_v25 = vmax.f32 %v2382_v20, %v2439_v19  ;;  %v5128_v27 = vadd.f32 %v5127_v24, %v5126_v21  ;;  %v5129_v29 = vpop.f32.mrb[58].mxu1 }
 0x45b   : > { %v5130_v31 = vpop.f32.mrb[59].mxu1  ;;  %5393 = vmatpush3.bf16.msra.mxu1 %v5836_v13 }
 0x45c   : > { %v2387_v33 = vadd.f32 %v5128_v27, %v6994_v28  ;;  %v5131_v35 = vadd.f32 %v5130_v31, %v5129_v29  ;;  %v2473_v36 = vpack.c.bf16 %v2458_v25, %v2457_v9  ;;  %5394 = vmatprep.subr.bf16.mxu1 %v5837_v23 }
 0x45e   : > { %v2440_v38 = vmul.f32 0.1, %v2387_v33  ;;  %v2390_v41 = vadd.f32 %v5131_v35, %v6994_v28  ;;  %5371 = vmatmul.mubr.bf16.gmra.mrb[84].mxu1 %v2473_v36 }
 0x45f   : > { %5395 = vmatpush3.bf16.msra.mxu1 %v5837_v23 }
 0x460   : > { %v2441_v42 = vmul.f32 0.1, %v2390_v41  ;;  %v5132_v43 = vpop.f32.mrb[60].mxu1  ;;  %5396 = vmatprep.subr.bf16.mxu1 %v5838_v37  ;;  %v2459_v46 = vmax.f32 %v2387_v33, %v2440_v38 }
 0x461   : > { %v5133_v45 = vpop.f32.mrb[61].mxu1 }
 0x462   : > { %v2460_v48 = vmax.f32 %v2390_v41, %v2441_v42  ;;  %v5134_v50 = vadd.f32 %v5133_v45, %v5132_v43  ;;  %v5135_v51 = vpop.f32.mrb[62].mxu1 }
 0x463   : > { %v5136_v52 = vpop.f32.mrb[63].mxu1  ;;  %5397 = vmatpush3.bf16.msra.mxu1 %v5838_v37 }
 0x464   : > { %v2395_v54 = vadd.f32 %v5134_v50, %v6994_v28  ;;  %v5137_v56 = vadd.f32 %v5136_v52, %v5135_v51  ;;  %v2474_v57 = vpack.c.bf16 %v2460_v48, %v2459_v46 }
 0x466   : > { %v2442_v58 = vmul.f32 0.1, %v2395_v54  ;;  %v2398_v60 = vadd.f32 %v5137_v56, %v6994_v28  ;;  %5374 = vmatprep.mubr.bf16.mxu1 %v2474_v57  ;;  %v5840_v56 = vld [vmem:[#allocation11 + $0x38] sm:$0xff]   ;;  %v5841_v57 = vld [vmem:[#allocation13] ss:$8 sps:$4 sm:$0xff]  }
 0x468   : > { %v2443_v61 = vmul.f32 0.1, %v2398_v60  ;;  %v5138_v62 = vpop.f32.mrb[64].mxu1  ;;  %v2461_v3 = vmax.f32 %v2395_v54, %v2442_v58  ;;  %v5839_v54 = vld [vmem:[#allocation11 + $0x30] sm:$0xff]   ;;  %v5843_v58 = vld [vmem:[#allocation13 + $0x4] ss:$8 sps:$4 sm:$0xff]  }
 0x469   : > { %v5139_v2 = vpop.f32.mrb[65].mxu1  ;;  %5398 = vmatprep.subr.bf16.mxu1 %v5839_v54  ;;  %3050 = vmatprep.subr.bf16.mxu0 %v5843_v58 }
 0x46a   : > { %v2462_v4 = vmax.f32 %v2398_v60, %v2443_v61  ;;  %v5140_v63 = vadd.f32 %v5139_v2, %v5138_v62  ;;  %v5141_v6 = vpop.f32.mrb[66].mxu1  ;;  %5399 = vmatpush3.bf16.msra.mxu1 %v5839_v54  ;;  %v5846_v60 = vld [vmem:[#allocation13 + $0x14] ss:$8 sps:$4 sm:$0xff]   ;;  %3051 = vmatpush1.bf16.msra.mxu0 %v5841_v57  ;;  %v5844_v61 = vld [vmem:[#allocation13 + $0x10] ss:$8 sps:$4 sm:$0xff]  }
 0x46b   : > { %v5142_v5 = vpop.f32.mrb[67].mxu1  ;;  %5400 = vmatprep.subr.bf16.mxu1 %v5840_v56  ;;  %3052 = vmatprep.subr.bf16.mxu0 %v5846_v60  ;;  %v5847_v62 = vld [vmem:[#allocation13 + $0x20] ss:$8 sps:$4 sm:$0xff]   ;;  %v5852_v2 = vld [vmem:[#allocation13 + $0x34] ss:$8 sps:$4 sm:$0xff]  }
 0x46c   : > { %v2403_v7 = vadd.f32 %v5140_v63, %v6994_v28  ;;  %v5143_v53 = vadd.f32 %v5142_v5, %v5141_v6  ;;  %v2475_v1 = vpack.c.bf16 %v2462_v4, %v2461_v3  ;;  %v5850_v3 = vld [vmem:[#allocation13 + $0x30] ss:$8 sps:$4 sm:$0xff]   ;;  %v5855_v4 = vld [vmem:[#allocation13 + $0x44] ss:$8 sps:$4 sm:$0xff]   ;;  %v5853_v63 = vld [vmem:[#allocation13 + $0x40] ss:$8 sps:$4 sm:$0xff]  }
 0x46d   : > { %v5858_v6 = vld [vmem:[#allocation13 + $0x54] ss:$8 sps:$4 sm:$0xff]   ;;  %v5856_v5 = vld [vmem:[#allocation13 + $0x50] ss:$8 sps:$4 sm:$0xff]  }
 0x46e   : > { %v2444_v39 = vmul.f32 0.1, %v2403_v7  ;;  %v2406_v47 = vadd.f32 %v5143_v53, %v6994_v28  ;;  %5375 = vmatmul.mubr.bf16.gmra.mrb[88].mxu1 %v2475_v1  ;;  %3053 = vmatpush1.bf16.msra.mxu0 %v5844_v61  ;;  %v5859_v53 = vld [vmem:[#allocation13 + $0x60] ss:$8 sps:$4 sm:$0xff]  }
 0x46f   : > { %5401 = vmatpush3.bf16.msra.mxu1 %v5840_v56  ;;  %v7018_v1 = vld [vmem:[%s7448_s19] ss:$0 sm:$0xff]  ;;  %s4657_s19 = sshll.u32 %s7284_s17, 4  ;;  %s7328_s19 = int_to_ptr.vmem [resolvable:$true] %s4657_s19 }
 0x470   : > { %v2445_v32 = vmul.f32 0.1, %v2406_v47  ;;  %v5144_v40 = vpop.f32.mrb[68].mxu1  ;;  %v2463_v34 = vmax.f32 %v2403_v7, %v2444_v39  ;;  %v5861_v7 = vld [vmem:[#allocation13 + $0x64] ss:$8 sps:$4 sm:$0xff]   ;;  %s6247_s23 = scalar_lea.vmem %s7328_s19, 2432 }
 0x471   : > { %v5145_v26 = vpop.f32.mrb[69].mxu1  ;;  %p6248_p10 = scmp.ne.s32.totalorder %s7328_s19, %s6247_s23 }
 0x472   : > { %v2464_v22 = vmax.f32 %v2406_v47, %v2445_v32  ;;  %v5146_v30 = vadd.f32 %v5145_v26, %v5144_v40  ;;  %v5147_v59 = vpop.f32.mrb[70].mxu1 }
 0x473   : > { %v5148_v55 = vpop.f32.mrb[71].mxu1  ;;  %p6249_p11 = pnand %p6248_p10, %p7454_p1 }
 0x474   : > { %v2411_v8 = vadd.f32 %v5146_v30, %v6994_v28  ;;  %v5149_v10 = vadd.f32 %v5148_v55, %v5147_v59  ;;  %v2476_v11 = vpack.c.bf16 %v2464_v22, %v2463_v34 }
 0x475   : > { %p6250_p12 = pneg %p6249_p11 }
 0x476   : > { %v2446_v12 = vmul.f32 0.1, %v2411_v8  ;;  %v2414_v18 = vadd.f32 %v5149_v10, %v6994_v28  ;;  %5378 = vmatprep.mubr.bf16.mxu1 %v2476_v11 }
 0x478   : > { %v2447_v13 = vmul.f32 0.1, %v2414_v18  ;;  %v5150_v16 = vpop.f32.mrb[72].mxu1  ;;  %v2465_v19 = vmax.f32 %v2411_v8, %v2446_v12 }
 0x479   : > { %v5151_v20 = vpop.f32.mrb[73].mxu1 }
 0x47a   : > { %v2466_v21 = vmax.f32 %v2414_v18, %v2447_v13  ;;  %v5152_v23 = vadd.f32 %v5151_v20, %v5150_v16  ;;  %v5153_v24 = vpop.f32.mrb[74].mxu1 }
 0x47b   : > { %v5154_v9 = vpop.f32.mrb[75].mxu1 }
 0x47c   : > { %v2419_v25 = vadd.f32 %v5152_v23, %v6994_v28  ;;  %v5155_v27 = vadd.f32 %v5154_v9, %v5153_v24  ;;  %v2477_v29 = vpack.c.bf16 %v2466_v21, %v2465_v19 }
 0x47e   : > { %v2448_v31 = vmul.f32 0.1, %v2419_v25  ;;  %v2422_v33 = vadd.f32 %v5155_v27, %v6994_v28  ;;  %5379 = vmatmul.mubr.bf16.gmra.mrb[92].mxu1 %v2477_v29 }
 0x480   : > { %v2449_v35 = vmul.f32 0.1, %v2422_v33  ;;  %v5156_v36 = vpop.f32.mrb[76].mxu1  ;;  %v2467_v38 = vmax.f32 %v2419_v25, %v2448_v31 }
 0x481   : > { %v5157_v37 = vpop.f32.mrb[77].mxu1 }
 0x482   : > { %v2468_v41 = vmax.f32 %v2422_v33, %v2449_v35  ;;  %v5158_v42 = vadd.f32 %v5157_v37, %v5156_v36  ;;  %v5159_v43 = vpop.f32.mrb[78].mxu1 }
 0x483   : > { %v5160_v45 = vpop.f32.mrb[79].mxu1 }
 0x484   : > { %v2427_v46 = vadd.f32 %v5158_v42, %v6994_v28  ;;  %v2478_v48 = vpack.c.bf16 %v2468_v41, %v2467_v38  ;;  %v5849_v28 = vld [vmem:[#allocation13 + $0x24] ss:$8 sps:$4 sm:$0xff]  }
 0x485   : > { %3054 = vmatprep.subr.bf16.mxu0 %v5849_v28 }
 0x486   : > { %v2450_v50 = vmul.f32 0.1, %v2427_v46  ;;  %5382 = vmatprep.mubr.bf16.mxu1 %v2478_v48  ;;  %3055 = vmatpush1.bf16.msra.mxu0 %v5847_v62 }
 0x487   : > { %3056 = vmatprep.subr.bf16.mxu0 %v5852_v2 }
 0x488   : > { %v2469_v51 = vmax.f32 %v2427_v46, %v2450_v50 }
 0x48a   : > { %v2479_v52 = vpack.c.bf16 %v2469_v51, %v2469_v51  ;;  %3057 = vmatpush1.bf16.msra.mxu0 %v5850_v3 }
 0x48b   : > { %3058 = vmatprep.subr.bf16.mxu0 %v5855_v4 }
 0x48c   : > { %5383 = vmatmul.mubr.bf16.gmra.mrb[96].mxu1 %v2479_v52 }
 0x48e   : > { %3059 = vmatpush1.bf16.msra.mxu0 %v5853_v63 }
 0x48f   : > { %3060 = vmatprep.subr.bf16.mxu0 %v5858_v6 }
 0x492   : > { %3061 = vmatpush1.bf16.msra.mxu0 %v5856_v5 }
 0x493   : > { %3062 = vmatprep.subr.bf16.mxu0 %v5861_v7 }
 0x496   : > { %3063 = vmatpush1.bf16.msra.mxu0 %v5859_v53 }
 0x521   : > { %v5368_v39 = vpop.f32.mrb[80].mxu1 }
 0x522   : > { %v2594_v47 = vadd.f32 %v5368_v39, %v7018_v1  ;;  %v2585_v32 = vpop.f32.mrb[81].mxu1 }
 0x523   : > { %v2586_v40 = vadd.f32 %v7018_v1, %v2585_v32  ;;  %v5369_v26 = vpop.f32.mrb[82].mxu1 }
 0x524   : > { %v2665_v34 = vmul.f32 0.1, %v2594_v47  ;;  %v2597_v22 = vadd.f32 %v5369_v26, %v7018_v1  ;;  %v2588_v30 = vpop.f32.mrb[83].mxu1 }
 0x525   : > { %v2663_v59 = vmul.f32 0.1, %v2586_v40  ;;  %v2589_v55 = vadd.f32 %v7018_v1, %v2588_v30 }
 0x526   : > { %v2666_v8 = vmul.f32 0.1, %v2597_v22  ;;  %v2684_v11 = vmax.f32 %v2594_v47, %v2665_v34 }
 0x527   : > { %v2664_v10 = vmul.f32 0.1, %v2589_v55  ;;  %v2682_v18 = vmax.f32 %v2586_v40, %v2663_v59 }
 0x528   : > { %v2685_v12 = vmax.f32 %v2597_v22, %v2666_v8 }
 0x529   : > { %v2683_v13 = vmax.f32 %v2589_v55, %v2664_v10 }
 0x52a   : > { %v2702_v16 = vpack.c.bf16 %v2685_v12, %v2684_v11 }
 0x52b   : > { %v2701_v20 = vpack.c.bf16 %v2683_v13, %v2682_v18 }
 0x52d   : > { %5402 = vmatprep.mubr.bf16.mxu1 %v2701_v20 }
 0x52e   : > { %5403 = vmatmul.mubr.bf16.vlgmr.msra.gmra.mrb[100].mxu1 %v2702_v16 }
 0x531   : > { %v5372_v19 = vpop.f32.mrb[84].mxu1 }
 0x532   : > { %v2610_v21 = vadd.f32 %v5372_v19, %v7018_v1  ;;  %v2601_v23 = vpop.f32.mrb[85].mxu1 }
 0x533   : > { %v2602_v24 = vadd.f32 %v7018_v1, %v2601_v23  ;;  %v5373_v9 = vpop.f32.mrb[86].mxu1 }
 0x534   : > { %v2669_v25 = vmul.f32 0.1, %v2610_v21  ;;  %v2613_v27 = vadd.f32 %v5373_v9, %v7018_v1  ;;  %v2604_v29 = vpop.f32.mrb[87].mxu1 }
 0x535   : > { %v2667_v31 = vmul.f32 0.1, %v2602_v24  ;;  %v2605_v33 = vadd.f32 %v7018_v1, %v2604_v29 }
 0x536   : > { %v2670_v35 = vmul.f32 0.1, %v2613_v27  ;;  %v2688_v37 = vmax.f32 %v2610_v21, %v2669_v25 }
 0x537   : > { %v2668_v36 = vmul.f32 0.1, %v2605_v33  ;;  %v2686_v41 = vmax.f32 %v2602_v24, %v2667_v31 }
 0x538   : > { %v2689_v38 = vmax.f32 %v2613_v27, %v2670_v35 }
 0x539   : > { %v2687_v42 = vmax.f32 %v2605_v33, %v2668_v36 }
 0x53a   : > { %v2704_v43 = vpack.c.bf16 %v2689_v38, %v2688_v37  ;;  %v5862_v37 = vld [vmem:[#allocation13 + $0x70] ss:$8 sps:$4 sm:$0xff]   ;;  %v5864_v38 = vld [vmem:[#allocation13 + $0x74] ss:$8 sps:$4 sm:$0xff]  }
 0x53b   : > { %v2703_v45 = vpack.c.bf16 %v2687_v42, %v2686_v41  ;;  %3064 = vmatprep.subr.bf16.mxu0 %v5864_v38  ;;  %v5865_v41 = vld [vmem:[#allocation14] ss:$16 sps:$4 sm:$0xff]   ;;  %v5867_v42 = vld [vmem:[#allocation14 + $0x4] ss:$16 sps:$4 sm:$0xff]  }
 0x53c   : > { %3065 = vmatpush1.bf16.msra.mxu0 %v5862_v37  ;;  %3683 = vmatprep.subr.bf16.mxu1 %v5867_v42  ;;  %v5888_v37 = vld [vmem:[#allocation14 + $0x6c] ss:$16 sps:$4 sm:$0xff]  }
 0x53d   : > { %5406 = vmatprep.mubr.bf16.mxu1 %v2703_v45  ;;  %v5873_v45 = vld [vmem:[#allocation14 + $0x24] ss:$16 sps:$4 sm:$0xff]   ;;  %3684 = vmatpush1.bf16.msra.mxu1 %v5865_v41 }
 0x53e   : > { %5407 = vmatmul.mubr.bf16.gmra.mrb[104].mxu1 %v2704_v43  ;;  %v5870_v43 = vld [vmem:[#allocation14 + $0xc] ss:$16 sps:$4 sm:$0xff]   ;;  %3685 = vmatprep.subr.bf16.mxu1 %v5873_v45 }
 0x53f   : > { %3814 = vmatprep.subr.bf16.mxu0 %v5870_v43 }
 0x541   : > { %v5376_v46 = vpop.f32.mrb[88].mxu1 }
 0x542   : > { %v2626_v48 = vadd.f32 %v5376_v46, %v7018_v1  ;;  %v2617_v50 = vpop.f32.mrb[89].mxu1  ;;  %v5879_v46 = vld [vmem:[#allocation14 + $0x44] ss:$16 sps:$4 sm:$0xff]  }
 0x543   : > { %v2618_v51 = vadd.f32 %v7018_v1, %v2617_v50  ;;  %v5377_v52 = vpop.f32.mrb[90].mxu1  ;;  %v5885_v50 = vld [vmem:[#allocation14 + $0x64] ss:$16 sps:$4 sm:$0xff]  }
 0x544   : > { %v2673_v54 = vmul.f32 0.1, %v2626_v48  ;;  %v2629_v56 = vadd.f32 %v5377_v52, %v7018_v1  ;;  %v2620_v57 = vpop.f32.mrb[91].mxu1  ;;  %v5891_v52 = vld [vmem:[#allocation14 + $0x84] ss:$16 sps:$4 sm:$0xff]  }
 0x545   : > { %v2671_v58 = vmul.f32 0.1, %v2618_v51  ;;  %v2621_v60 = vadd.f32 %v7018_v1, %v2620_v57  ;;  %v5895_v57 = vld [vmem:[#allocation14 + $0xa0] ss:$16 sps:$4 sm:$0xff]  }
 0x546   : > { %v2674_v61 = vmul.f32 0.1, %v2629_v56  ;;  %v2692_v62 = vmax.f32 %v2626_v48, %v2673_v54  ;;  %v5877_v48 = vld [vmem:[#allocation14 + $0x40] ss:$16 sps:$4 sm:$0xff]  }
 0x547   : > { %v2672_v28 = vmul.f32 0.1, %v2621_v60  ;;  %v2690_v3 = vmax.f32 %v2618_v51, %v2671_v58  ;;  %v5883_v51 = vld [vmem:[#allocation14 + $0x60] ss:$16 sps:$4 sm:$0xff]   ;;  %v5903_v58 = vld [vmem:[#allocation14 + $0xc4] ss:$16 sps:$4 sm:$0xff]  }
 0x548   : > { %v2693_v2 = vmax.f32 %v2629_v56, %v2674_v61  ;;  %v5889_v54 = vld [vmem:[#allocation14 + $0x80] ss:$16 sps:$4 sm:$0xff]   ;;  %v5897_v56 = vld [vmem:[#allocation14 + $0xa4] ss:$16 sps:$4 sm:$0xff]  }
 0x549   : > { %v2691_v4 = vmax.f32 %v2621_v60, %v2672_v28  ;;  %v5901_v60 = vld [vmem:[#allocation14 + $0xc0] ss:$16 sps:$4 sm:$0xff]   ;;  %v5909_v61 = vld [vmem:[#allocation14 + $0xe4] ss:$16 sps:$4 sm:$0xff]  }
 0x54a   : > { %v2706_v63 = vpack.c.bf16 %v2693_v2, %v2692_v62  ;;  %v5907_v28 = vld [vmem:[#allocation14 + $0xe0] ss:$16 sps:$4 sm:$0xff]   ;;  %v5915_v62 = vld [vmem:[#allocation14 + $0x104] ss:$16 sps:$4 sm:$0xff]  }
 0x54b   : > { %v2705_v6 = vpack.c.bf16 %v2691_v4, %v2690_v3  ;;  %v5913_v2 = vld [vmem:[#allocation14 + $0x100] ss:$16 sps:$4 sm:$0xff]   ;;  %v5921_v3 = vld [vmem:[#allocation14 + $0x124] ss:$16 sps:$4 sm:$0xff]  }
 0x54c   : > { %v5919_v4 = vld [vmem:[#allocation14 + $0x120] ss:$16 sps:$4 sm:$0xff]  }
 0x54d   : > { %5410 = vmatprep.mubr.bf16.mxu1 %v2705_v6  ;;  %v5925_v6 = vld [vmem:[#allocation14 + $0x140] ss:$16 sps:$4 sm:$0xff]  }
 0x54e   : > { %5411 = vmatmul.mubr.bf16.gmra.mrb[108].mxu1 %v2706_v63  ;;  %v5927_v63 = vld [vmem:[#allocation14 + $0x144] ss:$16 sps:$4 sm:$0xff]  }
 0x551   : > { %v5380_v5 = vpop.f32.mrb[92].mxu1 }
 0x552   : > { %v2642_v7 = vadd.f32 %v5380_v5, %v7018_v1  ;;  %v2633_v53 = vpop.f32.mrb[93].mxu1  ;;  %v5933_v5 = vld [vmem:[#allocation14 + $0x164] ss:$16 sps:$4 sm:$0xff]  }
 0x553   : > { %v2634_v39 = vadd.f32 %v7018_v1, %v2633_v53  ;;  %v5381_v47 = vpop.f32.mrb[94].mxu1  ;;  %v5931_v53 = vld [vmem:[#allocation14 + $0x160] ss:$16 sps:$4 sm:$0xff]  }
 0x554   : > { %v2677_v32 = vmul.f32 0.1, %v2642_v7  ;;  %v2645_v40 = vadd.f32 %v5381_v47, %v7018_v1  ;;  %v2636_v26 = vpop.f32.mrb[95].mxu1  ;;  %v5939_v47 = vld [vmem:[#allocation14 + $0x184] ss:$16 sps:$4 sm:$0xff]  }
 0x555   : > { %v2675_v34 = vmul.f32 0.1, %v2634_v39  ;;  %v2637_v22 = vadd.f32 %v7018_v1, %v2636_v26 }
 0x556   : > { %v2678_v30 = vmul.f32 0.1, %v2645_v40  ;;  %v2696_v55 = vmax.f32 %v2642_v7, %v2677_v32  ;;  %v7042_v7 = vld [vmem:[%s7449_s11] ss:$0 sm:$0xff]  ;;  %s7453_s11 = sld [smem:[#allocation38_spill]] }
 0x557   : > { %v2676_v59 = vmul.f32 0.1, %v2637_v22  ;;  %v2694_v10 = vmax.f32 %v2634_v39, %v2675_v34 }
 0x558   : > { %v2697_v8 = vmax.f32 %v2645_v40, %v2678_v30 }
 0x559   : > { %v2695_v11 = vmax.f32 %v2637_v22, %v2676_v59 }
 0x55a   : > { %v2708_v12 = vpack.c.bf16 %v2697_v8, %v2696_v55  ;;  %v5937_v55 = vld [vmem:[#allocation14 + $0x180] ss:$16 sps:$4 sm:$0xff]  }
 0x55b   : > { %v2707_v18 = vpack.c.bf16 %v2695_v11, %v2694_v10 }
 0x55c   : > { %s7326_s21 = scalar_lea.hbm %s7453_s11, %s5085_s10 }
 0x55d   : > { %5414 = vmatprep.mubr.bf16.mxu1 %v2707_v18 }
 0x55e   : > { %5415 = vmatmul.mubr.bf16.gmra.mrb[112].mxu1 %v2708_v12 }
 0x55f   : > { %v5384_v13 = vpop.f32.mrb[96].mxu1 }
 0x560   : > { %v2658_v16 = vadd.f32 %v5384_v13, %v7018_v1  ;;  %v2649_v20 = vpop.f32.mrb[97].mxu1 }
 0x561   : > { %v2650_v19 = vadd.f32 %v7018_v1, %v2649_v20  ;;  %v5385_v21 = vpop.f32.mrb[98].mxu1 }
 0x562   : > { %v2681_v23 = vmul.f32 0.1, %v2658_v16  ;;  %v2652_v24 = vpop.f32.mrb[99].mxu1  ;;  %v5868_v21 = vld [vmem:[#allocation14 + $0x8] ss:$16 sps:$4 sm:$0xff]  }
 0x563   : > { %v2679_v9 = vmul.f32 0.1, %v2650_v19  ;;  %v2653_v25 = vadd.f32 %v7018_v1, %v2652_v24  ;;  %v5871_v1 = vld [vmem:[#allocation14 + $0x20] ss:$16 sps:$4 sm:$0xff]   ;;  %v5876_v24 = vld [vmem:[#allocation14 + $0x2c] ss:$16 sps:$4 sm:$0xff]  }
 0x564   : > { %v2700_v29 = vmax.f32 %v2658_v16, %v2681_v23  ;;  %3686 = vmatpush1.bf16.msra.mxu1 %v5871_v1 }
 0x565   : > { %v2680_v27 = vmul.f32 0.1, %v2653_v25  ;;  %v2698_v31 = vmax.f32 %v2650_v19, %v2679_v9  ;;  %3687 = vmatprep.subr.bf16.mxu1 %v5879_v46  ;;  %v5874_v9 = vld [vmem:[#allocation14 + $0x28] ss:$16 sps:$4 sm:$0xff]  }
 0x566   : > { %v2710_v36 = vpack.c.bf16 %v2700_v29, %v2700_v29  ;;  %v5886_v46 = vld [vmem:[#allocation14 + $0x68] ss:$16 sps:$4 sm:$0xff]  }
 0x567   : > { %v2699_v33 = vmax.f32 %v2653_v25, %v2680_v27  ;;  %v5882_v25 = vld [vmem:[#allocation14 + $0x4c] ss:$16 sps:$4 sm:$0xff]  }
 0x568   : > { %3688 = vmatpush1.bf16.msra.mxu1 %v5877_v48 }
 0x569   : > { %v2709_v35 = vpack.c.bf16 %v2699_v33, %v2698_v31  ;;  %3689 = vmatprep.subr.bf16.mxu1 %v5885_v50  ;;  %v5880_v33 = vld [vmem:[#allocation14 + $0x48] ss:$16 sps:$4 sm:$0xff]   ;;  %v5894_v50 = vld [vmem:[#allocation14 + $0x8c] ss:$16 sps:$4 sm:$0xff]  }
 0x56b   : > { %5418 = vmatprep.mubr.bf16.mxu1 %v2709_v35 }
 0x56c   : > { %5419 = vmatmul.mubr.bf16.gmra.mrb[116].mxu1 %v2710_v36 }
 0x56d   : > { %3690 = vmatpush1.bf16.msra.mxu1 %v5883_v51 }
 0x56e   : > { %3691 = vmatprep.subr.bf16.mxu1 %v5891_v52 }
 0x571   : > { %3692 = vmatpush1.bf16.msra.mxu1 %v5889_v54 }
 0x572   : > { %3693 = vmatprep.subr.bf16.mxu1 %v5897_v56 }
 0x575   : > { %3694 = vmatpush1.bf16.msra.mxu1 %v5895_v57 }
 0x576   : > { %3695 = vmatprep.subr.bf16.mxu1 %v5903_v58  ;;  %v5892_v58 = vld [vmem:[#allocation14 + $0x88] ss:$16 sps:$4 sm:$0xff]  }
 0x579   : > { %3696 = vmatpush1.bf16.msra.mxu1 %v5901_v60 }
 0x57a   : > { %3697 = vmatprep.subr.bf16.mxu1 %v5909_v61  ;;  %v5900_v61 = vld [vmem:[#allocation14 + $0xac] ss:$16 sps:$4 sm:$0xff]  }
 0x57d   : > { %3698 = vmatpush1.bf16.msra.mxu1 %v5907_v28  ;;  %v5898_v28 = vld [vmem:[#allocation14 + $0xa8] ss:$16 sps:$4 sm:$0xff]  }
 0x57e   : > { %3699 = vmatprep.subr.bf16.mxu1 %v5915_v62  ;;  %v5906_v62 = vld [vmem:[#allocation14 + $0xcc] ss:$16 sps:$4 sm:$0xff]  }
 0x581   : > { %3700 = vmatpush1.bf16.msra.mxu1 %v5913_v2 }
 0x582   : > { %3701 = vmatprep.subr.bf16.mxu1 %v5921_v3 }
 0x585   : > { %3702 = vmatpush1.bf16.msra.mxu1 %v5919_v4 }
 0x586   : > { %3703 = vmatprep.subr.bf16.mxu1 %v5927_v63  ;;  %v5904_v63 = vld [vmem:[#allocation14 + $0xc8] ss:$16 sps:$4 sm:$0xff]  }
 0x589   : > { %3704 = vmatpush1.bf16.msra.mxu1 %v5925_v6 }
 0x58a   : > { %3705 = vmatprep.subr.bf16.mxu1 %v5933_v5 }
 0x58d   : > { %3706 = vmatpush1.bf16.msra.mxu1 %v5931_v53  ;;  %v5912_v53 = vld [vmem:[#allocation14 + $0xec] ss:$16 sps:$4 sm:$0xff]  }
 0x58e   : > { %3707 = vmatprep.subr.bf16.mxu1 %v5939_v47 }
 0x591   : > { %3708 = vmatpush1.bf16.msra.mxu1 %v5937_v55 }
 0x601   : > { %v5404_v39 = vpop.f32.mrb[100].mxu1 }
 0x602   : > { %v2825_v32 = vadd.f32 %v5404_v39, %v7042_v7  ;;  %v2816_v40 = vpop.f32.mrb[101].mxu1 }
 0x603   : > { %v2817_v26 = vadd.f32 %v7042_v7, %v2816_v40  ;;  %v5405_v34 = vpop.f32.mrb[102].mxu1 }
 0x604   : > { %v2896_v22 = vmul.f32 0.1, %v2825_v32  ;;  %v2828_v30 = vadd.f32 %v5405_v34, %v7042_v7  ;;  %v2819_v59 = vpop.f32.mrb[103].mxu1 }
 0x605   : > { %v2894_v8 = vmul.f32 0.1, %v2817_v26  ;;  %v2820_v10 = vadd.f32 %v7042_v7, %v2819_v59  ;;  %v5918_v59 = vld [vmem:[#allocation14 + $0x10c] ss:$16 sps:$4 sm:$0xff]  }
 0x606   : > { %v2897_v11 = vmul.f32 0.1, %v2828_v30  ;;  %v2915_v18 = vmax.f32 %v2825_v32, %v2896_v22  ;;  %v5910_v22 = vld [vmem:[#allocation14 + $0xe8] ss:$16 sps:$4 sm:$0xff]  }
 0x607   : > { %v2895_v12 = vmul.f32 0.1, %v2820_v10  ;;  %v2913_v16 = vmax.f32 %v2817_v26, %v2894_v8 }
 0x608   : > { %v2916_v13 = vmax.f32 %v2828_v30, %v2897_v11 }
 0x609   : > { %v2914_v20 = vmax.f32 %v2820_v10, %v2895_v12 }
 0x60a   : > { %v2933_v19 = vpack.c.bf16 %v2916_v13, %v2915_v18  ;;  %v5916_v18 = vld [vmem:[#allocation14 + $0x108] ss:$16 sps:$4 sm:$0xff]  }
 0x60b   : > { %v2932_v23 = vpack.c.bf16 %v2914_v20, %v2913_v16  ;;  %v5924_v16 = vld [vmem:[#allocation14 + $0x12c] ss:$16 sps:$4 sm:$0xff]   ;;  %v5922_v20 = vld [vmem:[#allocation14 + $0x128] ss:$16 sps:$4 sm:$0xff]  }
 0x60d   : > { %3083 = vmatmul.mubr.bf16.vlgmr.msra.gmra.mrb[80].mxu0 %v2932_v23 }
 0x60e   : > { %3092 = vmatprep.mubr.bf16.mxu0 %v6346_v0  ;;  %3815 = vmatpush1.bf16.msra.mxu0 %v5868_v21 }
 0x60f   : > { %3816 = vmatprep.subr.bf16.mxu0 %v5876_v24 }
 0x611   : > { %v5408_v27 = vpop.f32.mrb[104].mxu1 }
 0x612   : > { %v2841_v29 = vadd.f32 %v5408_v27, %v7042_v7  ;;  %v2832_v31 = vpop.f32.mrb[105].mxu1  ;;  %3817 = vmatpush1.bf16.msra.mxu0 %v5874_v9  ;;  %v5928_v9 = vld [vmem:[#allocation14 + $0x148] ss:$16 sps:$4 sm:$0xff]  }
 0x613   : > { %v2833_v35 = vadd.f32 %v7042_v7, %v2832_v31  ;;  %v5409_v36 = vpop.f32.mrb[106].mxu1  ;;  %3818 = vmatprep.subr.bf16.mxu0 %v5882_v25 }
 0x614   : > { %v2900_v38 = vmul.f32 0.1, %v2841_v29  ;;  %v2844_v41 = vadd.f32 %v5409_v36, %v7042_v7  ;;  %v2835_v42 = vpop.f32.mrb[107].mxu1 }
 0x615   : > { %v2898_v43 = vmul.f32 0.1, %v2833_v35  ;;  %v2836_v45 = vadd.f32 %v7042_v7, %v2835_v42  ;;  %3093 = vmatmul.mubr.bf16.gmra.mrb[84].mxu0 %v2933_v19  ;;  %v5930_v19 = vld [vmem:[#allocation14 + $0x14c] ss:$16 sps:$4 sm:$0xff]  }
 0x616   : > { %v2901_v1 = vmul.f32 0.1, %v2844_v41  ;;  %3102 = vmatprep.mubr.bf16.mxu0 %v6346_v0  ;;  %3819 = vmatpush1.bf16.msra.mxu0 %v5880_v33  ;;  %v2919_v51 = vmax.f32 %v2841_v29, %v2900_v38  ;;  %v5936_v29 = vld [vmem:[#allocation14 + $0x16c] ss:$16 sps:$4 sm:$0xff]  }
 0x617   : > { %v2899_v48 = vmul.f32 0.1, %v2836_v45  ;;  %3820 = vmatprep.subr.bf16.mxu0 %v5888_v37  ;;  %v2917_v54 = vmax.f32 %v2833_v35, %v2898_v43  ;;  %v5942_v43 = vld [vmem:[#allocation14 + $0x18c] ss:$16 sps:$4 sm:$0xff]  }
 0x618   : > { %v2920_v52 = vmax.f32 %v2844_v41, %v2901_v1  ;;  %v5934_v41 = vld [vmem:[#allocation14 + $0x168] ss:$16 sps:$4 sm:$0xff]  }
 0x619   : > { %v2918_v56 = vmax.f32 %v2836_v45, %v2899_v48 }
 0x61a   : > { %v2935_v57 = vpack.c.bf16 %v2920_v52, %v2919_v51  ;;  %3821 = vmatpush1.bf16.msra.mxu0 %v5886_v46  ;;  %v5940_v51 = vld [vmem:[#allocation14 + $0x188] ss:$16 sps:$4 sm:$0xff]  }
 0x61b   : > { %v2934_v60 = vpack.c.bf16 %v2918_v56, %v2917_v54  ;;  %3822 = vmatprep.subr.bf16.mxu0 %v5894_v50 }
 0x61d   : > { %3103 = vmatmul.mubr.bf16.gmra.mrb[88].mxu0 %v2934_v60 }
 0x61e   : > { %3112 = vmatprep.mubr.bf16.mxu0 %v6346_v0  ;;  %3823 = vmatpush1.bf16.msra.mxu0 %v5892_v58 }
 0x61f   : > { %3824 = vmatprep.subr.bf16.mxu0 %v5900_v61 }
 0x621   : > { %v5412_v2 = vpop.f32.mrb[108].mxu1 }
 0x622   : > { %v2857_v3 = vadd.f32 %v5412_v2, %v7042_v7  ;;  %v2848_v4 = vpop.f32.mrb[109].mxu1  ;;  %3825 = vmatpush1.bf16.msra.mxu0 %v5898_v28 }
 0x623   : > { %v2849_v6 = vadd.f32 %v7042_v7, %v2848_v4  ;;  %v5413_v5 = vpop.f32.mrb[110].mxu1  ;;  %3826 = vmatprep.subr.bf16.mxu0 %v5906_v62 }
 0x624   : > { %v2904_v39 = vmul.f32 0.1, %v2857_v3  ;;  %v2860_v47 = vadd.f32 %v5413_v5, %v7042_v7  ;;  %v2851_v32 = vpop.f32.mrb[111].mxu1 }
 0x625   : > { %v2902_v40 = vmul.f32 0.1, %v2849_v6  ;;  %v2852_v26 = vadd.f32 %v7042_v7, %v2851_v32  ;;  %3113 = vmatmul.mubr.bf16.gmra.mrb[92].mxu0 %v2935_v57  ;;  %v5943_v32 = vld [vmem:[#allocation14 + $0x1a0] ss:$16 sps:$4 sm:$0xff]  }
 0x626   : > { %v2905_v34 = vmul.f32 0.1, %v2860_v47  ;;  %3122 = vmatprep.mubr.bf16.mxu0 %v6346_v0  ;;  %3827 = vmatpush1.bf16.msra.mxu0 %v5904_v63  ;;  %v2923_v55 = vmax.f32 %v2857_v3, %v2904_v39  ;;  %v5945_v39 = vld [vmem:[#allocation14 + $0x1a4] ss:$16 sps:$4 sm:$0xff]  }
 0x627   : > { %v2903_v30 = vmul.f32 0.1, %v2852_v26  ;;  %3828 = vmatprep.subr.bf16.mxu0 %v5912_v53  ;;  %v2921_v10 = vmax.f32 %v2849_v6, %v2902_v40  ;;  %v5946_v40 = vld [vmem:[#allocation14 + $0x1a8] ss:$16 sps:$4 sm:$0xff]   ;;  %3709 = vmatprep.subr.bf16.mxu1 %v5945_v39 }
 0x628   : > { %v2924_v8 = vmax.f32 %v2860_v47, %v2905_v34  ;;  %v5948_v47 = vld [vmem:[#allocation14 + $0x1ac] ss:$16 sps:$4 sm:$0xff]   ;;  %3710 = vmatpush1.bf16.msra.mxu1 %v5943_v32  ;;  %v5949_v34 = vld [vmem:[#allocation14 + $0x1c0] ss:$16 sps:$4 sm:$0xff]  }
 0x629   : > { %v2922_v11 = vmax.f32 %v2852_v26, %v2903_v30  ;;  %v5951_v26 = vld [vmem:[#allocation14 + $0x1c4] ss:$16 sps:$4 sm:$0xff]   ;;  %v5960_v30 = vld [vmem:[#allocation14 + $0x1ec] ss:$16 sps:$4 sm:$0xff]  }
 0x62a   : > { %v2937_v12 = vpack.c.bf16 %v2924_v8, %v2923_v55  ;;  %3829 = vmatpush1.bf16.msra.mxu0 %v5910_v22  ;;  %v5952_v22 = vld [vmem:[#allocation14 + $0x1c8] ss:$16 sps:$4 sm:$0xff]   ;;  %3711 = vmatprep.subr.bf16.mxu1 %v5951_v26  ;;  %v5961_v8 = vld [vmem:[#allocation16 + $0x40] sm:$0xff]  }
 0x62b   : > { %v2936_v13 = vpack.c.bf16 %v2922_v11, %v2921_v10  ;;  %3830 = vmatprep.subr.bf16.mxu0 %v5918_v59  ;;  %v5955_v59 = vld [vmem:[#allocation14 + $0x1e0] ss:$16 sps:$4 sm:$0xff]   ;;  %v5958_v55 = vld [vmem:[#allocation14 + $0x1e8] ss:$16 sps:$4 sm:$0xff]  }
 0x62c   : > { %3712 = vmatpush1.bf16.msra.mxu1 %v5949_v34  ;;  %v7072_v10 = vld [vmem:[#allocation16 + $0xc0] sm:$0xff]   ;;  %v2958_v11 = vld [vmem:[%s7450_s30] sm:$0x3]  ;;  %s6347_s30 = smov [#allocation17]  }
 0x62d   : > { %3123 = vmatmul.mubr.bf16.gmra.mrb[96].mxu0 %v2936_v13  ;;  %s6251_s8 = sshll.u32 %s6347_s30, 4  ;;  %s6252_s8 = int_to_ptr.vmem [resolvable:$false] %s6251_s8 }
 0x62e   : > { %3132 = vmatprep.mubr.bf16.mxu0 %v6346_v0  ;;  %3831 = vmatpush1.bf16.msra.mxu0 %v5916_v18  ;;  %v7082_v18 = vrot.slane %v2958_v11, %v6813_v17  ;;  %s6253_s16 = scalar_lea.vmem %s6252_s8, 4864  ;;  %p6254_p13 = scmp.lt.s32.totalorder %s7328_s19, %s6252_s8 }
 0x62f   : > { %3832 = vmatprep.subr.bf16.mxu0 %v5924_v16  ;;  %p6255_p8 = scmp.lt.s32.totalorder %s6253_s16, %s6247_s23 }
 0x631   : > { %v5416_v21 = vpop.f32.mrb[112].mxu1  ;;  %p6256_p7 = por %p6255_p8, %p6254_p13 }
 0x632   : > { %v2873_v23 = vadd.f32 %v5416_v21, %v7042_v7  ;;  %v2864_v24 = vpop.f32.mrb[113].mxu1  ;;  %3833 = vmatpush1.bf16.msra.mxu0 %v5922_v20 }
 0x633   : > { %v2865_v25 = vadd.f32 %v7042_v7, %v2864_v24  ;;  %v5417_v27 = vpop.f32.mrb[114].mxu1  ;;  %3834 = vmatprep.subr.bf16.mxu0 %v5930_v19  ;;  %p6257_p9 = pnand %p6256_p7, %p6250_p12 }
 0x634   : > { %v2908_v31 = vmul.f32 0.1, %v2873_v23  ;;  %v2876_v33 = vadd.f32 %v5417_v27, %v7042_v7  ;;  %v2867_v35 = vpop.f32.mrb[115].mxu1 }
 0x635   : > { %v2906_v36 = vmul.f32 0.1, %v2865_v25  ;;  %v2868_v37 = vadd.f32 %v7042_v7, %v2867_v35  ;;  %3133 = vmatmul.mubr.bf16.gmra.mrb[100].mxu0 %v2937_v12  ;;  %v7079_v12 = vrot.slane %v2958_v11, %v6807_v15  ;;  %v7109_v11 = vld [vmem:[#allocation16 + $0xd8] sm:$0xff]  }
 0x636   : > { %v2909_v38 = vmul.f32 0.1, %v2876_v33  ;;  %3142 = vmatprep.mubr.bf16.mxu0 %v6346_v0  ;;  %3835 = vmatpush1.bf16.msra.mxu0 %v5928_v9  ;;  %v2927_v45 = vmax.f32 %v2873_v23, %v2908_v31 }
 0x637   : > { %v2907_v42 = vmul.f32 0.1, %v2868_v37  ;;  %3836 = vmatprep.subr.bf16.mxu0 %v5936_v29  ;;  %v2925_v46 = vmax.f32 %v2865_v25, %v2906_v36 }
 0x638   : > { %v2928_v1 = vmax.f32 %v2876_v33, %v2909_v38 }
 0x639   : > { %v2926_v48 = vmax.f32 %v2868_v37, %v2907_v42 }
 0x63a   : > { %v2939_v50 = vpack.c.bf16 %v2928_v1, %v2927_v45  ;;  %3837 = vmatpush1.bf16.msra.mxu0 %v5934_v41 }
 0x63b   : > { %v2938_v52 = vpack.c.bf16 %v2926_v48, %v2925_v46  ;;  %3838 = vmatprep.subr.bf16.mxu0 %v5942_v43  ;;  %v5962_v48 = vld [vmem:[#allocation16] sm:$0xff]  }
 0x63d   : > { %3143 = vmatmul.mubr.bf16.gmra.mrb[104].mxu0 %v2938_v52 }
 0x63e   : > { %3152 = vmatprep.mubr.bf16.mxu0 %v6346_v0  ;;  %3839 = vmatpush1.bf16.msra.mxu0 %v5940_v51 }
 0x63f   : > { %v5420_v54 = vpop.f32.mrb[116].mxu1  ;;  %3840 = vmatprep.subr.bf16.mxu0 %v5948_v47 }
 0x640   : > { %v2880_v56 = vpop.f32.mrb[117].mxu1  ;;  %v2889_v2 = vadd.f32 %v5420_v54, %v7042_v7 }
 0x641   : > { %v2881_v57 = vadd.f32 %v7042_v7, %v2880_v56  ;;  %v5421_v58 = vpop.f32.mrb[118].mxu1  ;;  %v5963_v56 = vld [vmem:[#allocation16 + $0x48] sm:$0xff]  }
 0x642   : > { %v2883_v60 = vpop.f32.mrb[119].mxu1  ;;  %v2912_v6 = vmul.f32 0.1, %v2889_v2  ;;  %3841 = vmatpush1.bf16.msra.mxu0 %v5946_v40 }
 0x643   : > { %v2910_v61 = vmul.f32 0.1, %v2881_v57  ;;  %v2884_v28 = vadd.f32 %v7042_v7, %v2883_v60  ;;  %v5954_v7 = vld [vmem:[#allocation14 + $0x1cc] ss:$16 sps:$4 sm:$0xff]  }
 0x644   : > { %v2931_v5 = vmax.f32 %v2889_v2, %v2912_v6  ;;  %3842 = vmatprep.subr.bf16.mxu0 %v5954_v7  ;;  %v7097_v2 = vld [vmem:[#allocation16 + $0x88] sm:$0xff]   ;;  %v7100_v6 = vld [vmem:[#allocation16 + $0xd0] sm:$0xff]  }
 0x645   : > { %v2911_v62 = vmul.f32 0.1, %v2884_v28  ;;  %3153 = vmatmul.mubr.bf16.gmra.mrb[108].mxu0 %v2939_v50  ;;  %v2929_v3 = vmax.f32 %v2881_v57, %v2910_v61  ;;  %v7090_v50 = vld [vmem:[#allocation16 + $0x80] sm:$0xff]   ;;  %v7093_v57 = vld [vmem:[#allocation16 + $0xc8] sm:$0xff]  }
 0x646   : > { %3162 = vmatprep.mubr.bf16.mxu0 %v6346_v0  ;;  %v2941_v53 = vpack.c.bf16 %v2931_v5, %v2931_v5  ;;  %3843 = vmatpush1.bf16.msra.mxu0 %v5952_v22  ;;  %v5966_v22 = vld [vmem:[#allocation16 + $0x10] sm:$0xff]  }
 0x647   : > { %v2930_v4 = vmax.f32 %v2884_v28, %v2911_v62  ;;  %3844 = vmatprep.subr.bf16.mxu0 %v5960_v30  ;;  %v5964_v62 = vld [vmem:[#allocation16 + $0x8] sm:$0xff]  }
 0x649   : > { %v2940_v63 = vpack.c.bf16 %v2930_v4, %v2929_v3 }
 0x64a   : > { %3845 = vmatpush1.bf16.msra.mxu0 %v5958_v55 }
 0x64b   : > { %5274 = vmatprep.subr.bf16.mxu0 %v7072_v10 }
 0x64d   : > { %3163 = vmatmul.mubr.bf16.gmra.mrb[112].mxu0 %v2940_v63  ;;  %v5965_v63 = vld [vmem:[#allocation16 + $0x50] sm:$0xff]  }
 0x64e   : > { %3172 = vmatprep.mubr.bf16.mxu0 %v6346_v0  ;;  %v5957_v0 = vld [vmem:[#allocation14 + $0x1e4] ss:$16 sps:$4 sm:$0xff]  }
 0x64f   : > { %3713 = vmatprep.subr.bf16.mxu1 %v5957_v0  ;;  %v7105_v0 = vld [vmem:[#allocation16 + $0x90] sm:$0xff]  }
 0x650   : > { %3714 = vmatpush1.bf16.msra.mxu1 %v5955_v59 }
 0x651   : > { %5198 = vmatprep.subr.bf16.mxu1 %v5961_v8  ;;  %v5967_v8 = vld [vmem:[#allocation16 + $0x58] sm:$0xff]  }
 0x655   : > { %3173 = vmatmul.mubr.bf16.gmra.mrb[116].mxu0 %v2941_v53 }
 0x6e0   : > { %v3084_v13 = vpop.f32.mrb[80].mxu0 }
 0x6e1   : > { %v3085_v16 = vadd.f32 %v3084_v13, %v7079_v12  ;;  %v3086_v20 = vpop.f32.mrb[81].mxu0 }
 0x6e2   : > { %v3087_v19 = vadd.f32 %v3086_v20, %v7082_v18  ;;  %v3088_v21 = vpop.f32.mrb[82].mxu0 }
 0x6e3   : > { %v3181_v23 = vmul.f32 0.1, %v3085_v16  ;;  %v3089_v24 = vadd.f32 %v3088_v21, %v7079_v12  ;;  %v3090_v9 = vpop.f32.mrb[83].mxu0  ;;  %v5968_v21 = vld [vmem:[#allocation16 + $0x18] sm:$0xff]  }
 0x6e4   : > { %v3182_v25 = vmul.f32 0.1, %v3087_v19  ;;  %v3091_v27 = vadd.f32 %v3090_v9, %v7082_v18 }
 0x6e5   : > { %v3183_v29 = vmul.f32 0.1, %v3089_v24  ;;  %v3219_v33 = vmax.f32 %v3085_v16, %v3181_v23  ;;  %v7113_v23 = vld [vmem:[#allocation16 + $0x98] sm:$0xff]  }
 0x6e6   : > { %v3184_v31 = vmul.f32 0.1, %v3091_v27  ;;  %v3220_v36 = vmax.f32 %v3087_v19, %v3182_v25  ;;  %v5969_v25 = vld [vmem:[#allocation16 + $0x60] sm:$0xff]  }
 0x6e7   : > { %v3221_v35 = vmax.f32 %v3089_v24, %v3183_v29 }
 0x6e8   : > { %v3222_v37 = vmax.f32 %v3091_v27, %v3184_v31  ;;  %v3094_v38 = vpop.f32.mrb[84].mxu0  ;;  %v7116_v27 = vld [vmem:[#allocation16 + $0xe0] sm:$0xff]  }
 0x6e9   : > { %v3257_v41 = vpack.c.bf16 %v3221_v35, %v3219_v33  ;;  %v3095_v42 = vadd.f32 %v3094_v38, %v7079_v12  ;;  %v3096_v43 = vpop.f32.mrb[85].mxu0 }
 0x6ea   : > { %v3097_v45 = vadd.f32 %v3096_v43, %v7082_v18  ;;  %v3098_v1 = vpop.f32.mrb[86].mxu0  ;;  %v3258_v46 = vpack.c.bf16 %v3222_v37, %v3220_v36  ;;  %v5970_v43 = vld [vmem:[#allocation16 + $0x20] sm:$0xff]  }
 0x6eb   : > { %v3185_v51 = vmul.f32 0.1, %v3095_v42  ;;  %v3099_v52 = vadd.f32 %v3098_v1, %v7079_v12  ;;  %v3100_v54 = vpop.f32.mrb[87].mxu0 }
 0x6ec   : > { %v3186_v58 = vmul.f32 0.1, %v3097_v45  ;;  %v3101_v60 = vadd.f32 %v3100_v54, %v7082_v18  ;;  %3715 = vmatprep.mubr.bf16.mxu1 %v3258_v46  ;;  %3846 = vmatprep.mubr.bf16.mxu0 %v3258_v46 }
 0x6ed   : > { %v3187_v61 = vmul.f32 0.1, %v3099_v52  ;;  %3716 = vmatmul.mubr.bf16.vlgmr.msra.gmra.mrb[120].mxu1 %v3257_v41  ;;  %3847 = vmatmul.mubr.bf16.vlgmr.msra.gmra.mrb[120].mxu0 %v3257_v41  ;;  %v3223_v3 = vmax.f32 %v3095_v42, %v3185_v51  ;;  %v5973_v51 = vld [vmem:[#allocation16 + $0x68] sm:$0xff]  }
 0x6ee   : > { %v3188_v28 = vmul.f32 0.1, %v3101_v60  ;;  %5199 = vmatpush3.bf16.msra.mxu1 %v5962_v48  ;;  %5275 = vmatpush3.bf16.msra.mxu0 %v7090_v50  ;;  %v3224_v5 = vmax.f32 %v3097_v45, %v3186_v58  ;;  %v7121_v45 = vld [vmem:[#allocation16 + $0xa0] sm:$0xff]  }
 0x6ef   : > { %v3225_v4 = vmax.f32 %v3099_v52, %v3187_v61  ;;  %5200 = vmatprep.subr.bf16.mxu1 %v5963_v56  ;;  %5276 = vmatprep.subr.bf16.mxu0 %v7093_v57 }
 0x6f0   : > { %v3226_v53 = vmax.f32 %v3101_v60, %v3188_v28  ;;  %v3104_v39 = vpop.f32.mrb[88].mxu0  ;;  %v5974_v60 = vld [vmem:[#allocation16 + $0x28] sm:$0xff]  }
 0x6f1   : > { %v3105_v47 = vadd.f32 %v3104_v39, %v7079_v12  ;;  %v3106_v32 = vpop.f32.mrb[89].mxu0  ;;  %v3259_v40 = vpack.c.bf16 %v3225_v4, %v3223_v3 }
 0x6f2   : > { %v3107_v26 = vadd.f32 %v3106_v32, %v7082_v18  ;;  %v3108_v7 = vpop.f32.mrb[90].mxu0  ;;  %v3260_v34 = vpack.c.bf16 %v3226_v53, %v3224_v5  ;;  %5201 = vmatpush3.bf16.msra.mxu1 %v5964_v62  ;;  %5277 = vmatpush3.bf16.msra.mxu0 %v7097_v2  ;;  %v5979_v62 = vld [vmem:[#allocation16 + $0x70] sm:$0xff]  }
 0x6f3   : > { %v3189_v30 = vmul.f32 0.1, %v3105_v47  ;;  %v3109_v59 = vadd.f32 %v3108_v7, %v7079_v12  ;;  %v3110_v55 = vpop.f32.mrb[91].mxu0  ;;  %5202 = vmatprep.subr.bf16.mxu1 %v5965_v63  ;;  %5278 = vmatprep.subr.bf16.mxu0 %v7100_v6 }
 0x6f4   : > { %v3190_v13 = vmul.f32 0.1, %v3107_v26  ;;  %v3111_v16 = vadd.f32 %v3110_v55, %v7082_v18  ;;  %3725 = vmatprep.mubr.bf16.mxu1 %v3260_v34  ;;  %3856 = vmatprep.mubr.bf16.mxu0 %v3260_v34 }
 0x6f5   : > { %v3191_v20 = vmul.f32 0.1, %v3109_v59  ;;  %3726 = vmatmul.mubr.bf16.gmra.mrb[124].mxu1 %v3259_v40  ;;  %3857 = vmatmul.mubr.bf16.gmra.mrb[124].mxu0 %v3259_v40  ;;  %v3227_v24 = vmax.f32 %v3105_v47, %v3189_v30 }
 0x6f6   : > { %v3192_v19 = vmul.f32 0.1, %v3111_v16  ;;  %5203 = vmatpush3.bf16.msra.mxu1 %v5966_v22  ;;  %5279 = vmatpush3.bf16.msra.mxu0 %v7105_v0  ;;  %v3228_v29 = vmax.f32 %v3107_v26, %v3190_v13  ;;  %v5980_v26 = vld [vmem:[#allocation16 + $0x30] sm:$0xff]  }
 0x6f7   : > { %v3229_v9 = vmax.f32 %v3109_v59, %v3191_v20  ;;  %5204 = vmatprep.subr.bf16.mxu1 %v5967_v8  ;;  %5280 = vmatprep.subr.bf16.mxu0 %v7109_v11 }
 0x6f8   : > { %v3230_v31 = vmax.f32 %v3111_v16, %v3192_v19  ;;  %v3114_v33 = vpop.f32.mrb[92].mxu0 }
 0x6f9   : > { %v3115_v35 = vadd.f32 %v3114_v33, %v7079_v12  ;;  %v3116_v36 = vpop.f32.mrb[93].mxu0  ;;  %v3261_v37 = vpack.c.bf16 %v3229_v9, %v3227_v24 }
 0x6fa   : > { %v3117_v38 = vadd.f32 %v3116_v36, %v7082_v18  ;;  %v3118_v41 = vpop.f32.mrb[94].mxu0  ;;  %v3262_v42 = vpack.c.bf16 %v3230_v31, %v3228_v29  ;;  %5205 = vmatpush3.bf16.msra.mxu1 %v5968_v21  ;;  %5281 = vmatpush3.bf16.msra.mxu0 %v7113_v23 }
 0x6fb   : > { %v3193_v1 = vmul.f32 0.1, %v3115_v35  ;;  %v3119_v46 = vadd.f32 %v3118_v41, %v7079_v12  ;;  %v3120_v48 = vpop.f32.mrb[95].mxu0  ;;  %5206 = vmatprep.subr.bf16.mxu1 %v5969_v25  ;;  %5282 = vmatprep.subr.bf16.mxu0 %v7116_v27 }
 0x6fc   : > { %v3194_v52 = vmul.f32 0.1, %v3117_v38  ;;  %v3121_v54 = vadd.f32 %v3120_v48, %v7082_v18  ;;  %3735 = vmatprep.mubr.bf16.mxu1 %v3262_v42  ;;  %3866 = vmatprep.mubr.bf16.mxu0 %v3262_v42 }
 0x6fd   : > { %v3195_v56 = vmul.f32 0.1, %v3119_v46  ;;  %3736 = vmatmul.mubr.bf16.gmra.mrb[128].mxu1 %v3261_v37  ;;  %3867 = vmatmul.mubr.bf16.gmra.mrb[128].mxu0 %v3261_v37  ;;  %v3231_v61 = vmax.f32 %v3115_v35, %v3193_v1 }
 0x6fe   : > { %v3196_v58 = vmul.f32 0.1, %v3121_v54  ;;  %5207 = vmatpush3.bf16.msra.mxu1 %v5970_v43  ;;  %5283 = vmatpush3.bf16.msra.mxu0 %v7121_v45  ;;  %v3232_v3 = vmax.f32 %v3117_v38, %v3194_v52 }
 0x6ff   : > { %v3233_v28 = vmax.f32 %v3119_v46, %v3195_v56  ;;  %5208 = vmatprep.subr.bf16.mxu1 %v5973_v51 }
 0x700   : > { %v3234_v4 = vmax.f32 %v3121_v54, %v3196_v58  ;;  %v3124_v63 = vpop.f32.mrb[96].mxu0 }
 0x701   : > { %v3125_v5 = vadd.f32 %v3124_v63, %v7079_v12  ;;  %v3126_v53 = vpop.f32.mrb[97].mxu0  ;;  %v3263_v39 = vpack.c.bf16 %v3233_v28, %v3231_v61 }
 0x702   : > { %v3127_v47 = vadd.f32 %v3126_v53, %v7082_v18  ;;  %v3128_v32 = vpop.f32.mrb[98].mxu0  ;;  %v3264_v40 = vpack.c.bf16 %v3234_v4, %v3232_v3  ;;  %5209 = vmatpush3.bf16.msra.mxu1 %v5974_v60 }
 0x703   : > { %v3197_v7 = vmul.f32 0.1, %v3125_v5  ;;  %v3129_v34 = vadd.f32 %v3128_v32, %v7079_v12  ;;  %v3130_v22 = vpop.f32.mrb[99].mxu0  ;;  %5210 = vmatprep.subr.bf16.mxu1 %v5979_v62 }
 0x704   : > { %v3198_v30 = vmul.f32 0.1, %v3127_v47  ;;  %v3131_v59 = vadd.f32 %v3130_v22, %v7082_v18  ;;  %3745 = vmatprep.mubr.bf16.mxu1 %v3264_v40  ;;  %3876 = vmatprep.mubr.bf16.mxu0 %v3264_v40 }
 0x705   : > { %v3199_v55 = vmul.f32 0.1, %v3129_v34  ;;  %3746 = vmatmul.mubr.bf16.gmra.mrb[132].mxu1 %v3263_v39  ;;  %3877 = vmatmul.mubr.bf16.gmra.mrb[132].mxu0 %v3263_v39  ;;  %v3235_v13 = vmax.f32 %v3125_v5, %v3197_v7 }
 0x706   : > { %v3200_v8 = vmul.f32 0.1, %v3131_v59  ;;  %5211 = vmatpush3.bf16.msra.mxu1 %v5980_v26  ;;  %v3236_v20 = vmax.f32 %v3127_v47, %v3198_v30 }
 0x707   : > { %v3237_v16 = vmax.f32 %v3129_v34, %v3199_v55 }
 0x708   : > { %v3238_v19 = vmax.f32 %v3131_v59, %v3200_v8  ;;  %v3134_v21 = vpop.f32.mrb[100].mxu0 }
 0x709   : > { %v3135_v24 = vadd.f32 %v3134_v21, %v7079_v12  ;;  %v3136_v9 = vpop.f32.mrb[101].mxu0  ;;  %v3265_v25 = vpack.c.bf16 %v3237_v16, %v3235_v13 }
 0x70a   : > { %v3137_v29 = vadd.f32 %v3136_v9, %v7082_v18  ;;  %v3138_v31 = vpop.f32.mrb[102].mxu0  ;;  %v3266_v33 = vpack.c.bf16 %v3238_v19, %v3236_v20 }
 0x70b   : > { %v3201_v35 = vmul.f32 0.1, %v3135_v24  ;;  %v3139_v36 = vadd.f32 %v3138_v31, %v7079_v12  ;;  %v3140_v37 = vpop.f32.mrb[103].mxu0 }
 0x70c   : > { %v3202_v38 = vmul.f32 0.1, %v3137_v29  ;;  %v3141_v41 = vadd.f32 %v3140_v37, %v7082_v18  ;;  %3755 = vmatprep.mubr.bf16.mxu1 %v3266_v33  ;;  %3886 = vmatprep.mubr.bf16.mxu0 %v3266_v33 }
 0x70d   : > { %v3203_v42 = vmul.f32 0.1, %v3139_v36  ;;  %3756 = vmatmul.mubr.bf16.gmra.mrb[136].mxu1 %v3265_v25  ;;  %3887 = vmatmul.mubr.bf16.gmra.mrb[136].mxu0 %v3265_v25  ;;  %v3239_v1 = vmax.f32 %v3135_v24, %v3201_v35 }
 0x70e   : > { %v3204_v43 = vmul.f32 0.1, %v3141_v41  ;;  %v3240_v48 = vmax.f32 %v3137_v29, %v3202_v38 }
 0x70f   : > { %v3241_v46 = vmax.f32 %v3139_v36, %v3203_v42 }
 0x710   : > { %v3242_v51 = vmax.f32 %v3141_v41, %v3204_v43  ;;  %v3144_v52 = vpop.f32.mrb[104].mxu0 }
 0x711   : > { %v3145_v54 = vadd.f32 %v3144_v52, %v7079_v12  ;;  %v3146_v56 = vpop.f32.mrb[105].mxu0  ;;  %v3267_v58 = vpack.c.bf16 %v3241_v46, %v3239_v1 }
 0x712   : > { %v3147_v60 = vadd.f32 %v3146_v56, %v7082_v18  ;;  %v3148_v61 = vpop.f32.mrb[106].mxu0  ;;  %v3268_v28 = vpack.c.bf16 %v3242_v51, %v3240_v48 }
 0x713   : > { %v3205_v62 = vmul.f32 0.1, %v3145_v54  ;;  %v3149_v3 = vadd.f32 %v3148_v61, %v7079_v12  ;;  %v3150_v4 = vpop.f32.mrb[107].mxu0 }
 0x714   : > { %v3206_v63 = vmul.f32 0.1, %v3147_v60  ;;  %v3151_v5 = vadd.f32 %v3150_v4, %v7082_v18  ;;  %3765 = vmatprep.mubr.bf16.mxu1 %v3268_v28  ;;  %3896 = vmatprep.mubr.bf16.mxu0 %v3268_v28 }
 0x715   : > { %v3207_v53 = vmul.f32 0.1, %v3149_v3  ;;  %3766 = vmatmul.mubr.bf16.gmra.mrb[140].mxu1 %v3267_v58  ;;  %3897 = vmatmul.mubr.bf16.gmra.mrb[140].mxu0 %v3267_v58  ;;  %v3243_v47 = vmax.f32 %v3145_v54, %v3205_v62 }
 0x716   : > { %v3208_v39 = vmul.f32 0.1, %v3151_v5  ;;  %v3244_v40 = vmax.f32 %v3147_v60, %v3206_v63 }
 0x717   : > { %v3245_v32 = vmax.f32 %v3149_v3, %v3207_v53 }
 0x718   : > { %v3246_v26 = vmax.f32 %v3151_v5, %v3208_v39  ;;  %v3154_v7 = vpop.f32.mrb[108].mxu0 }
 0x719   : > { %v3155_v34 = vadd.f32 %v3154_v7, %v7079_v12  ;;  %v3156_v22 = vpop.f32.mrb[109].mxu0  ;;  %v3269_v30 = vpack.c.bf16 %v3245_v32, %v3243_v47 }
 0x71a   : > { %v3157_v59 = vadd.f32 %v3156_v22, %v7082_v18  ;;  %v3158_v55 = vpop.f32.mrb[110].mxu0  ;;  %v3270_v8 = vpack.c.bf16 %v3246_v26, %v3244_v40 }
 0x71b   : > { %v3209_v13 = vmul.f32 0.1, %v3155_v34  ;;  %v3159_v16 = vadd.f32 %v3158_v55, %v7079_v12  ;;  %v3160_v20 = vpop.f32.mrb[111].mxu0  ;;  %v5986_v55 = vld [vmem:[#allocation16 + $0x78] sm:$0xff]  }
 0x71c   : > { %v3210_v19 = vmul.f32 0.1, %v3157_v59  ;;  %v3161_v21 = vadd.f32 %v3160_v20, %v7082_v18  ;;  %3775 = vmatprep.mubr.bf16.mxu1 %v3270_v8  ;;  %3906 = vmatprep.mubr.bf16.mxu0 %v3270_v8  ;;  %v7161_v8 = vld [vmem:[#allocation16 + $0xf8] sm:$0xff]   ;;  %v3341_v20 = vld [vmem:[%s7451_s22] sm:$0xf] }
 0x71d   : > { %v3211_v24 = vmul.f32 0.1, %v3159_v16  ;;  %3776 = vmatmul.mubr.bf16.gmra.mrb[144].mxu1 %v3269_v30  ;;  %3907 = vmatmul.mubr.bf16.gmra.mrb[144].mxu0 %v3269_v30  ;;  %v3247_v25 = vmax.f32 %v3155_v34, %v3209_v13  ;;  %v7155_v30 = vld [vmem:[#allocation16 + $0xf0] sm:$0xff]   ;;  %v5988_v13 = vld [vmem:[#allocation16 + $0x38] sm:$0xff]  }
 0x71e   : > { %v3212_v9 = vmul.f32 0.1, %v3161_v21  ;;  %v3248_v31 = vmax.f32 %v3157_v59, %v3210_v19  ;;  %v7157_v59 = vld [vmem:[#allocation16 + $0xb0] sm:$0xff]   ;;  %5212 = vmatprep.subr.bf16.mxu1 %v5986_v55  ;;  %v7172_v19 = vrot.slane %v3341_v20, %v6807_v15 }
 0x71f   : > { %v3249_v29 = vmax.f32 %v3159_v16, %v3211_v24  ;;  %v7163_v16 = vld [vmem:[#allocation16 + $0xb8] sm:$0xff]   ;;  %5213 = vmatpush3.bf16.msra.mxu1 %v5988_v13  ;;  %v7179_v24 = vrot.slane %v3341_v20, %v6813_v17 }
 0x720   : > { %v3250_v33 = vmax.f32 %v3161_v21, %v3212_v9  ;;  %v3164_v35 = vpop.f32.mrb[112].mxu0  ;;  %5422 = vmatprep.subr.bf16.mxu1 %v7072_v10  ;;  %v7176_v21 = vrot.slane %v3341_v20, %v749_v44  ;;  %v7183_v9 = vrot.slane %v3341_v20, %v753_v49 }
 0x721   : > { %v3165_v36 = vadd.f32 %v3164_v35, %v7079_v12  ;;  %v3166_v37 = vpop.f32.mrb[113].mxu0  ;;  %v3271_v38 = vpack.c.bf16 %v3249_v29, %v3247_v25 }
 0x722   : > { %v3167_v41 = vadd.f32 %v3166_v37, %v7082_v18  ;;  %v3168_v42 = vpop.f32.mrb[114].mxu0  ;;  %v3272_v43 = vpack.c.bf16 %v3250_v33, %v3248_v31 }
 0x723   : > { %v3213_v1 = vmul.f32 0.1, %v3165_v36  ;;  %v3169_v46 = vadd.f32 %v3168_v42, %v7079_v12  ;;  %v3170_v48 = vpop.f32.mrb[115].mxu0 }
 0x724   : > { %v3214_v51 = vmul.f32 0.1, %v3167_v41  ;;  %v3171_v52 = vadd.f32 %v3170_v48, %v7082_v18  ;;  %3785 = vmatprep.mubr.bf16.mxu1 %v3272_v43  ;;  %3916 = vmatprep.mubr.bf16.mxu0 %v3272_v43 }
 0x725   : > { %v3215_v54 = vmul.f32 0.1, %v3169_v46  ;;  %3786 = vmatmul.mubr.bf16.gmra.mrb[148].mxu1 %v3271_v38  ;;  %3917 = vmatmul.mubr.bf16.gmra.mrb[148].mxu0 %v3271_v38  ;;  %v3251_v58 = vmax.f32 %v3165_v36, %v3213_v1 }
 0x726   : > { %v3216_v56 = vmul.f32 0.1, %v3171_v52  ;;  %v3252_v61 = vmax.f32 %v3167_v41, %v3214_v51 }
 0x727   : > { %v3253_v60 = vmax.f32 %v3169_v46, %v3215_v54 }
 0x728   : > { %v3254_v28 = vmax.f32 %v3171_v52, %v3216_v56  ;;  %v3174_v62 = vpop.f32.mrb[116].mxu0 }
 0x729   : > { %v3175_v3 = vadd.f32 %v3174_v62, %v7079_v12  ;;  %v3176_v4 = vpop.f32.mrb[117].mxu0  ;;  %v3273_v63 = vpack.c.bf16 %v3253_v60, %v3251_v58  ;;  %v7149_v12 = vld [vmem:[#allocation16 + $0xe8] sm:$0xff]  }
 0x72a   : > { %v3177_v5 = vadd.f32 %v3176_v4, %v7082_v18  ;;  %v3178_v53 = vpop.f32.mrb[118].mxu0  ;;  %v3274_v39 = vpack.c.bf16 %v3254_v28, %v3252_v61  ;;  %v7151_v18 = vld [vmem:[#allocation16 + $0xa8] sm:$0xff]   ;;  %5284 = vmatprep.subr.bf16.mxu0 %v7149_v12 }
 0x72b   : > { %v3217_v47 = vmul.f32 0.1, %v3175_v3  ;;  %v3179_v32 = vpop.f32.mrb[119].mxu0  ;;  %5285 = vmatpush3.bf16.msra.mxu0 %v7151_v18 }
 0x72c   : > { %v3218_v40 = vmul.f32 0.1, %v3177_v5  ;;  %3795 = vmatprep.mubr.bf16.mxu1 %v3274_v39  ;;  %3926 = vmatprep.mubr.bf16.mxu0 %v3274_v39 }
 0x72d   : > { %3796 = vmatmul.mubr.bf16.gmra.mrb[152].mxu1 %v3273_v63  ;;  %3927 = vmatmul.mubr.bf16.gmra.mrb[152].mxu0 %v3273_v63  ;;  %v3255_v7 = vmax.f32 %v3175_v3, %v3217_v47 }
 0x72e   : > { %v3256_v26 = vmax.f32 %v3177_v5, %v3218_v40  ;;  %5286 = vmatprep.subr.bf16.mxu0 %v7155_v30 }
 0x72f   : > { %v3275_v22 = vpack.c.bf16 %v3255_v7, %v3255_v7  ;;  %5287 = vmatpush3.bf16.msra.mxu0 %v7157_v59 }
 0x730   : > { %v3276_v34 = vpack.c.bf16 %v3256_v26, %v3256_v26  ;;  %5288 = vmatprep.subr.bf16.mxu0 %v7161_v8 }
 0x732   : > { %3805 = vmatprep.mubr.bf16.mxu1 %v3276_v34  ;;  %3936 = vmatprep.mubr.bf16.mxu0 %v3276_v34 }
 0x733   : > { %5289 = vmatpush3.bf16.msra.mxu0 %v7163_v16 }
 0x735   : > { %3806 = vmatmul.mubr.bf16.gmra.mrb[156].mxu1 %v3275_v22  ;;  %3937 = vmatmul.mubr.bf16.gmra.mrb[156].mxu0 %v3275_v22 }
 0x7c0   : > { %v3717_v25 = vpop.f32.mrb[120].mxu1  ;;  %v3848_v10 = vpop.f32.mrb[120].mxu0 }
 0x7c1   : > { %v3718_v29 = vadd.f32 %v3717_v25, %v7172_v19  ;;  %v3849_v31 = vadd.f32 %v3848_v10, %v7176_v21  ;;  %v3719_v33 = vpop.f32.mrb[121].mxu1  ;;  %v3850_v15 = vpop.f32.mrb[121].mxu0 }
 0x7c2   : > { %v3720_v35 = vadd.f32 %v3719_v33, %v7179_v24  ;;  %v3851_v44 = vadd.f32 %v3850_v15, %v7183_v9  ;;  %v3721_v36 = vpop.f32.mrb[122].mxu1  ;;  %v3852_v37 = vpop.f32.mrb[122].mxu0 }
 0x7c3   : > { %v3945_v17 = vmul.f32 0.1, %v3718_v29  ;;  %v3947_v38 = vmul.f32 0.1, %v3849_v31  ;;  %v3722_v14 = vadd.f32 %v3721_v36, %v7172_v19  ;;  %v3853_v49 = vadd.f32 %v3852_v37, %v7176_v21  ;;  %v3723_v41 = vpop.f32.mrb[123].mxu1  ;;  %v3854_v42 = vpop.f32.mrb[123].mxu0 }
 0x7c4   : > { %v3946_v43 = vmul.f32 0.1, %v3720_v35  ;;  %v3948_v1 = vmul.f32 0.1, %v3851_v44  ;;  %v3724_v46 = vadd.f32 %v3723_v41, %v7179_v24  ;;  %v3855_v48 = vadd.f32 %v3854_v42, %v7183_v9 }
 0x7c5   : > { %v3949_v51 = vmul.f32 0.1, %v3722_v14  ;;  %v3951_v52 = vmul.f32 0.1, %v3853_v49  ;;  %v4021_v58 = vmax.f32 %v3718_v29, %v3945_v17  ;;  %v4023_v60 = vmax.f32 %v3849_v31, %v3947_v38 }
 0x7c6   : > { %v3950_v54 = vmul.f32 0.1, %v3724_v46  ;;  %v3952_v56 = vmul.f32 0.1, %v3855_v48  ;;  %v4022_v62 = vmax.f32 %v3720_v35, %v3946_v43  ;;  %v4024_v3 = vmax.f32 %v3851_v44, %v3948_v1 }
 0x7c7   : > { %v4025_v61 = vmax.f32 %v3722_v14, %v3949_v51  ;;  %v4027_v28 = vmax.f32 %v3853_v49, %v3951_v52 }
 0x7c8   : > { %v4026_v4 = vmax.f32 %v3724_v46, %v3950_v54  ;;  %v4028_v63 = vmax.f32 %v3855_v48, %v3952_v56  ;;  %v3727_v5 = vpop.f32.mrb[124].mxu1  ;;  %v3858_v53 = vpop.f32.mrb[124].mxu0 }
 0x7c9   : > { %v4097_v39 = vpack.c.bf16 %v4025_v61, %v4021_v58  ;;  %v4099_v47 = vpack.c.bf16 %v4027_v28, %v4023_v60  ;;  %v3728_v32 = vadd.f32 %v3727_v5, %v7172_v19  ;;  %v3859_v40 = vadd.f32 %v3858_v53, %v7176_v21  ;;  %v3729_v26 = vpop.f32.mrb[125].mxu1  ;;  %v3860_v7 = vpop.f32.mrb[125].mxu0 }
 0x7ca   : > { %v3730_v34 = vadd.f32 %v3729_v26, %v7179_v24  ;;  %v3861_v22 = vadd.f32 %v3860_v7, %v7183_v9  ;;  %v3731_v55 = vpop.f32.mrb[126].mxu1  ;;  %v3862_v13 = vpop.f32.mrb[126].mxu0  ;;  %v4098_v20 = vpack.c.bf16 %v4026_v4, %v4022_v62  ;;  %v4100_v25 = vpack.c.bf16 %v4028_v63, %v4024_v3 }
 0x7cb   : > { %v3953_v10 = vmul.f32 0.1, %v3728_v32  ;;  %v3955_v29 = vmul.f32 0.1, %v3859_v40  ;;  %v3732_v31 = vadd.f32 %v3731_v55, %v7172_v19  ;;  %v3863_v33 = vadd.f32 %v3862_v13, %v7176_v21  ;;  %v3733_v15 = vpop.f32.mrb[127].mxu1  ;;  %v3864_v35 = vpop.f32.mrb[127].mxu0 }
 0x7cc   : > { %v3954_v44 = vmul.f32 0.1, %v3730_v34  ;;  %v3956_v36 = vmul.f32 0.1, %v3861_v22  ;;  %v3734_v37 = vadd.f32 %v3733_v15, %v7179_v24  ;;  %v3865_v17 = vadd.f32 %v3864_v35, %v7183_v9  ;;  %4432 = vmatprep.mubr.bf16.mxu1 %v4098_v20  ;;  %4544 = vmatprep.mubr.bf16.mxu0 %v4100_v25 }
 0x7cd   : > { %v3957_v38 = vmul.f32 0.1, %v3732_v31  ;;  %v3959_v14 = vmul.f32 0.1, %v3863_v33  ;;  %4433 = vmatmul.mubr.bf16.vlgmr.msra.gmra.mrb[160].mxu1 %v4097_v39  ;;  %4545 = vmatmul.mubr.bf16.vlgmr.msra.gmra.mrb[160].mxu0 %v4099_v47  ;;  %v4029_v42 = vmax.f32 %v3728_v32, %v3953_v10  ;;  %v4031_v43 = vmax.f32 %v3859_v40, %v3955_v29 }
 0x7ce   : > { %v3958_v49 = vmul.f32 0.1, %v3734_v37  ;;  %v3960_v41 = vmul.f32 0.1, %v3865_v17  ;;  %5430 = vmatpush3.bf16.msra.mxu1 %v7090_v50  ;;  %v4030_v48 = vmax.f32 %v3730_v34, %v3954_v44  ;;  %v4032_v51 = vmax.f32 %v3861_v22, %v3956_v36 }
 0x7cf   : > { %v4033_v1 = vmax.f32 %v3732_v31, %v3957_v38  ;;  %v4035_v46 = vmax.f32 %v3863_v33, %v3959_v14  ;;  %5423 = vmatprep.subr.bf16.mxu1 %v7093_v57 }
 0x7d0   : > { %v4034_v52 = vmax.f32 %v3734_v37, %v3958_v49  ;;  %v4036_v54 = vmax.f32 %v3865_v17, %v3960_v41  ;;  %v3737_v56 = vpop.f32.mrb[128].mxu1  ;;  %v3868_v58 = vpop.f32.mrb[128].mxu0 }
 0x7d1   : > { %v3738_v60 = vadd.f32 %v3737_v56, %v7172_v19  ;;  %v3869_v61 = vadd.f32 %v3868_v58, %v7176_v21  ;;  %v3739_v28 = vpop.f32.mrb[129].mxu1  ;;  %v3870_v62 = vpop.f32.mrb[129].mxu0  ;;  %v4101_v3 = vpack.c.bf16 %v4033_v1, %v4029_v42  ;;  %v4103_v50 = vpack.c.bf16 %v4035_v46, %v4031_v43 }
 0x7d2   : > { %v3740_v4 = vadd.f32 %v3739_v28, %v7179_v24  ;;  %v3871_v63 = vadd.f32 %v3870_v62, %v7183_v9  ;;  %v3741_v5 = vpop.f32.mrb[130].mxu1  ;;  %v3872_v57 = vpop.f32.mrb[130].mxu0  ;;  %v4102_v53 = vpack.c.bf16 %v4034_v52, %v4030_v48  ;;  %v4104_v39 = vpack.c.bf16 %v4036_v54, %v4032_v51  ;;  %5431 = vmatpush3.bf16.msra.mxu1 %v7097_v2 }
 0x7d3   : > { %v3961_v47 = vmul.f32 0.1, %v3738_v60  ;;  %v3963_v32 = vmul.f32 0.1, %v3869_v61  ;;  %v3742_v40 = vadd.f32 %v3741_v5, %v7172_v19  ;;  %v3873_v26 = vadd.f32 %v3872_v57, %v7176_v21  ;;  %v3743_v7 = vpop.f32.mrb[131].mxu1  ;;  %v3874_v34 = vpop.f32.mrb[131].mxu0  ;;  %5424 = vmatprep.subr.bf16.mxu1 %v7100_v6 }
 0x7d4   : > { %v3962_v22 = vmul.f32 0.1, %v3740_v4  ;;  %v3964_v55 = vmul.f32 0.1, %v3871_v63  ;;  %v3744_v13 = vadd.f32 %v3743_v7, %v7179_v24  ;;  %v3875_v20 = vadd.f32 %v3874_v34, %v7183_v9  ;;  %4440 = vmatprep.mubr.bf16.mxu1 %v4102_v53  ;;  %4552 = vmatprep.mubr.bf16.mxu0 %v4104_v39 }
 0x7d5   : > { %v3965_v25 = vmul.f32 0.1, %v3742_v40  ;;  %v3967_v2 = vmul.f32 0.1, %v3873_v26  ;;  %4441 = vmatmul.mubr.bf16.gmra.mrb[164].mxu1 %v4101_v3  ;;  %4553 = vmatmul.mubr.bf16.gmra.mrb[164].mxu0 %v4103_v50  ;;  %v4037_v31 = vmax.f32 %v3738_v60, %v3961_v47  ;;  %v4039_v33 = vmax.f32 %v3869_v61, %v3963_v32 }
 0x7d6   : > { %v3966_v10 = vmul.f32 0.1, %v3744_v13  ;;  %v3968_v29 = vmul.f32 0.1, %v3875_v20  ;;  %5432 = vmatpush3.bf16.msra.mxu1 %v7105_v0  ;;  %v4038_v35 = vmax.f32 %v3740_v4, %v3962_v22  ;;  %v4040_v44 = vmax.f32 %v3871_v63, %v3964_v55 }
 0x7d7   : > { %v4041_v15 = vmax.f32 %v3742_v40, %v3965_v25  ;;  %v4043_v6 = vmax.f32 %v3873_v26, %v3967_v2  ;;  %5425 = vmatprep.subr.bf16.mxu1 %v7109_v11 }
 0x7d8   : > { %v4042_v36 = vmax.f32 %v3744_v13, %v3966_v10  ;;  %v4044_v37 = vmax.f32 %v3875_v20, %v3968_v29  ;;  %v3747_v17 = vpop.f32.mrb[132].mxu1  ;;  %v3878_v38 = vpop.f32.mrb[132].mxu0 }
 0x7d9   : > { %v3748_v14 = vadd.f32 %v3747_v17, %v7172_v19  ;;  %v3879_v49 = vadd.f32 %v3878_v38, %v7176_v21  ;;  %v3749_v41 = vpop.f32.mrb[133].mxu1  ;;  %v3880_v42 = vpop.f32.mrb[133].mxu0  ;;  %v4105_v43 = vpack.c.bf16 %v4041_v15, %v4037_v31  ;;  %v4107_v0 = vpack.c.bf16 %v4043_v6, %v4039_v33 }
 0x7da   : > { %v3750_v1 = vadd.f32 %v3749_v41, %v7179_v24  ;;  %v3881_v46 = vadd.f32 %v3880_v42, %v7183_v9  ;;  %v3751_v48 = vpop.f32.mrb[134].mxu1  ;;  %v3882_v11 = vpop.f32.mrb[134].mxu0  ;;  %v4106_v51 = vpack.c.bf16 %v4042_v36, %v4038_v35  ;;  %v4108_v52 = vpack.c.bf16 %v4044_v37, %v4040_v44  ;;  %5433 = vmatpush3.bf16.msra.mxu1 %v7113_v23 }
 0x7db   : > { %v3969_v54 = vmul.f32 0.1, %v3748_v14  ;;  %v3971_v56 = vmul.f32 0.1, %v3879_v49  ;;  %v3752_v58 = vadd.f32 %v3751_v48, %v7172_v19  ;;  %v3883_v60 = vadd.f32 %v3882_v11, %v7176_v21  ;;  %v3753_v61 = vpop.f32.mrb[135].mxu1  ;;  %v3884_v28 = vpop.f32.mrb[135].mxu0  ;;  %5426 = vmatprep.subr.bf16.mxu1 %v7116_v27 }
 0x7dc   : > { %v3970_v62 = vmul.f32 0.1, %v3750_v1  ;;  %v3972_v3 = vmul.f32 0.1, %v3881_v46  ;;  %v3754_v50 = vadd.f32 %v3753_v61, %v7179_v24  ;;  %v3885_v4 = vadd.f32 %v3884_v28, %v7183_v9  ;;  %4448 = vmatprep.mubr.bf16.mxu1 %v4106_v51  ;;  %4560 = vmatprep.mubr.bf16.mxu0 %v4108_v52 }
 0x7dd   : > { %v3973_v63 = vmul.f32 0.1, %v3752_v58  ;;  %v3975_v23 = vmul.f32 0.1, %v3883_v60  ;;  %4449 = vmatmul.mubr.bf16.gmra.mrb[168].mxu1 %v4105_v43  ;;  %4561 = vmatmul.mubr.bf16.gmra.mrb[168].mxu0 %v4107_v0  ;;  %v4045_v53 = vmax.f32 %v3748_v14, %v3969_v54  ;;  %v4047_v39 = vmax.f32 %v3879_v49, %v3971_v56 }
 0x7de   : > { %v3974_v5 = vmul.f32 0.1, %v3754_v50  ;;  %v3976_v57 = vmul.f32 0.1, %v3885_v4  ;;  %5434 = vmatpush3.bf16.msra.mxu1 %v7121_v45  ;;  %v4046_v32 = vmax.f32 %v3750_v1, %v3970_v62  ;;  %v4048_v40 = vmax.f32 %v3881_v46, %v3972_v3 }
 0x7df   : > { %v4049_v47 = vmax.f32 %v3752_v58, %v3973_v63  ;;  %v4051_v27 = vmax.f32 %v3883_v60, %v3975_v23  ;;  %5427 = vmatprep.subr.bf16.mxu1 %v7149_v12 }
 0x7e0   : > { %v4050_v26 = vmax.f32 %v3754_v50, %v3974_v5  ;;  %v4052_v7 = vmax.f32 %v3885_v4, %v3976_v57  ;;  %v3757_v34 = vpop.f32.mrb[136].mxu1  ;;  %v3888_v22 = vpop.f32.mrb[136].mxu0 }
 0x7e1   : > { %v3758_v55 = vadd.f32 %v3757_v34, %v7172_v19  ;;  %v3889_v13 = vadd.f32 %v3888_v22, %v7176_v21  ;;  %v3759_v20 = vpop.f32.mrb[137].mxu1  ;;  %v3890_v25 = vpop.f32.mrb[137].mxu0  ;;  %v4109_v2 = vpack.c.bf16 %v4049_v47, %v4045_v53  ;;  %v4111_v45 = vpack.c.bf16 %v4051_v27, %v4047_v39 }
 0x7e2   : > { %v3760_v10 = vadd.f32 %v3759_v20, %v7179_v24  ;;  %v3891_v29 = vadd.f32 %v3890_v25, %v7183_v9  ;;  %v3761_v31 = vpop.f32.mrb[138].mxu1  ;;  %v3892_v12 = vpop.f32.mrb[138].mxu0  ;;  %v4110_v33 = vpack.c.bf16 %v4050_v26, %v4046_v32  ;;  %v4112_v15 = vpack.c.bf16 %v4052_v7, %v4048_v40  ;;  %5435 = vmatpush3.bf16.msra.mxu1 %v7151_v18 }
 0x7e3   : > { %v3977_v6 = vmul.f32 0.1, %v3758_v55  ;;  %v3979_v35 = vmul.f32 0.1, %v3889_v13  ;;  %v3762_v44 = vadd.f32 %v3761_v31, %v7172_v19  ;;  %v3893_v36 = vadd.f32 %v3892_v12, %v7176_v21  ;;  %v3763_v37 = vpop.f32.mrb[139].mxu1  ;;  %v3894_v17 = vpop.f32.mrb[139].mxu0  ;;  %5428 = vmatprep.subr.bf16.mxu1 %v7155_v30 }
 0x7e4   : > { %v3978_v38 = vmul.f32 0.1, %v3760_v10  ;;  %v3980_v14 = vmul.f32 0.1, %v3891_v29  ;;  %v3764_v49 = vadd.f32 %v3763_v37, %v7179_v24  ;;  %v3895_v41 = vadd.f32 %v3894_v17, %v7183_v9  ;;  %4456 = vmatprep.mubr.bf16.mxu1 %v4110_v33  ;;  %4568 = vmatprep.mubr.bf16.mxu0 %v4112_v15 }
 0x7e5   : > { %v3981_v42 = vmul.f32 0.1, %v3762_v44  ;;  %v3983_v18 = vmul.f32 0.1, %v3893_v36  ;;  %4457 = vmatmul.mubr.bf16.gmra.mrb[172].mxu1 %v4109_v2  ;;  %4569 = vmatmul.mubr.bf16.gmra.mrb[172].mxu0 %v4111_v45  ;;  %v4053_v1 = vmax.f32 %v3758_v55, %v3977_v6  ;;  %v4055_v46 = vmax.f32 %v3889_v13, %v3979_v35 }
 0x7e6   : > { %v3982_v43 = vmul.f32 0.1, %v3764_v49  ;;  %v3984_v0 = vmul.f32 0.1, %v3895_v41  ;;  %5436 = vmatpush3.bf16.msra.mxu1 %v7157_v59  ;;  %v4054_v11 = vmax.f32 %v3760_v10, %v3978_v38  ;;  %v4056_v51 = vmax.f32 %v3891_v29, %v3980_v14 }
 0x7e7   : > { %v4057_v48 = vmax.f32 %v3762_v44, %v3981_v42  ;;  %v4059_v30 = vmax.f32 %v3893_v36, %v3983_v18  ;;  %5429 = vmatprep.subr.bf16.mxu1 %v7161_v8 }
 0x7e8   : > { %v4058_v52 = vmax.f32 %v3764_v49, %v3982_v43  ;;  %v4060_v54 = vmax.f32 %v3895_v41, %v3984_v0  ;;  %v3767_v56 = vpop.f32.mrb[140].mxu1  ;;  %v3898_v58 = vpop.f32.mrb[140].mxu0 }
 0x7e9   : > { %v3768_v60 = vadd.f32 %v3767_v56, %v7172_v19  ;;  %v3899_v61 = vadd.f32 %v3898_v58, %v7176_v21  ;;  %v3769_v28 = vpop.f32.mrb[141].mxu1  ;;  %v3900_v62 = vpop.f32.mrb[141].mxu0  ;;  %v4113_v3 = vpack.c.bf16 %v4057_v48, %v4053_v1  ;;  %v4115_v59 = vpack.c.bf16 %v4059_v30, %v4055_v46 }
 0x7ea   : > { %v3770_v50 = vadd.f32 %v3769_v28, %v7179_v24  ;;  %v3901_v4 = vadd.f32 %v3900_v62, %v7183_v9  ;;  %v3771_v63 = vpop.f32.mrb[142].mxu1  ;;  %v3902_v8 = vpop.f32.mrb[142].mxu0  ;;  %v4114_v23 = vpack.c.bf16 %v4058_v52, %v4054_v11  ;;  %v4116_v5 = vpack.c.bf16 %v4060_v54, %v4056_v51  ;;  %5437 = vmatpush3.bf16.msra.mxu1 %v7163_v16 }
 0x7eb   : > { %v3985_v57 = vmul.f32 0.1, %v3768_v60  ;;  %v3987_v53 = vmul.f32 0.1, %v3899_v61  ;;  %v3772_v39 = vadd.f32 %v3771_v63, %v7172_v19  ;;  %v3903_v47 = vadd.f32 %v3902_v8, %v7176_v21  ;;  %v3773_v27 = vpop.f32.mrb[143].mxu1  ;;  %v3904_v32 = vpop.f32.mrb[143].mxu0 }
 0x7ec   : > { %v3986_v40 = vmul.f32 0.1, %v3770_v50  ;;  %v3988_v26 = vmul.f32 0.1, %v3901_v4  ;;  %v3774_v7 = vadd.f32 %v3773_v27, %v7179_v24  ;;  %v3905_v34 = vadd.f32 %v3904_v32, %v7183_v9  ;;  %4464 = vmatprep.mubr.bf16.mxu1 %v4114_v23  ;;  %4576 = vmatprep.mubr.bf16.mxu0 %v4116_v5 }
 0x7ed   : > { %v3989_v22 = vmul.f32 0.1, %v3772_v39  ;;  %v3991_v55 = vmul.f32 0.1, %v3903_v47  ;;  %4465 = vmatmul.mubr.bf16.gmra.mrb[176].mxu1 %v4113_v3  ;;  %4577 = vmatmul.mubr.bf16.gmra.mrb[176].mxu0 %v4115_v59  ;;  %v4061_v20 = vmax.f32 %v3768_v60, %v3985_v57  ;;  %v4063_v25 = vmax.f32 %v3899_v61, %v3987_v53 }
 0x7ee   : > { %v3990_v16 = vmul.f32 0.1, %v3774_v7  ;;  %v3992_v13 = vmul.f32 0.1, %v3905_v34  ;;  %v4062_v10 = vmax.f32 %v3770_v50, %v3986_v40  ;;  %v4064_v29 = vmax.f32 %v3901_v4, %v3988_v26 }
 0x7ef   : > { %v4065_v2 = vmax.f32 %v3772_v39, %v3989_v22  ;;  %v4067_v45 = vmax.f32 %v3903_v47, %v3991_v55 }
 0x7f0   : > { %v4066_v31 = vmax.f32 %v3774_v7, %v3990_v16  ;;  %v4068_v12 = vmax.f32 %v3905_v34, %v3992_v13  ;;  %v3777_v33 = vpop.f32.mrb[144].mxu1  ;;  %v3908_v15 = vpop.f32.mrb[144].mxu0 }
 0x7f1   : > { %v3778_v6 = vadd.f32 %v3777_v33, %v7172_v19  ;;  %v3909_v35 = vadd.f32 %v3908_v15, %v7176_v21  ;;  %v3779_v44 = vpop.f32.mrb[145].mxu1  ;;  %v3910_v36 = vpop.f32.mrb[145].mxu0  ;;  %v4117_v37 = vpack.c.bf16 %v4065_v2, %v4061_v20  ;;  %v4119_v17 = vpack.c.bf16 %v4067_v45, %v4063_v25 }
 0x7f2   : > { %v3780_v38 = vadd.f32 %v3779_v44, %v7179_v24  ;;  %v3911_v14 = vadd.f32 %v3910_v36, %v7183_v9  ;;  %v3781_v49 = vpop.f32.mrb[146].mxu1  ;;  %v3912_v41 = vpop.f32.mrb[146].mxu0  ;;  %v4118_v42 = vpack.c.bf16 %v4066_v31, %v4062_v10  ;;  %v4120_v18 = vpack.c.bf16 %v4068_v12, %v4064_v29 }
 0x7f3   : > { %v3993_v43 = vmul.f32 0.1, %v3778_v6  ;;  %v3995_v0 = vmul.f32 0.1, %v3909_v35  ;;  %v3782_v1 = vadd.f32 %v3781_v49, %v7172_v19  ;;  %v3913_v46 = vadd.f32 %v3912_v41, %v7176_v21  ;;  %v3783_v48 = vpop.f32.mrb[147].mxu1  ;;  %v3914_v30 = vpop.f32.mrb[147].mxu0 }
 0x7f4   : > { %v3994_v11 = vmul.f32 0.1, %v3780_v38  ;;  %v3996_v51 = vmul.f32 0.1, %v3911_v14  ;;  %v3784_v52 = vadd.f32 %v3783_v48, %v7179_v24  ;;  %v3915_v54 = vadd.f32 %v3914_v30, %v7183_v9  ;;  %4472 = vmatprep.mubr.bf16.mxu1 %v4118_v42  ;;  %4584 = vmatprep.mubr.bf16.mxu0 %v4120_v18 }
 0x7f5   : > { %v3997_v56 = vmul.f32 0.1, %v3782_v1  ;;  %v3999_v58 = vmul.f32 0.1, %v3913_v46  ;;  %4473 = vmatmul.mubr.bf16.gmra.mrb[180].mxu1 %v4117_v37  ;;  %4585 = vmatmul.mubr.bf16.gmra.mrb[180].mxu0 %v4119_v17  ;;  %v4069_v28 = vmax.f32 %v3778_v6, %v3993_v43  ;;  %v4071_v62 = vmax.f32 %v3909_v35, %v3995_v0 }
 0x7f6   : > { %v3998_v60 = vmul.f32 0.1, %v3784_v52  ;;  %v4000_v61 = vmul.f32 0.1, %v3915_v54  ;;  %v4070_v50 = vmax.f32 %v3780_v38, %v3994_v11  ;;  %v4072_v4 = vmax.f32 %v3911_v14, %v3996_v51 }
 0x7f7   : > { %v4073_v3 = vmax.f32 %v3782_v1, %v3997_v56  ;;  %v4075_v59 = vmax.f32 %v3913_v46, %v3999_v58 }
 0x7f8   : > { %v4074_v63 = vmax.f32 %v3784_v52, %v3998_v60  ;;  %v4076_v8 = vmax.f32 %v3915_v54, %v4000_v61  ;;  %v3787_v23 = vpop.f32.mrb[148].mxu1  ;;  %v3918_v5 = vpop.f32.mrb[148].mxu0 }
 0x7f9   : > { %v3788_v57 = vadd.f32 %v3787_v23, %v7172_v19  ;;  %v3919_v53 = vadd.f32 %v3918_v5, %v7176_v21  ;;  %v3789_v39 = vpop.f32.mrb[149].mxu1  ;;  %v3920_v47 = vpop.f32.mrb[149].mxu0  ;;  %v4121_v27 = vpack.c.bf16 %v4073_v3, %v4069_v28  ;;  %v4123_v32 = vpack.c.bf16 %v4075_v59, %v4071_v62 }
 0x7fa   : > { %v3790_v40 = vadd.f32 %v3789_v39, %v7179_v24  ;;  %v3921_v26 = vadd.f32 %v3920_v47, %v7183_v9  ;;  %v3791_v7 = vpop.f32.mrb[150].mxu1  ;;  %v3922_v34 = vpop.f32.mrb[150].mxu0  ;;  %v4122_v22 = vpack.c.bf16 %v4074_v63, %v4070_v50  ;;  %v4124_v55 = vpack.c.bf16 %v4076_v8, %v4072_v4 }
 0x7fb   : > { %v4001_v16 = vmul.f32 0.1, %v3788_v57  ;;  %v4003_v13 = vmul.f32 0.1, %v3919_v53  ;;  %v3792_v20 = vadd.f32 %v3791_v7, %v7172_v19  ;;  %v3923_v25 = vadd.f32 %v3922_v34, %v7176_v21  ;;  %v3793_v2 = vpop.f32.mrb[151].mxu1  ;;  %v3924_v45 = vpop.f32.mrb[151].mxu0 }
 0x7fc   : > { %v4002_v10 = vmul.f32 0.1, %v3790_v40  ;;  %v4004_v29 = vmul.f32 0.1, %v3921_v26  ;;  %v3794_v31 = vadd.f32 %v3793_v2, %v7179_v24  ;;  %v3925_v12 = vadd.f32 %v3924_v45, %v7183_v9  ;;  %4480 = vmatprep.mubr.bf16.mxu1 %v4122_v22  ;;  %4592 = vmatprep.mubr.bf16.mxu0 %v4124_v55 }
 0x7fd   : > { %v4005_v33 = vmul.f32 0.1, %v3792_v20  ;;  %v4007_v15 = vmul.f32 0.1, %v3923_v25  ;;  %4481 = vmatmul.mubr.bf16.gmra.mrb[184].mxu1 %v4121_v27  ;;  %4593 = vmatmul.mubr.bf16.gmra.mrb[184].mxu0 %v4123_v32  ;;  %v4077_v44 = vmax.f32 %v3788_v57, %v4001_v16  ;;  %v4079_v36 = vmax.f32 %v3919_v53, %v4003_v13 }
 0x7fe   : > { %v4006_v6 = vmul.f32 0.1, %v3794_v31  ;;  %v4008_v35 = vmul.f32 0.1, %v3925_v12  ;;  %v4078_v38 = vmax.f32 %v3790_v40, %v4002_v10  ;;  %v4080_v14 = vmax.f32 %v3921_v26, %v4004_v29 }
 0x7ff   : > { %v4081_v37 = vmax.f32 %v3792_v20, %v4005_v33  ;;  %v4083_v17 = vmax.f32 %v3923_v25, %v4007_v15 }
 0x800   : > { %v4082_v49 = vmax.f32 %v3794_v31, %v4006_v6  ;;  %v4084_v41 = vmax.f32 %v3925_v12, %v4008_v35  ;;  %v3797_v42 = vpop.f32.mrb[152].mxu1  ;;  %v3928_v18 = vpop.f32.mrb[152].mxu0 }
 0x801   : > { %v4127_v43 = vpack.c.bf16 %v4083_v17, %v4079_v36  ;;  %v3798_v0 = vadd.f32 %v3797_v42, %v7172_v19  ;;  %v3929_v1 = vadd.f32 %v3928_v18, %v7176_v21  ;;  %v3799_v46 = vpop.f32.mrb[153].mxu1  ;;  %v3930_v48 = vpop.f32.mrb[153].mxu0  ;;  %v4125_v30 = vpack.c.bf16 %v4081_v37, %v4077_v44 }
 0x802   : > { %v3800_v11 = vadd.f32 %v3799_v46, %v7179_v24  ;;  %v3931_v51 = vadd.f32 %v3930_v48, %v7183_v9  ;;  %v3801_v52 = vpop.f32.mrb[154].mxu1  ;;  %v3932_v54 = vpop.f32.mrb[154].mxu0  ;;  %v4126_v56 = vpack.c.bf16 %v4082_v49, %v4078_v38  ;;  %v4128_v58 = vpack.c.bf16 %v4084_v41, %v4080_v14 }
 0x803   : > { %v4009_v60 = vmul.f32 0.1, %v3798_v0  ;;  %v4011_v61 = vmul.f32 0.1, %v3929_v1  ;;  %v3802_v28 = vadd.f32 %v3801_v52, %v7172_v19  ;;  %v3933_v62 = vadd.f32 %v3932_v54, %v7176_v21  ;;  %v3803_v3 = vpop.f32.mrb[155].mxu1  ;;  %v3934_v59 = vpop.f32.mrb[155].mxu0 }
 0x804   : > { %v4010_v50 = vmul.f32 0.1, %v3800_v11  ;;  %v4012_v4 = vmul.f32 0.1, %v3931_v51  ;;  %v3804_v63 = vadd.f32 %v3803_v3, %v7179_v24  ;;  %v3935_v8 = vadd.f32 %v3934_v59, %v7183_v9  ;;  %4488 = vmatprep.mubr.bf16.mxu1 %v4126_v56 }
 0x805   : > { %v4013_v23 = vmul.f32 0.1, %v3802_v28  ;;  %v4015_v5 = vmul.f32 0.1, %v3933_v62  ;;  %4489 = vmatmul.mubr.bf16.gmra.mrb[188].mxu1 %v4125_v30  ;;  %v4085_v39 = vmax.f32 %v3798_v0, %v4009_v60  ;;  %v4087_v47 = vmax.f32 %v3929_v1, %v4011_v61 }
 0x806   : > { %v4014_v57 = vmul.f32 0.1, %v3804_v63  ;;  %v4016_v53 = vmul.f32 0.1, %v3935_v8  ;;  %v4086_v40 = vmax.f32 %v3800_v11, %v4010_v50  ;;  %v4088_v26 = vmax.f32 %v3931_v51, %v4012_v4 }
 0x807   : > { %v4089_v27 = vmax.f32 %v3802_v28, %v4013_v23  ;;  %v4091_v32 = vmax.f32 %v3933_v62, %v4015_v5 }
 0x808   : > { %v4090_v7 = vmax.f32 %v3804_v63, %v4014_v57  ;;  %v4092_v34 = vmax.f32 %v3935_v8, %v4016_v53  ;;  %v3807_v22 = vpop.f32.mrb[156].mxu1  ;;  %v3938_v55 = vpop.f32.mrb[156].mxu0 }
 0x809   : > { %v3808_v16 = vadd.f32 %v3807_v22, %v7172_v19  ;;  %v3809_v13 = vpop.f32.mrb[157].mxu1  ;;  %v3940_v20 = vpop.f32.mrb[157].mxu0  ;;  %v4129_v25 = vpack.c.bf16 %v4089_v27, %v4085_v39  ;;  %v4131_v2 = vpack.c.bf16 %v4091_v32, %v4087_v47  ;;  %v3939_v38 = vadd.f32 %v3938_v55, %v7176_v21 }
 0x80a   : > { %v3810_v45 = vadd.f32 %v3809_v13, %v7179_v24  ;;  %v3811_v10 = vpop.f32.mrb[158].mxu1  ;;  %v3942_v29 = vpop.f32.mrb[158].mxu0  ;;  %v4130_v31 = vpack.c.bf16 %v4090_v7, %v4086_v40  ;;  %v4132_v12 = vpack.c.bf16 %v4092_v34, %v4088_v26  ;;  %v3941_v17 = vadd.f32 %v3940_v20, %v7183_v9  ;;  %v7279_v9 = vld [vmem:[%s7452_s20] ss:$0 sm:$0xff] }
 0x80b   : > { %v4017_v33 = vmul.f32 0.1, %v3808_v16  ;;  %v3812_v15 = vpop.f32.mrb[159].mxu1  ;;  %v3943_v6 = vpop.f32.mrb[159].mxu0  ;;  %v4019_v49 = vmul.f32 0.1, %v3939_v38 }
 0x80c   : > { %v4018_v35 = vmul.f32 0.1, %v3810_v45  ;;  %4496 = vmatprep.mubr.bf16.mxu1 %v4130_v31  ;;  %v4020_v24 = vmul.f32 0.1, %v3941_v17 }
 0x80d   : > { %4497 = vmatmul.mubr.bf16.gmra.mrb[192].mxu1 %v4129_v25  ;;  %v4093_v36 = vmax.f32 %v3808_v16, %v4017_v33  ;;  %v4095_v42 = vmax.f32 %v3939_v38, %v4019_v49 }
 0x80e   : > { %v4094_v44 = vmax.f32 %v3810_v45, %v4018_v35  ;;  %v4096_v14 = vmax.f32 %v3941_v17, %v4020_v24 }
 0x80f   : > { %v4133_v19 = vpack.c.bf16 %v4093_v36, %v4093_v36  ;;  %v4135_v18 = vpack.c.bf16 %v4095_v42, %v4095_v42 }
 0x810   : > { %v4134_v37 = vpack.c.bf16 %v4094_v44, %v4094_v44  ;;  %v4136_v41 = vpack.c.bf16 %v4096_v14, %v4096_v14 }
 0x812   : > { %4504 = vmatprep.mubr.bf16.mxu1 %v4134_v37 }
 0x815   : > { %4505 = vmatmul.mubr.bf16.gmra.mrb[196].mxu1 %v4133_v19 }
 0x816   : > { %4600 = vmatprep.mubr.bf16.mxu1 %v4128_v58 }
 0x81d   : > { %4601 = vmatmul.mubr.bf16.vlgmr.msra.gmra.mrb[200].mxu1 %v4127_v43 }
 0x81e   : > { %4608 = vmatprep.mubr.bf16.mxu1 %v4132_v12 }
 0x825   : > { %4609 = vmatmul.mubr.bf16.gmra.mrb[204].mxu1 %v4131_v2 }
 0x826   : > { %4616 = vmatprep.mubr.bf16.mxu1 %v4136_v41 }
 0x82d   : > { %4617 = vmatmul.mubr.bf16.gmra.mrb[208].mxu1 %v4135_v18 }
 0x8a0   : > { %v5214_v0 = vpop.f32.mrb[160].mxu1  ;;  %v5290_v1 = vpop.f32.mrb[160].mxu0 }
 0x8a1   : > { %v5215_v46 = vpop.f32.mrb[161].mxu1  ;;  %v5291_v43 = vpop.f32.mrb[161].mxu0 }
 0x8a2   : > { %v5216_v48 = vadd.f32 %v5215_v46, %v5214_v0  ;;  %v5292_v21 = vadd.f32 %v5291_v43, %v5290_v1  ;;  %v5217_v30 = vpop.f32.mrb[162].mxu1  ;;  %v5293_v11 = vpop.f32.mrb[162].mxu0 }
 0x8a3   : > { %v5218_v51 = vpop.f32.mrb[163].mxu1  ;;  %v5294_v52 = vpop.f32.mrb[163].mxu0 }
 0x8a4   : > { %v4435_v54 = vadd.f32 %v5216_v48, %v7279_v9  ;;  %v5219_v56 = vadd.f32 %v5218_v51, %v5217_v30  ;;  %v5295_v58 = vadd.f32 %v5294_v52, %v5293_v11 }
 0x8a6   : > { %v4547_v60 = vadd.f32 %v5292_v21, %v4435_v54  ;;  %v4438_v61 = vadd.f32 %v5219_v56, %v7279_v9 }
 0x8a8   : > { %4624 = vst [vmem:[%s7284_s17] sm:$0xff] %v4547_v60  ;;  %v4550_v28 = vadd.f32 %v5295_v58, %v4438_v61  ;;  %v5220_v62 = vpop.f32.mrb[164].mxu1  ;;  %v5296_v3 = vpop.f32.mrb[164].mxu0 }
 0x8a9   : > { %v5221_v59 = vpop.f32.mrb[165].mxu1  ;;  %v5297_v50 = vpop.f32.mrb[165].mxu0 }
 0x8aa   : > { %4625 = vst [vmem:[%s7284_s17 + $0x8] sm:$0xff] %v4550_v28  ;;  %v5222_v4 = vadd.f32 %v5221_v59, %v5220_v62  ;;  %v5298_v63 = vadd.f32 %v5297_v50, %v5296_v3  ;;  %v5223_v8 = vpop.f32.mrb[166].mxu1  ;;  %v5299_v23 = vpop.f32.mrb[166].mxu0 }
 0x8ab   : > { %v5224_v5 = vpop.f32.mrb[167].mxu1  ;;  %v5300_v57 = vpop.f32.mrb[167].mxu0 }
 0x8ac   : > { %v4443_v53 = vadd.f32 %v5222_v4, %v7279_v9  ;;  %v5225_v39 = vadd.f32 %v5224_v5, %v5223_v8  ;;  %v5301_v47 = vadd.f32 %v5300_v57, %v5299_v23 }
 0x8ae   : > { %v4555_v27 = vadd.f32 %v5298_v63, %v4443_v53  ;;  %v4446_v32 = vadd.f32 %v5225_v39, %v7279_v9 }
 0x8b0   : > { %4626 = vst [vmem:[%s7284_s17 + $0x10] sm:$0xff] %v4555_v27  ;;  %v4558_v40 = vadd.f32 %v5301_v47, %v4446_v32  ;;  %v5226_v26 = vpop.f32.mrb[168].mxu1  ;;  %v5302_v7 = vpop.f32.mrb[168].mxu0 }
 0x8b1   : > { %v5227_v34 = vpop.f32.mrb[169].mxu1  ;;  %v5303_v22 = vpop.f32.mrb[169].mxu0 }
 0x8b2   : > { %4627 = vst [vmem:[%s7284_s17 + $0x18] sm:$0xff] %v4558_v40  ;;  %v5228_v55 = vadd.f32 %v5227_v34, %v5226_v26  ;;  %v5304_v16 = vadd.f32 %v5303_v22, %v5302_v7  ;;  %v5229_v13 = vpop.f32.mrb[170].mxu1  ;;  %v5305_v20 = vpop.f32.mrb[170].mxu0 }
 0x8b3   : > { %v5230_v25 = vpop.f32.mrb[171].mxu1  ;;  %v5306_v2 = vpop.f32.mrb[171].mxu0 }
 0x8b4   : > { %v4451_v45 = vadd.f32 %v5228_v55, %v7279_v9  ;;  %v5231_v10 = vadd.f32 %v5230_v25, %v5229_v13  ;;  %v5307_v29 = vadd.f32 %v5306_v2, %v5305_v20 }
 0x8b6   : > { %v4563_v31 = vadd.f32 %v5304_v16, %v4451_v45  ;;  %v4454_v12 = vadd.f32 %v5231_v10, %v7279_v9 }
 0x8b8   : > { %4628 = vst [vmem:[%s7284_s17 + $0x20] sm:$0xff] %v4563_v31  ;;  %v4566_v33 = vadd.f32 %v5307_v29, %v4454_v12  ;;  %v5232_v15 = vpop.f32.mrb[172].mxu1  ;;  %v5308_v6 = vpop.f32.mrb[172].mxu0 }
 0x8b9   : > { %v5233_v35 = vpop.f32.mrb[173].mxu1  ;;  %v5309_v44 = vpop.f32.mrb[173].mxu0 }
 0x8ba   : > { %4629 = vst [vmem:[%s7284_s17 + $0x28] sm:$0xff] %v4566_v33  ;;  %v5234_v36 = vadd.f32 %v5233_v35, %v5232_v15  ;;  %v5310_v37 = vadd.f32 %v5309_v44, %v5308_v6  ;;  %v5235_v19 = vpop.f32.mrb[174].mxu1  ;;  %v5311_v17 = vpop.f32.mrb[174].mxu0 }
 0x8bb   : > { %v5236_v24 = vpop.f32.mrb[175].mxu1  ;;  %v5312_v38 = vpop.f32.mrb[175].mxu0 }
 0x8bc   : > { %v4459_v14 = vadd.f32 %v5234_v36, %v7279_v9  ;;  %v5237_v49 = vadd.f32 %v5236_v24, %v5235_v19  ;;  %v5313_v41 = vadd.f32 %v5312_v38, %v5311_v17 }
 0x8be   : > { %v4571_v42 = vadd.f32 %v5310_v37, %v4459_v14  ;;  %v4462_v18 = vadd.f32 %v5237_v49, %v7279_v9 }
 0x8c0   : > { %4630 = vst [vmem:[%s7284_s17 + $0x30] sm:$0xff] %v4571_v42  ;;  %v4574_v0 = vadd.f32 %v5313_v41, %v4462_v18  ;;  %v5238_v1 = vpop.f32.mrb[176].mxu1  ;;  %v5314_v46 = vpop.f32.mrb[176].mxu0 }
 0x8c1   : > { %v5239_v43 = vpop.f32.mrb[177].mxu1  ;;  %v5315_v48 = vpop.f32.mrb[177].mxu0 }
 0x8c2   : > { %4631 = vst [vmem:[%s7284_s17 + $0x38] sm:$0xff] %v4574_v0  ;;  %v5240_v21 = vadd.f32 %v5239_v43, %v5238_v1  ;;  %v5316_v30 = vadd.f32 %v5315_v48, %v5314_v46  ;;  %v5241_v11 = vpop.f32.mrb[178].mxu1  ;;  %v5317_v51 = vpop.f32.mrb[178].mxu0 }
 0x8c3   : > { %v5242_v52 = vpop.f32.mrb[179].mxu1  ;;  %v5318_v54 = vpop.f32.mrb[179].mxu0 }
 0x8c4   : > { %v4467_v56 = vadd.f32 %v5240_v21, %v7279_v9  ;;  %v5243_v58 = vadd.f32 %v5242_v52, %v5241_v11  ;;  %v5319_v60 = vadd.f32 %v5318_v54, %v5317_v51 }
 0x8c6   : > { %v4579_v61 = vadd.f32 %v5316_v30, %v4467_v56  ;;  %v4470_v28 = vadd.f32 %v5243_v58, %v7279_v9 }
 0x8c8   : > { %4632 = vst [vmem:[%s7284_s17 + $0x40] sm:$0xff] %v4579_v61  ;;  %v4582_v62 = vadd.f32 %v5319_v60, %v4470_v28  ;;  %v5244_v3 = vpop.f32.mrb[180].mxu1  ;;  %v5320_v59 = vpop.f32.mrb[180].mxu0 }
 0x8c9   : > { %v5245_v50 = vpop.f32.mrb[181].mxu1  ;;  %v5321_v4 = vpop.f32.mrb[181].mxu0 }
 0x8ca   : > { %4633 = vst [vmem:[%s7284_s17 + $0x48] sm:$0xff] %v4582_v62  ;;  %v5246_v63 = vadd.f32 %v5245_v50, %v5244_v3  ;;  %v5322_v8 = vadd.f32 %v5321_v4, %v5320_v59  ;;  %v5247_v23 = vpop.f32.mrb[182].mxu1  ;;  %v5323_v5 = vpop.f32.mrb[182].mxu0 }
 0x8cb   : > { %v5248_v57 = vpop.f32.mrb[183].mxu1  ;;  %v5324_v53 = vpop.f32.mrb[183].mxu0 }
 0x8cc   : > { %v4475_v39 = vadd.f32 %v5246_v63, %v7279_v9  ;;  %v5249_v47 = vadd.f32 %v5248_v57, %v5247_v23  ;;  %v5325_v27 = vadd.f32 %v5324_v53, %v5323_v5 }
 0x8ce   : > { %v4587_v32 = vadd.f32 %v5322_v8, %v4475_v39  ;;  %v4478_v40 = vadd.f32 %v5249_v47, %v7279_v9 }
 0x8d0   : > { %4634 = vst [vmem:[%s7284_s17 + $0x50] sm:$0xff] %v4587_v32  ;;  %v4590_v26 = vadd.f32 %v5325_v27, %v4478_v40  ;;  %v5250_v7 = vpop.f32.mrb[184].mxu1  ;;  %v5326_v34 = vpop.f32.mrb[184].mxu0 }
 0x8d1   : > { %v5251_v22 = vpop.f32.mrb[185].mxu1  ;;  %v5327_v55 = vpop.f32.mrb[185].mxu0 }
 0x8d2   : > { %4635 = vst [vmem:[%s7284_s17 + $0x58] sm:$0xff] %v4590_v26  ;;  %v5252_v16 = vadd.f32 %v5251_v22, %v5250_v7  ;;  %v5328_v13 = vadd.f32 %v5327_v55, %v5326_v34  ;;  %v5253_v20 = vpop.f32.mrb[186].mxu1  ;;  %v5329_v25 = vpop.f32.mrb[186].mxu0 }
 0x8d3   : > { %v5254_v2 = vpop.f32.mrb[187].mxu1  ;;  %v5330_v45 = vpop.f32.mrb[187].mxu0 }
 0x8d4   : > { %v4483_v10 = vadd.f32 %v5252_v16, %v7279_v9  ;;  %v5255_v29 = vadd.f32 %v5254_v2, %v5253_v20  ;;  %v5331_v31 = vadd.f32 %v5330_v45, %v5329_v25 }
 0x8d6   : > { %v4595_v12 = vadd.f32 %v5328_v13, %v4483_v10  ;;  %v4486_v33 = vadd.f32 %v5255_v29, %v7279_v9 }
 0x8d8   : > { %4636 = vst [vmem:[%s7284_s17 + $0x60] sm:$0xff] %v4595_v12  ;;  %v4598_v15 = vadd.f32 %v5331_v31, %v4486_v33  ;;  %v5256_v6 = vpop.f32.mrb[188].mxu1 }
 0x8d9   : > { %v5257_v35 = vpop.f32.mrb[189].mxu1 }
 0x8da   : > { %4637 = vst [vmem:[%s7284_s17 + $0x68] sm:$0xff] %v4598_v15  ;;  %v5258_v44 = vadd.f32 %v5257_v35, %v5256_v6  ;;  %v5259_v36 = vpop.f32.mrb[190].mxu1 }
 0x8db   : > { %v5260_v37 = vpop.f32.mrb[191].mxu1 }
 0x8dc   : > { %v5261_v19 = vadd.f32 %v5260_v37, %v5259_v36  ;;  %v4491_v21 = vadd.f32 %v5258_v44, %v7279_v9 }
 0x8de   : > { %v4494_v52 = vadd.f32 %v5261_v19, %v7279_v9 }
 0x8e0   : > { %v5262_v17 = vpop.f32.mrb[192].mxu1 }
 0x8e1   : > { %v5263_v24 = vpop.f32.mrb[193].mxu1 }
 0x8e2   : > { %v5264_v38 = vadd.f32 %v5263_v24, %v5262_v17  ;;  %v5265_v14 = vpop.f32.mrb[194].mxu1 }
 0x8e3   : > { %v5266_v49 = vpop.f32.mrb[195].mxu1 }
 0x8e4   : > { %v5267_v41 = vadd.f32 %v5266_v49, %v5265_v14  ;;  %v4499_v28 = vadd.f32 %v5264_v38, %v7279_v9 }
 0x8e6   : > { %v4502_v50 = vadd.f32 %v5267_v41, %v7279_v9 }
 0x8e8   : > { %v5268_v42 = vpop.f32.mrb[196].mxu1 }
 0x8e9   : > { %v5269_v18 = vpop.f32.mrb[197].mxu1 }
 0x8ea   : > { %v5270_v0 = vadd.f32 %v5269_v18, %v5268_v42  ;;  %v5271_v1 = vpop.f32.mrb[198].mxu1 }
 0x8eb   : > { %v5272_v46 = vpop.f32.mrb[199].mxu1 }
 0x8ec   : > { %v4507_v57 = vadd.f32 %v5270_v0, %v7279_v9 }
 0x8f0   : > { %v5332_v43 = vpop.f32.mrb[200].mxu1 }
 0x8f1   : > { %v5333_v48 = vpop.f32.mrb[201].mxu1 }
 0x8f2   : > { %v5334_v30 = vadd.f32 %v5333_v48, %v5332_v43  ;;  %v5335_v11 = vpop.f32.mrb[202].mxu1 }
 0x8f3   : > { %v5336_v51 = vpop.f32.mrb[203].mxu1 }
 0x8f4   : > { %v4603_v54 = vadd.f32 %v5334_v30, %v4491_v21  ;;  %v5337_v56 = vadd.f32 %v5336_v51, %v5335_v11 }
 0x8f6   : > { %4638 = vst [vmem:[%s7284_s17 + $0x70] sm:$0xff] %v4603_v54  ;;  %v4606_v58 = vadd.f32 %v5337_v56, %v4494_v52 }
 0x8f8   : > { %4639 = vst [vmem:[%s7284_s17 + $0x78] sm:$0xff] %v4606_v58  ;;  %v5338_v60 = vpop.f32.mrb[204].mxu1 }
 0x8f9   : > { %v5339_v61 = vpop.f32.mrb[205].mxu1 }
 0x8fa   : > { %v5340_v62 = vadd.f32 %v5339_v61, %v5338_v60  ;;  %v5341_v3 = vpop.f32.mrb[206].mxu1 }
 0x8fb   : > { %v5342_v59 = vpop.f32.mrb[207].mxu1 }
 0x8fc   : > { %v4611_v4 = vadd.f32 %v5340_v62, %v4499_v28  ;;  %v5343_v63 = vadd.f32 %v5342_v59, %v5341_v3 }
 0x8fe   : > { %4640 = vst [vmem:[%s7284_s17 + $0x80] sm:$0xff] %v4611_v4  ;;  %v4614_v8 = vadd.f32 %v5343_v63, %v4502_v50 }
 0x900   : > { %4641 = vst [vmem:[%s7284_s17 + $0x88] sm:$0xff] %v4614_v8  ;;  %v5344_v23 = vpop.f32.mrb[208].mxu1 }
 0x901   : > { %v5345_v5 = vpop.f32.mrb[209].mxu1 }
 0x902   : > { %v5346_v53 = vadd.f32 %v5345_v5, %v5344_v23  ;;  %v5347_v39 = vpop.f32.mrb[210].mxu1 }
 0x903   : > { %v5348_v47 = vpop.f32.mrb[211].mxu1 }
 0x904   : > { %v4619_v27 = vadd.f32 %v5346_v53, %v4507_v57 }
 0x906   : > { %4642 = vst [vmem:[%s7284_s17 + $0x90] sm:$0xff] %v4619_v27 }
 0x907   : > { %6260 = shalt.err (!%p6257_p9)
}
 0x908   : > { %s6261_s22 = scalar_lea.hbm %s7326_s21, 2432  ;;  %s6265_s20 = scalar_lea.hbm %s7453_s11, 4864 }
 0x909   : > { %p6262_p4 = scmp.ne.s32.totalorder %s7326_s21, %s6261_s22  ;;  %p6266_p2 = scmp.lt.u32.totalorder %s7326_s21, %s7453_s11 }
 0x90a   : > { %p6267_p0 = scmp.lt.u32.totalorder %s6265_s20, %s6261_s22  ;;  %p6269_p10 = scmp.lt.u32.totalorder %s6261_s22, %s7326_s21 }
 0x90b   : > { %p6263_p3 = pnand %p6262_p4, %p7454_p1 }
 0x90c   : > { %p6268_p5 = por %p6267_p0, %p6266_p2 }
 0x90d   : > { %p6264_p6 = pneg %p6263_p3 }
 0x90e   : > { %p6270_p11 = por %p6269_p10, %p6268_p5 }
 0x910   : > { %p6271_p12 = pnand %p6270_p11, %p6264_p6 }
 0x912   : > { %6274 = shalt.err (!%p6271_p12)
}
 0x913   : > { %s6348_s10 = smov 128   ;;  %s6349_s1 = smov 8  }
 0x914   : > { %5553 = dma.vmem_to_hbm [thread:$0]  (%p7454_p1), %s7328_s19, 2432, %s7326_s21, %s4644_s0, %s6348_s10, %s6348_s10, %s6349_s1  }
 0x915 PF: > { %s4672_s7 = sand.u32 1, %s6317_s24   ;;  %p7455_p13 = scmp.ne.s32.totalorder %s7434_s6, 0 }
 0x916   : > { %p7456_p8 = scmp.ge.s32.totalorder %s6329_s27, 2  ;;  %s4673_s23 = scalar_lea.sflag [#allocation4], %s4672_s7 }
 0x918   : > { %p5585_p7 = pnand %p7456_p8, %p7455_p13 }
 0x91a   : > { %6312 = dma.done.wait (!%p5585_p7), %s4673_s23, 2432  }
 0x91b   : > { %6314 = vsyncadd (!%p5585_p7), %s4673_s23, 4294964864  ;;  %p34_p9 = scmp.ge.s32.totalorder %s6672_s18, 4   ;;  %s7457_s24 = smov %s6321_s25 }
 0x91c   : > { %s7458_s25 = smov %s6325_s26  ;;  %s7459_s26 = smov %s6683_s4 }
 0x91d   : > { %s7460_s27 = smov %s6672_s18  ;;  %36 = sbr.rel (!%p34_p9) target bundleno = 25 (0x19), region = 165 }
 0x924   :  { %4678 = vsyncpa [#allocation3], 1 }
 0x925   :  { %4680 = vsyncpa [#allocation3 + $0x1], 1 }
 0x926   :  { %4681 = vsyncpa [#allocation6], 1 }
 0x927   :  { %4682 = vsyncpa [#allocation9], 1 }
 0x928   :  { %4683 = vsyncpa [#allocation12], 1 }
 0x929   :  { %4684 = vsyncpa [#allocation15], 1 }
 0x92a   :  { %4685 = vsyncpa [#allocation4], 1 }
 0x92b   :  { %4687 = vsyncpa [#allocation4 + $0x1], 1 }

</bundles_post_ra>
